<compile_context>
chip_gen: v7x
topology: tpu7x:2x2x1
jax: 0.10.0
libtpu: 0.0.40
codegen_flags: <defaults>
</compile_context>

<pallas_src>
import functools
import math

import jax
import jax.numpy as jnp
from jax.experimental import pallas as pl
from jax.experimental.pallas import tpu as pltpu


def _round_up(x, m):
    return ((x + m - 1) // m) * m


# ----------------------------------------------------------------------------
# Kernel body: one full linear head  out = x @ W + b   (single grid step/head)
# Shapes seen by the kernel (after Squeezed head axis in the fused case):
#   x_ref: (Bp, K)   w_ref: (K, Np)   b_ref: (1, Np)   o_ref: (Bp, Np)
# ----------------------------------------------------------------------------
def _linear_head_kernel(x_ref, w_ref, b_ref, o_ref):
    o_ref[...] = (
        jnp.dot(x_ref[...], w_ref[...], preferred_element_type=jnp.float32)
        + b_ref[...]
    ).astype(o_ref.dtype)


# ----------------------------------------------------------------------------
# Single-head (eval) call: grid=(1,), full-array blocks.
# ----------------------------------------------------------------------------
def _linear_full(x_p, w_p, b_p):
    Bp, K = x_p.shape
    _, Np = w_p.shape
    return pl.pallas_call(
        _linear_head_kernel,
        out_shape=jax.ShapeDtypeStruct((Bp, Np), x_p.dtype),
        grid=(1,),
        in_specs=[
            pl.BlockSpec((Bp, K), lambda h: (0, 0)),   # x  (full K, un-padded)
            pl.BlockSpec((K, Np), lambda h: (0, 0)),   # W  (pre-padded N)
            pl.BlockSpec((1, Np), lambda h: (0, 0)),   # bias
        ],
        out_specs=pl.BlockSpec((Bp, Np), lambda h: (0, 0)),
        compiler_params=pltpu.CompilerParams(
            dimension_semantics=("arbitrary",),
        ),
    )(x_p, w_p, b_p)


# ----------------------------------------------------------------------------
# Fused two-head (training) call: grid=(2,) over head index, Squeezed blocks.
# BlockSpec double-buffering overlaps head-1 weight DMA with head-0 compute.
# ----------------------------------------------------------------------------
def _fused_heads(x_stack, w_stack, b_stack):
    H, Bp, K = x_stack.shape
    _, _, Np = w_stack.shape
    return pl.pallas_call(
        _linear_head_kernel,
        out_shape=jax.ShapeDtypeStruct((H, Bp, Np), x_stack.dtype),
        grid=(H,),
        in_specs=[
            pl.BlockSpec((None, Bp, K), lambda h: (h, 0, 0)),   # x per head
            pl.BlockSpec((None, K, Np), lambda h: (h, 0, 0)),   # W per head
            pl.BlockSpec((None, 1, Np), lambda h: (h, 0, 0)),   # bias per head
        ],
        out_specs=pl.BlockSpec((None, Bp, Np), lambda h: (h, 0, 0)),
        compiler_params=pltpu.CompilerParams(
            dimension_semantics=("arbitrary",),
        ),
    )(x_stack, w_stack, b_stack)


# ----------------------------------------------------------------------------
# Jitted forward wrappers (pad batch to 8 rows; slice back to B, class_nums)
# ----------------------------------------------------------------------------
@functools.partial(jax.jit, static_argnames=("n_classes",))
def eval_forward(x, w_pad, b_pad, *, n_classes):
    B, _ = x.shape
    Bp = max(_round_up(B, 8), 8)
    x_p = jnp.pad(x, ((0, Bp - B), (0, 0)))
    out = _linear_full(x_p, w_pad, b_pad)
    return out[:B, :n_classes]


@functools.partial(jax.jit, static_argnames=("n_classes",))
def train_forward(x, x_aux, w_stack, b_stack, *, n_classes):
    B, _ = x.shape
    Bp = max(_round_up(B, 8), 8)
    pad = ((0, Bp - B), (0, 0))
    # head 0 = main classifier on x, head 1 = aux classifier on x_aux
    x_stack = jnp.stack([jnp.pad(x, pad), jnp.pad(x_aux, pad)], axis=0)
    out = _fused_heads(x_stack, w_stack, b_stack)          # (2, Bp, Np)
    coarse_logits = out[0, :B, :n_classes]
    logits_aux = out[1, :B, :n_classes]
    return coarse_logits, logits_aux


# ----------------------------------------------------------------------------
# Model_aux equivalent
# ----------------------------------------------------------------------------
class ModelAuxPallas:
    FEAT_DIM = 1000  # backbone output dim (nn.Linear(1000, class_nums))

    def __init__(self, class_nums=1010, seed=0):
        self.class_nums = class_nums
        key = jax.random.PRNGKey(seed)
        k1, k2, k3, k4 = jax.random.split(key, 4)
        # PyTorch Linear init: U(-1/sqrt(fan_in), 1/sqrt(fan_in));
        # weights stored already transposed: (K, N)
        bound = 1.0 / math.sqrt(self.FEAT_DIM)
        self.w = jax.random.uniform(
            k1, (self.FEAT_DIM, class_nums), jnp.float32, -bound, bound)
        self.b = jax.random.uniform(
            k2, (class_nums,), jnp.float32, -bound, bound)
        self.w_aux = jax.random.uniform(
            k3, (self.FEAT_DIM, class_nums), jnp.float32, -bound, bound)
        self.b_aux = jax.random.uniform(
            k4, (class_nums,), jnp.float32, -bound, bound)

        # Pre-pad ONCE at init (N -> multiple of 128 for lane-dense output).
        Np = _round_up(class_nums, 128)
        self._Np = Np
        pad_n = Np - class_nums
        self.w_pad = jnp.pad(self.w, ((0, 0), (0, pad_n)))              # (K, Np)
        self.b_pad = jnp.pad(self.b, (0, pad_n)).reshape(1, Np)         # (1, Np)
        w_aux_pad = jnp.pad(self.w_aux, ((0, 0), (0, pad_n)))
        b_aux_pad = jnp.pad(self.b_aux, (0, pad_n)).reshape(1, Np)
        self.w_stack = jnp.stack([self.w_pad, w_aux_pad], axis=0)       # (2, K, Np)
        self.b_stack = jnp.stack([self.b_pad, b_aux_pad], axis=0)       # (2, 1, Np)

        self.training = False

    def __call__(self, x, x_aux=None):
        # x, x_aux: backbone features of shape (B, 1000)
        if self.training:
            assert x_aux is not None
            return train_forward(
                x, x_aux, self.w_stack, self.b_stack, n_classes=self.class_nums)
        return eval_forward(x, self.w_pad, self.b_pad, n_classes=self.class_nums)


if __name__ == "__main__":
    class_nums = 1010
    B = 2

    model = ModelAuxPallas(class_nums=class_nums, seed=0)

    key = jax.random.PRNGKey(0)
    kx, ka = jax.random.split(key)
    x = jax.random.normal(kx, (B, ModelAuxPallas.FEAT_DIM), jnp.float32)
    x_aux = jax.random.normal(ka, (B, ModelAuxPallas.FEAT_DIM), jnp.float32)

    # eval path
    model.training = False
    coarse = model(x)
    coarse = jax.block_until_ready(coarse)

    # training path (fused two-head kernel)
    model.training = True
    coarse_t, logits_aux = model(x, x_aux)
    jax.block_until_ready((coarse_t, logits_aux))

    # correctness check against plain-JAX reference
    ref = x @ model.w + model.b
    ref_aux = x_aux @ model.w_aux + model.b_aux
    assert coarse.shape == (B, class_nums)
    assert coarse_t.shape == (B, class_nums)
    assert logits_aux.shape == (B, class_nums)
    assert jnp.allclose(coarse, ref, atol=1e-4, rtol=1e-4)
    assert jnp.allclose(coarse_t, ref, atol=1e-4, rtol=1e-4)
    assert jnp.allclose(logits_aux, ref_aux, atol=1e-4, rtol=1e-4)

    print("KERNEL_OK")
</pallas_src>

<mosaic_0001>
module attributes {stable_mosaic.version = 11 : i64} {
  func.func @_linear_head_kernel(%arg0: i32, %arg1: memref<8x1000xf32, #tpu.memory_space<vmem>>, %arg2: memref<1000x1024xf32, #tpu.memory_space<vmem>>, %arg3: memref<1x1024xf32, #tpu.memory_space<vmem>>, %arg4: memref<8x1024xf32, #tpu.memory_space<vmem>>) attributes {dimension_semantics = [#tpu.dimension_semantics<arbitrary>], iteration_bounds = array<i64: 1>, scalar_prefetch = 0 : i64, scratch_operands = 0 : i64, tpu.core_type = #tpu.core_type<tc>, window_params = [{pipeline_mode = #tpu.pipeline_mode<synchronous>, transform_indices = @transform_0, window_bounds = array<i64: 8, 1000>}, {pipeline_mode = #tpu.pipeline_mode<synchronous>, transform_indices = @transform_1, window_bounds = array<i64: 1000, 1024>}, {pipeline_mode = #tpu.pipeline_mode<synchronous>, transform_indices = @transform_2, window_bounds = array<i64: 1, 1024>}, {pipeline_mode = #tpu.pipeline_mode<synchronous>, transform_indices = @transform_3, window_bounds = array<i64: 8, 1024>}]} {
    %c0 = arith.constant 0 : index
    %c0_0 = arith.constant 0 : index
    %0 = vector.load %arg1[%c0, %c0_0] : memref<8x1000xf32, #tpu.memory_space<vmem>>, vector<8x1000xf32>
    %c0_1 = arith.constant 0 : index
    %c0_2 = arith.constant 0 : index
    %1 = vector.load %arg2[%c0_1, %c0_2] : memref<1000x1024xf32, #tpu.memory_space<vmem>>, vector<1000x1024xf32>
    %cst = arith.constant dense<0.000000e+00> : vector<8x1024xf32>
    %2 = tpu.matmul %0, %1, %cst {dimension_numbers = #tpu.dot_dimension_numbers<[1], [0], [0], [1], [0, 0, 1, 1], [], []>} : vector<8x1000xf32>, vector<1000x1024xf32>, vector<8x1024xf32> -> vector<8x1024xf32>
    %c0_3 = arith.constant 0 : index
    %c0_4 = arith.constant 0 : index
    %3 = vector.load %arg3[%c0_3, %c0_4] : memref<1x1024xf32, #tpu.memory_space<vmem>>, vector<1x1024xf32>
    %4 = vector.broadcast %3 : vector<1x1024xf32> to vector<8x1024xf32>
    %5 = arith.addf %2, %4 : vector<8x1024xf32>
    %c0_5 = arith.constant 0 : index
    %c0_6 = arith.constant 0 : index
    %6 = vector.load %arg4[%c0_5, %c0_6] : memref<8x1024xf32, #tpu.memory_space<vmem>>, vector<8x1024xf32>
    tpu.vector_store %arg4[%c0_5, %c0_6], %5 {strides = array<i32>} : memref<8x1024xf32, #tpu.memory_space<vmem>>, vector<8x1024xf32>,
    return
  }
  func.func @transform_0(%arg0: i32) -> (i32, i32) {
    %c0_i32 = arith.constant 0 : i32
    %c0_i32_0 = arith.constant 0 : i32
    %c0_i32_1 = arith.constant 0 : i32
    return %c0_i32, %c0_i32_0 : i32, i32
  }
  func.func @transform_1(%arg0: i32) -> (i32, i32) {
    %c0_i32 = arith.constant 0 : i32
    %c0_i32_0 = arith.constant 0 : i32
    %c0_i32_1 = arith.constant 0 : i32
    return %c0_i32, %c0_i32_0 : i32, i32
  }
  func.func @transform_2(%arg0: i32) -> (i32, i32) {
    %c0_i32 = arith.constant 0 : i32
    %c0_i32_0 = arith.constant 0 : i32
    %c0_i32_1 = arith.constant 0 : i32
    return %c0_i32, %c0_i32_0 : i32, i32
  }
  func.func @transform_3(%arg0: i32) -> (i32, i32) {
    %c0_i32 = arith.constant 0 : i32
    %c0_i32_0 = arith.constant 0 : i32
    %c0_i32_1 = arith.constant 0 : i32
    return %c0_i32, %c0_i32_0 : i32, i32
  }
}

</mosaic_0001>

<bundles_post_ra>
// kernel: eval_forward.1
= control target key start
LH: loop header
LB: loop body
LE: loop exit
PB: predicated region body
PF: predicated region fallthrough
CT: control target
= control target key end

     0   :  { %8 = vsyncpa [#allocation3], 0  ;;  %s3476_s0 = inlined_call_operand.vmem [shape: f32[8,1000], index: 0, kind: input, shape index: {}]   ;;  %s3477_s1 = inlined_call_operand.hbm [shape: f32[1000,1024], index: 1, kind: input, shape index: {}]   ;;  %s3478_s2 = inlined_call_operand.hbm [shape: f32[1,1024], index: 2, kind: input, shape index: {}]   ;;  %s3479_s3 = inlined_call_operand.vmem [shape: f32[8,1024], index: 3, kind: output, shape index: {}]  }
   0x1   :  { %9 = vsyncpa [#allocation5], 0  ;;  %s3332_s12 = smov [#allocation2]   ;;  %s3284_s16 = scalar_lea.hbm %s3477_s1, 128000 }
   0x2   :  { %s17_s13 = sshll.u32 %s3332_s12, 4  ;;  %p3285_p0 = scmp.ne.s32.totalorder %s3477_s1, %s3284_s16  ;;  %s18_s13 = int_to_ptr.vmem [resolvable:$true] %s17_s13 }
   0x3   :  { %p3288_p1 = scmp.lt.u32.totalorder %s3284_s16, %s3477_s1 }
   0x5   :  { %p3290_p2 = pnand %p3288_p1, %p3285_p0 }
   0x7   :  { %3293 = shalt.err (!%p3290_p2)
}
   0x8   :  { %s3294_s21 = scalar_lea.vmem %s18_s13, 128000  ;;  %p3299_p4 = scmp.lt.s32.totalorder %s18_s13, %s18_s13 }
   0x9   :  { %p3295_p3 = scmp.ne.s32.totalorder %s18_s13, %s3294_s21  ;;  %p3300_p5 = scmp.lt.s32.totalorder %s3294_s21, %s3294_s21 }
   0xb   :  { %p3301_p6 = por %p3300_p5, %p3299_p4 }
   0xd   :  { %p3302_p7 = pnand %p3301_p6, %p3295_p3 }
   0xf   :  { %3305 = shalt.err (!%p3302_p7)
}
  0x10   :  { %s3333_s22 = smov 1024   ;;  %s3334_s23 = smov 64  }
  0x11   :  { %23 = dma.hbm_to_vmem [thread:$0]  %s3477_s1, 128000, %s18_s13, [#allocation3], %s3333_s22, %s3333_s22, %s3334_s23  }
  0x12   :  { %s3335_s26 = smov [#allocation4]   ;;  %s3306_s30 = scalar_lea.hbm %s3478_s2, 128 }
  0x13   :  { %s30_s27 = sshll.u32 %s3335_s26, 4  ;;  %p3307_p8 = scmp.ne.s32.totalorder %s3478_s2, %s3306_s30  ;;  %s31_s27 = int_to_ptr.vmem [resolvable:$true] %s30_s27 }
  0x14   :  { %p3310_p9 = scmp.lt.u32.totalorder %s3306_s30, %s3478_s2 }
  0x16   :  { %p3312_p10 = pnand %p3310_p9, %p3307_p8 }
  0x18   :  { %3315 = shalt.err (!%p3312_p10)
}
  0x19   :  { %s3316_s8 = scalar_lea.vmem %s31_s27, 128  ;;  %p3321_p12 = scmp.lt.s32.totalorder %s31_s27, %s31_s27 }
  0x1a   :  { %p3317_p11 = scmp.ne.s32.totalorder %s31_s27, %s3316_s8  ;;  %p3322_p13 = scmp.lt.s32.totalorder %s3316_s8, %s3316_s8 }
  0x1c   :  { %p3323_p0 = por %p3322_p13, %p3321_p12 }
  0x1e   :  { %p3324_p1 = pnand %p3323_p0, %p3317_p11 }
  0x20   :  { %3327 = shalt.err (!%p3324_p1)
}
  0x21   :  { %33 = dma.hbm_to_vmem [thread:$0]  %s3478_s2, 128, %s31_s27, [#allocation5]  }
  0x22   :  { %3328 = dma.done.wait [#allocation3], 128000  }
  0x23   :  { %3329 = vsyncadd [#allocation3], 4294839296 }
  0x24   :  { %3330 = dma.done.wait [#allocation5], 128  }
  0x25   :  { %3331 = vsyncadd [#allocation5], 4294967168  ;;  %v49_v0 = vld [vmem:[#allocation2 + $0x8] sm:$0xff]  ;;  %v51_v2 = vld [vmem:[#allocation2 + $0x18] sm:$0xff]  ;;  %vm1090_vm0 = vcmask 850944  }
  0x26   :  { %v57_v1 = vld [vmem:[#allocation2 + $0x48] sm:$0xff]  ;;  %v59_v4 = vld [vmem:[#allocation2 + $0x58] sm:$0xff]  ;;  %v48_v5 = vld [vmem:[#allocation2] sm:$0xff] }
  0x27   :  { %v2248_v3 = vpack.c.bf16 %v57_v1, %v49_v0  ;;  %v56_v6 = vld [vmem:[#allocation2 + $0x40] sm:$0xff]  ;;  %v2496_v7 = vpack.c.bf16 %v59_v4, %v51_v2  ;;  %v50_v9 = vld [vmem:[#allocation2 + $0x10] sm:$0xff]  ;;  %v65_v11 = vld [vmem:[#allocation2 + $0x88] sm:$0xff] }
  0x28   :  { %v2250_v8 = vpack.c.bf16 %v56_v6, %v48_v5  ;;  %v58_v10 = vld [vmem:[#allocation2 + $0x50] sm:$0xff]  ;;  %v73_v13 = vld [vmem:[#allocation2 + $0xc8] sm:$0xff]  ;;  %v67_v14 = vld [vmem:[#allocation2 + $0x98] sm:$0xff] }
  0x29   :  { %2249 = vmatprep.subr.bf16.mxu0 %v2248_v3  ;;  %v2498_v12 = vpack.c.bf16 %v58_v10, %v50_v9  ;;  %v75_v15 = vld [vmem:[#allocation2 + $0xd8] sm:$0xff]  ;;  %2497 = vmatprep.subr.bf16.mxu1 %v2496_v7  ;;  %v2252_v16 = vpack.c.bf16 %v73_v13, %v65_v11  ;;  %v64_v18 = vld [vmem:[#allocation2 + $0x80] sm:$0xff]  ;;  %v66_v20 = vld [vmem:[#allocation2 + $0x90] sm:$0xff] }
  0x2a   :  { %2251 = vmatpush1.bf16.msra.mxu0 %v2250_v8  ;;  %v2500_v17 = vpack.c.bf16 %v75_v15, %v67_v14  ;;  %v72_v19 = vld [vmem:[#allocation2 + $0xc0] sm:$0xff]  ;;  %v74_v22 = vld [vmem:[#allocation2 + $0xd0] sm:$0xff]  ;;  %v81_v23 = vld [vmem:[#allocation2 + $0x108] sm:$0xff] }
  0x2b   :  { %2499 = vmatpush1.bf16.msra.mxu1 %v2498_v12  ;;  %v2254_v21 = vpack.c.bf16 %v72_v19, %v64_v18  ;;  %v89_v24 = vld [vmem:[#allocation2 + $0x148] sm:$0xff]  ;;  %2253 = vmatprep.subr.bf16.mxu0 %v2252_v16  ;;  %v2502_v25 = vpack.c.bf16 %v74_v22, %v66_v20  ;;  %v83_v27 = vld [vmem:[#allocation2 + $0x118] sm:$0xff]  ;;  %v80_v29 = vld [vmem:[#allocation2 + $0x100] sm:$0xff] }
  0x2c   :  { %2501 = vmatprep.subr.bf16.mxu1 %v2500_v17  ;;  %v2256_v26 = vpack.c.bf16 %v89_v24, %v81_v23  ;;  %v91_v28 = vld [vmem:[#allocation2 + $0x158] sm:$0xff]  ;;  %v88_v31 = vld [vmem:[#allocation2 + $0x140] sm:$0xff]  ;;  %v82_v32 = vld [vmem:[#allocation2 + $0x110] sm:$0xff] }
  0x2d   :  { %v2504_v30 = vpack.c.bf16 %v91_v28, %v83_v27  ;;  %v90_v33 = vld [vmem:[#allocation2 + $0x150] sm:$0xff]  ;;  %v2258_v34 = vpack.c.bf16 %v88_v31, %v80_v29  ;;  %v97_v35 = vld [vmem:[#allocation2 + $0x188] sm:$0xff]  ;;  %v99_v37 = vld [vmem:[#allocation2 + $0x198] sm:$0xff] }
  0x2e   :  { %2255 = vmatpush1.bf16.msra.mxu0 %v2254_v21  ;;  %v105_v36 = vld [vmem:[#allocation2 + $0x1c8] sm:$0xff]  ;;  %v2506_v38 = vpack.c.bf16 %v90_v33, %v82_v32  ;;  %v107_v40 = vld [vmem:[#allocation2 + $0x1d8] sm:$0xff]  ;;  %v96_v41 = vld [vmem:[#allocation2 + $0x180] sm:$0xff] }
  0x2f   :  { %2503 = vmatpush1.bf16.msra.mxu1 %v2502_v25  ;;  %2257 = vmatprep.subr.bf16.mxu0 %v2256_v26  ;;  %v2260_v39 = vpack.c.bf16 %v105_v36, %v97_v35  ;;  %v104_v42 = vld [vmem:[#allocation2 + $0x1c0] sm:$0xff]  ;;  %v2508_v43 = vpack.c.bf16 %v107_v40, %v99_v37  ;;  %v98_v44 = vld [vmem:[#allocation2 + $0x190] sm:$0xff]  ;;  %v113_v46 = vld [vmem:[#allocation2 + $0x208] sm:$0xff] }
  0x30   :  { %2505 = vmatprep.subr.bf16.mxu1 %v2504_v30  ;;  %v106_v45 = vld [vmem:[#allocation2 + $0x1d0] sm:$0xff]  ;;  %v121_v47 = vld [vmem:[#allocation2 + $0x248] sm:$0xff]  ;;  %v115_v48 = vld [vmem:[#allocation2 + $0x218] sm:$0xff]  ;;  %v2262_v50 = vpack.c.bf16 %v104_v42, %v96_v41 }
  0x31   :  { %v123_v49 = vld [vmem:[#allocation2 + $0x258] sm:$0xff]  ;;  %v2510_v51 = vpack.c.bf16 %v106_v45, %v98_v44  ;;  %v2264_v52 = vpack.c.bf16 %v121_v47, %v113_v46  ;;  %v112_v53 = vld [vmem:[#allocation2 + $0x200] sm:$0xff]  ;;  %v114_v55 = vld [vmem:[#allocation2 + $0x210] sm:$0xff] }
  0x32   :  { %2259 = vmatpush1.bf16.msra.mxu0 %v2258_v34  ;;  %v120_v54 = vld [vmem:[#allocation2 + $0x240] sm:$0xff]  ;;  %v2512_v56 = vpack.c.bf16 %v123_v49, %v115_v48  ;;  %v122_v57 = vld [vmem:[#allocation2 + $0x250] sm:$0xff]  ;;  %v129_v58 = vld [vmem:[#allocation2 + $0x288] sm:$0xff] }
  0x33   :  { %2507 = vmatpush1.bf16.msra.mxu1 %v2506_v38  ;;  %2261 = vmatprep.subr.bf16.mxu0 %v2260_v39  ;;  %v137_v59 = vld [vmem:[#allocation2 + $0x2c8] sm:$0xff]  ;;  %v131_v60 = vld [vmem:[#allocation2 + $0x298] sm:$0xff]  ;;  %v2266_v62 = vpack.c.bf16 %v120_v54, %v112_v53  ;;  %v2514_v63 = vpack.c.bf16 %v122_v57, %v114_v55  ;;  %v128_v1 = vld [vmem:[#allocation2 + $0x280] sm:$0xff] }
  0x34   :  { %2509 = vmatprep.subr.bf16.mxu1 %v2508_v43  ;;  %v139_v61 = vld [vmem:[#allocation2 + $0x2d8] sm:$0xff]  ;;  %v2268_v0 = vpack.c.bf16 %v137_v59, %v129_v58  ;;  %v136_v2 = vld [vmem:[#allocation2 + $0x2c0] sm:$0xff]  ;;  %v130_v3 = vld [vmem:[#allocation2 + $0x290] sm:$0xff] }
  0x35   :  { %v2516_v4 = vpack.c.bf16 %v139_v61, %v131_v60  ;;  %v138_v5 = vld [vmem:[#allocation2 + $0x2d0] sm:$0xff]  ;;  %v145_v6 = vld [vmem:[#allocation2 + $0x308] sm:$0xff]  ;;  %v147_v8 = vld [vmem:[#allocation2 + $0x318] sm:$0xff]  ;;  %v2270_v10 = vpack.c.bf16 %v136_v2, %v128_v1 }
  0x36   :  { %2263 = vmatpush1.bf16.msra.mxu0 %v2262_v50  ;;  %v153_v7 = vld [vmem:[#allocation2 + $0x348] sm:$0xff]  ;;  %v155_v9 = vld [vmem:[#allocation2 + $0x358] sm:$0xff]  ;;  %v2518_v11 = vpack.c.bf16 %v138_v5, %v130_v3  ;;  %v144_v13 = vld [vmem:[#allocation2 + $0x300] sm:$0xff] }
  0x37   :  { %2511 = vmatpush1.bf16.msra.mxu1 %v2510_v51  ;;  %2265 = vmatprep.subr.bf16.mxu0 %v2264_v52  ;;  %v2272_v12 = vpack.c.bf16 %v153_v7, %v145_v6  ;;  %v152_v14 = vld [vmem:[#allocation2 + $0x340] sm:$0xff]  ;;  %v146_v15 = vld [vmem:[#allocation2 + $0x310] sm:$0xff]  ;;  %v2520_v16 = vpack.c.bf16 %v155_v9, %v147_v8  ;;  %v161_v18 = vld [vmem:[#allocation2 + $0x388] sm:$0xff] }
  0x38   :  { %2513 = vmatprep.subr.bf16.mxu1 %v2512_v56  ;;  %v154_v17 = vld [vmem:[#allocation2 + $0x350] sm:$0xff]  ;;  %v169_v19 = vld [vmem:[#allocation2 + $0x3c8] sm:$0xff]  ;;  %v163_v20 = vld [vmem:[#allocation2 + $0x398] sm:$0xff]  ;;  %v2274_v22 = vpack.c.bf16 %v152_v14, %v144_v13 }
  0x39   :  { %v171_v21 = vld [vmem:[#allocation2 + $0x3d8] sm:$0xff]  ;;  %v2522_v23 = vpack.c.bf16 %v154_v17, %v146_v15  ;;  %v2276_v24 = vpack.c.bf16 %v169_v19, %v161_v18  ;;  %v160_v25 = vld [vmem:[#allocation2 + $0x380] sm:$0xff]  ;;  %v162_v27 = vld [vmem:[#allocation2 + $0x390] sm:$0xff] }
  0x3a   :  { %2267 = vmatpush1.bf16.msra.mxu0 %v2266_v62  ;;  %v168_v26 = vld [vmem:[#allocation2 + $0x3c0] sm:$0xff]  ;;  %v2524_v28 = vpack.c.bf16 %v171_v21, %v163_v20  ;;  %v170_v29 = vld [vmem:[#allocation2 + $0x3d0] sm:$0xff]  ;;  %v177_v30 = vld [vmem:[#allocation2 + $0x408] sm:$0xff] }
  0x3b   :  { %2515 = vmatpush1.bf16.msra.mxu1 %v2514_v63  ;;  %2269 = vmatprep.subr.bf16.mxu0 %v2268_v0  ;;  %v185_v31 = vld [vmem:[#allocation2 + $0x448] sm:$0xff]  ;;  %v179_v32 = vld [vmem:[#allocation2 + $0x418] sm:$0xff]  ;;  %v2278_v34 = vpack.c.bf16 %v168_v26, %v160_v25  ;;  %v2526_v35 = vpack.c.bf16 %v170_v29, %v162_v27  ;;  %v176_v37 = vld [vmem:[#allocation2 + $0x400] sm:$0xff] }
  0x3c   :  { %2517 = vmatprep.subr.bf16.mxu1 %v2516_v4  ;;  %v187_v33 = vld [vmem:[#allocation2 + $0x458] sm:$0xff]  ;;  %v2280_v36 = vpack.c.bf16 %v185_v31, %v177_v30  ;;  %v184_v38 = vld [vmem:[#allocation2 + $0x440] sm:$0xff]  ;;  %v178_v39 = vld [vmem:[#allocation2 + $0x410] sm:$0xff] }
  0x3d   :  { %v2528_v40 = vpack.c.bf16 %v187_v33, %v179_v32  ;;  %v186_v41 = vld [vmem:[#allocation2 + $0x450] sm:$0xff]  ;;  %v193_v42 = vld [vmem:[#allocation2 + $0x488] sm:$0xff]  ;;  %v195_v44 = vld [vmem:[#allocation2 + $0x498] sm:$0xff]  ;;  %v2282_v46 = vpack.c.bf16 %v184_v38, %v176_v37 }
  0x3e   :  { %2271 = vmatpush1.bf16.msra.mxu0 %v2270_v10  ;;  %v201_v43 = vld [vmem:[#allocation2 + $0x4c8] sm:$0xff]  ;;  %v203_v45 = vld [vmem:[#allocation2 + $0x4d8] sm:$0xff]  ;;  %v2530_v47 = vpack.c.bf16 %v186_v41, %v178_v39  ;;  %v192_v49 = vld [vmem:[#allocation2 + $0x480] sm:$0xff] }
  0x3f   :  { %2519 = vmatpush1.bf16.msra.mxu1 %v2518_v11  ;;  %2273 = vmatprep.subr.bf16.mxu0 %v2272_v12  ;;  %v2284_v48 = vpack.c.bf16 %v201_v43, %v193_v42  ;;  %v200_v50 = vld [vmem:[#allocation2 + $0x4c0] sm:$0xff]  ;;  %v194_v51 = vld [vmem:[#allocation2 + $0x490] sm:$0xff]  ;;  %v2532_v52 = vpack.c.bf16 %v203_v45, %v195_v44  ;;  %v209_v54 = vld [vmem:[#allocation2 + $0x508] sm:$0xff] }
  0x40   :  { %2521 = vmatprep.subr.bf16.mxu1 %v2520_v16  ;;  %v202_v53 = vld [vmem:[#allocation2 + $0x4d0] sm:$0xff]  ;;  %v217_v55 = vld [vmem:[#allocation2 + $0x548] sm:$0xff]  ;;  %v211_v56 = vld [vmem:[#allocation2 + $0x518] sm:$0xff]  ;;  %v2286_v58 = vpack.c.bf16 %v200_v50, %v192_v49 }
  0x41   :  { %v219_v57 = vld [vmem:[#allocation2 + $0x558] sm:$0xff]  ;;  %v2534_v59 = vpack.c.bf16 %v202_v53, %v194_v51  ;;  %v2288_v60 = vpack.c.bf16 %v217_v55, %v209_v54  ;;  %v208_v61 = vld [vmem:[#allocation2 + $0x500] sm:$0xff]  ;;  %v210_v63 = vld [vmem:[#allocation2 + $0x510] sm:$0xff] }
  0x42   :  { %2275 = vmatpush1.bf16.msra.mxu0 %v2274_v22  ;;  %v216_v62 = vld [vmem:[#allocation2 + $0x540] sm:$0xff]  ;;  %v2536_v0 = vpack.c.bf16 %v219_v57, %v211_v56  ;;  %v218_v1 = vld [vmem:[#allocation2 + $0x550] sm:$0xff]  ;;  %v225_v2 = vld [vmem:[#allocation2 + $0x588] sm:$0xff] }
  0x43   :  { %2523 = vmatpush1.bf16.msra.mxu1 %v2522_v23  ;;  %2277 = vmatprep.subr.bf16.mxu0 %v2276_v24  ;;  %v233_v3 = vld [vmem:[#allocation2 + $0x5c8] sm:$0xff]  ;;  %v227_v4 = vld [vmem:[#allocation2 + $0x598] sm:$0xff]  ;;  %v2290_v6 = vpack.c.bf16 %v216_v62, %v208_v61  ;;  %v224_v7 = vld [vmem:[#allocation2 + $0x580] sm:$0xff]  ;;  %v2538_v8 = vpack.c.bf16 %v218_v1, %v210_v63 }
  0x44   :  { %2525 = vmatprep.subr.bf16.mxu1 %v2524_v28  ;;  %v235_v5 = vld [vmem:[#allocation2 + $0x5d8] sm:$0xff]  ;;  %v2292_v9 = vpack.c.bf16 %v233_v3, %v225_v2  ;;  %v232_v10 = vld [vmem:[#allocation2 + $0x5c0] sm:$0xff]  ;;  %v226_v11 = vld [vmem:[#allocation2 + $0x590] sm:$0xff] }
  0x45   :  { %v234_v12 = vld [vmem:[#allocation2 + $0x5d0] sm:$0xff]  ;;  %v2540_v13 = vpack.c.bf16 %v235_v5, %v227_v4  ;;  %v241_v14 = vld [vmem:[#allocation2 + $0x608] sm:$0xff]  ;;  %v243_v17 = vld [vmem:[#allocation2 + $0x618] sm:$0xff]  ;;  %v2294_v19 = vpack.c.bf16 %v232_v10, %v224_v7 }
  0x46   :  { %2279 = vmatpush1.bf16.msra.mxu0 %v2278_v34  ;;  %v249_v15 = vld [vmem:[#allocation2 + $0x648] sm:$0xff]  ;;  %v251_v18 = vld [vmem:[#allocation2 + $0x658] sm:$0xff]  ;;  %v2542_v20 = vpack.c.bf16 %v234_v12, %v226_v11  ;;  %v240_v22 = vld [vmem:[#allocation2 + $0x600] sm:$0xff] }
  0x47   :  { %2527 = vmatpush1.bf16.msra.mxu1 %v2526_v35  ;;  %2281 = vmatprep.subr.bf16.mxu0 %v2280_v36  ;;  %v41_v16 = vld [vmem:[%s3476_s0 + $0x8] sm:$0xff]  ;;  %v2296_v21 = vpack.c.bf16 %v249_v15, %v241_v14  ;;  %v248_v23 = vld [vmem:[#allocation2 + $0x640] sm:$0xff]  ;;  %v242_v24 = vld [vmem:[#allocation2 + $0x610] sm:$0xff]  ;;  %v2544_v25 = vpack.c.bf16 %v251_v18, %v243_v17 }
  0x48   :  { %2529 = vmatprep.subr.bf16.mxu1 %v2528_v40  ;;  %1158 = vmatprep.mubr.f32.mxu0 %v41_v16  ;;  %v250_v26 = vld [vmem:[#allocation2 + $0x650] sm:$0xff]  ;;  %v257_v27 = vld [vmem:[#allocation2 + $0x688] sm:$0xff]  ;;  %v259_v29 = vld [vmem:[#allocation2 + $0x698] sm:$0xff]  ;;  %v2298_v31 = vpack.c.bf16 %v248_v23, %v240_v22 }
  0x49   :  { %1442 = vmatprep.mubr.f32.mxu1 %v41_v16  ;;  %v265_v28 = vld [vmem:[#allocation2 + $0x6c8] sm:$0xff]  ;;  %v267_v30 = vld [vmem:[#allocation2 + $0x6d8] sm:$0xff]  ;;  %v2546_v32 = vpack.c.bf16 %v250_v26, %v242_v24  ;;  %v256_v34 = vld [vmem:[#allocation2 + $0x680] sm:$0xff] }
  0x4a   :  { %2283 = vmatpush1.bf16.msra.mxu0 %v2282_v46  ;;  %v2300_v33 = vpack.c.bf16 %v265_v28, %v257_v27  ;;  %v264_v35 = vld [vmem:[#allocation2 + $0x6c0] sm:$0xff]  ;;  %v258_v36 = vld [vmem:[#allocation2 + $0x690] sm:$0xff]  ;;  %v2548_v37 = vpack.c.bf16 %v267_v30, %v259_v29  ;;  %v273_v39 = vld [vmem:[#allocation2 + $0x708] sm:$0xff] }
  0x4b   :  { %2531 = vmatpush1.bf16.msra.mxu1 %v2530_v47  ;;  %2285 = vmatprep.subr.bf16.mxu0 %v2284_v48  ;;  %v266_v38 = vld [vmem:[#allocation2 + $0x6d0] sm:$0xff]  ;;  %v281_v40 = vld [vmem:[#allocation2 + $0x748] sm:$0xff]  ;;  %v275_v41 = vld [vmem:[#allocation2 + $0x718] sm:$0xff]  ;;  %v2302_v43 = vpack.c.bf16 %v264_v35, %v256_v34 }
  0x4c   :  { %2533 = vmatprep.subr.bf16.mxu1 %v2532_v52  ;;  %v283_v42 = vld [vmem:[#allocation2 + $0x758] sm:$0xff]  ;;  %v2550_v44 = vpack.c.bf16 %v266_v38, %v258_v36  ;;  %v2304_v45 = vpack.c.bf16 %v281_v40, %v273_v39  ;;  %v272_v46 = vld [vmem:[#allocation2 + $0x700] sm:$0xff]  ;;  %v274_v48 = vld [vmem:[#allocation2 + $0x710] sm:$0xff] }
  0x4d   :  { %v280_v47 = vld [vmem:[#allocation2 + $0x740] sm:$0xff]  ;;  %v2552_v49 = vpack.c.bf16 %v283_v42, %v275_v41  ;;  %v282_v50 = vld [vmem:[#allocation2 + $0x750] sm:$0xff]  ;;  %v289_v51 = vld [vmem:[#allocation2 + $0x788] sm:$0xff] }
  0x4e   :  { %2287 = vmatpush1.bf16.msra.mxu0 %v2286_v58  ;;  %v297_v52 = vld [vmem:[#allocation2 + $0x7c8] sm:$0xff]  ;;  %v291_v53 = vld [vmem:[#allocation2 + $0x798] sm:$0xff]  ;;  %v2306_v55 = vpack.c.bf16 %v280_v47, %v272_v46  ;;  %v2554_v56 = vpack.c.bf16 %v282_v50, %v274_v48  ;;  %v288_v58 = vld [vmem:[#allocation2 + $0x780] sm:$0xff] }
  0x4f   :  { %2535 = vmatpush1.bf16.msra.mxu1 %v2534_v59  ;;  %2289 = vmatprep.subr.bf16.mxu0 %v2288_v60  ;;  %v299_v54 = vld [vmem:[#allocation2 + $0x7d8] sm:$0xff]  ;;  %v2308_v57 = vpack.c.bf16 %v297_v52, %v289_v51  ;;  %v296_v59 = vld [vmem:[#allocation2 + $0x7c0] sm:$0xff]  ;;  %v290_v60 = vld [vmem:[#allocation2 + $0x790] sm:$0xff] }
  0x50   :  { %2537 = vmatprep.subr.bf16.mxu1 %v2536_v0  ;;  %v2556_v61 = vpack.c.bf16 %v299_v54, %v291_v53  ;;  %v298_v62 = vld [vmem:[#allocation2 + $0x7d0] sm:$0xff]  ;;  %v305_v63 = vld [vmem:[#allocation2 + $0x808] sm:$0xff]  ;;  %v307_v1 = vld [vmem:[#allocation2 + $0x818] sm:$0xff]  ;;  %v2310_v3 = vpack.c.bf16 %v296_v59, %v288_v58 }
  0x51   :  { %v313_v0 = vld [vmem:[#allocation2 + $0x848] sm:$0xff]  ;;  %v315_v2 = vld [vmem:[#allocation2 + $0x858] sm:$0xff]  ;;  %v2558_v4 = vpack.c.bf16 %v298_v62, %v290_v60  ;;  %v312_v7 = vld [vmem:[#allocation2 + $0x840] sm:$0xff] }
  0x52   :  { %2291 = vmatpush1.bf16.msra.mxu0 %v2290_v6  ;;  %v2312_v5 = vpack.c.bf16 %v313_v0, %v305_v63  ;;  %v304_v6 = vld [vmem:[#allocation2 + $0x800] sm:$0xff]  ;;  %v314_v10 = vld [vmem:[#allocation2 + $0x850] sm:$0xff]  ;;  %v321_v11 = vld [vmem:[#allocation2 + $0x888] sm:$0xff] }
  0x53   :  { %2539 = vmatpush1.bf16.msra.mxu1 %v2538_v8  ;;  %2293 = vmatprep.subr.bf16.mxu0 %v2292_v9  ;;  %v306_v8 = vld [vmem:[#allocation2 + $0x810] sm:$0xff]  ;;  %v2560_v9 = vpack.c.bf16 %v315_v2, %v307_v1  ;;  %v329_v12 = vld [vmem:[#allocation2 + $0x8c8] sm:$0xff]  ;;  %v331_v14 = vld [vmem:[#allocation2 + $0x8d8] sm:$0xff]  ;;  %v2314_v16 = vpack.c.bf16 %v312_v7, %v304_v6 }
  0x54   :  { %2541 = vmatprep.subr.bf16.mxu1 %v2540_v13  ;;  %v323_v13 = vld [vmem:[#allocation2 + $0x898] sm:$0xff]  ;;  %v40_v15 = vld [vmem:[%s3476_s0] sm:$0xff]  ;;  %v2562_v17 = vpack.c.bf16 %v314_v10, %v306_v8  ;;  %v2316_v18 = vpack.c.bf16 %v329_v12, %v321_v11  ;;  %v330_v23 = vld [vmem:[#allocation2 + $0x8d0] sm:$0xff] }
  0x55   :  { %v2564_v22 = vpack.c.bf16 %v331_v14, %v323_v13  ;;  %v337_v24 = vld [vmem:[#allocation2 + $0x908] sm:$0xff]  ;;  %v339_v26 = vld [vmem:[#allocation2 + $0x918] sm:$0xff]  ;;  %v346_v35 = vld [vmem:[#allocation2 + $0x950] sm:$0xff] }
  0x56   :  { %2295 = vmatpush1.bf16.msra.mxu0 %v2294_v19  ;;  %v320_v19 = vld [vmem:[#allocation2 + $0x880] sm:$0xff]  ;;  %v347_v27 = vld [vmem:[#allocation2 + $0x958] sm:$0xff]  ;;  %v353_v36 = vld [vmem:[#allocation2 + $0x988] sm:$0xff] }
  0x57   :  { %2543 = vmatpush1.bf16.msra.mxu1 %v2542_v20  ;;  %2297 = vmatprep.subr.bf16.mxu0 %v2296_v21  ;;  %v328_v20 = vld [vmem:[#allocation2 + $0x8c0] sm:$0xff]  ;;  %v322_v21 = vld [vmem:[#allocation2 + $0x890] sm:$0xff]  ;;  %v2568_v34 = vpack.c.bf16 %v347_v27, %v339_v26  ;;  %v355_v38 = vld [vmem:[#allocation2 + $0x998] sm:$0xff] }
  0x58   :  { %2545 = vmatprep.subr.bf16.mxu1 %v2544_v25  ;;  %v345_v25 = vld [vmem:[#allocation2 + $0x948] sm:$0xff]  ;;  %v2318_v28 = vpack.c.bf16 %v328_v20, %v320_v19  ;;  %v2566_v29 = vpack.c.bf16 %v330_v23, %v322_v21  ;;  %v363_v39 = vld [vmem:[#allocation2 + $0x9d8] sm:$0xff]  ;;  %v362_v47 = vld [vmem:[#allocation2 + $0x9d0] sm:$0xff] }
  0x59   :  { %v2320_v30 = vpack.c.bf16 %v345_v25, %v337_v24  ;;  %v2572_v46 = vpack.c.bf16 %v363_v39, %v355_v38  ;;  %v369_v48 = vld [vmem:[#allocation2 + $0xa08] sm:$0xff]  ;;  %v371_v50 = vld [vmem:[#allocation2 + $0xa18] sm:$0xff]  ;;  %v378_v59 = vld [vmem:[#allocation2 + $0xa50] sm:$0xff] }
  0x5a   :  { %2299 = vmatpush1.bf16.msra.mxu0 %v2298_v31  ;;  %v336_v31 = vld [vmem:[#allocation2 + $0x900] sm:$0xff]  ;;  %v379_v51 = vld [vmem:[#allocation2 + $0xa58] sm:$0xff]  ;;  %v385_v60 = vld [vmem:[#allocation2 + $0xa88] sm:$0xff] }
  0x5b   :  { %2547 = vmatpush1.bf16.msra.mxu1 %v2546_v32  ;;  %2301 = vmatprep.subr.bf16.mxu0 %v2300_v33  ;;  %v344_v32 = vld [vmem:[#allocation2 + $0x940] sm:$0xff]  ;;  %v338_v33 = vld [vmem:[#allocation2 + $0x910] sm:$0xff]  ;;  %v2576_v58 = vpack.c.bf16 %v379_v51, %v371_v50  ;;  %v387_v62 = vld [vmem:[#allocation2 + $0xa98] sm:$0xff] }
  0x5c   :  { %2549 = vmatprep.subr.bf16.mxu1 %v2548_v37  ;;  %v361_v37 = vld [vmem:[#allocation2 + $0x9c8] sm:$0xff]  ;;  %v2322_v40 = vpack.c.bf16 %v344_v32, %v336_v31  ;;  %v2570_v41 = vpack.c.bf16 %v346_v35, %v338_v33  ;;  %v395_v63 = vld [vmem:[#allocation2 + $0xad8] sm:$0xff]  ;;  %v394_v7 = vld [vmem:[#allocation2 + $0xad0] sm:$0xff] }
  0x5d   :  { %v2324_v42 = vpack.c.bf16 %v361_v37, %v353_v36  ;;  %v2580_v6 = vpack.c.bf16 %v395_v63, %v387_v62  ;;  %v401_v8 = vld [vmem:[#allocation2 + $0xb08] sm:$0xff]  ;;  %v403_v10 = vld [vmem:[#allocation2 + $0xb18] sm:$0xff]  ;;  %v400_v13 = vld [vmem:[#allocation2 + $0xb00] sm:$0xff] }
  0x5e   :  { %2303 = vmatpush1.bf16.msra.mxu0 %v2302_v43  ;;  %v352_v43 = vld [vmem:[#allocation2 + $0x980] sm:$0xff]  ;;  %v411_v11 = vld [vmem:[#allocation2 + $0xb58] sm:$0xff]  ;;  %v417_v20 = vld [vmem:[#allocation2 + $0xb88] sm:$0xff] }
  0x5f   :  { %2551 = vmatpush1.bf16.msra.mxu1 %v2550_v44  ;;  %2305 = vmatprep.subr.bf16.mxu0 %v2304_v45  ;;  %v360_v44 = vld [vmem:[#allocation2 + $0x9c0] sm:$0xff]  ;;  %v354_v45 = vld [vmem:[#allocation2 + $0x990] sm:$0xff]  ;;  %v2584_v19 = vpack.c.bf16 %v411_v11, %v403_v10  ;;  %v425_v21 = vld [vmem:[#allocation2 + $0xbc8] sm:$0xff] }
  0x60   :  { %2553 = vmatprep.subr.bf16.mxu1 %v2552_v49  ;;  %v377_v49 = vld [vmem:[#allocation2 + $0xa48] sm:$0xff]  ;;  %v2326_v52 = vpack.c.bf16 %v360_v44, %v352_v43  ;;  %v2574_v53 = vpack.c.bf16 %v362_v47, %v354_v45  ;;  %v419_v23 = vld [vmem:[#allocation2 + $0xb98] sm:$0xff]  ;;  %v2340_v27 = vpack.c.bf16 %v425_v21, %v417_v20  ;;  %v426_v32 = vld [vmem:[#allocation2 + $0xbd0] sm:$0xff] }
  0x61   :  { %v2328_v54 = vpack.c.bf16 %v377_v49, %v369_v48  ;;  %v427_v24 = vld [vmem:[#allocation2 + $0xbd8] sm:$0xff]  ;;  %v433_v33 = vld [vmem:[#allocation2 + $0xc08] sm:$0xff]  ;;  %v442_v44 = vld [vmem:[#allocation2 + $0xc50] sm:$0xff] }
  0x62   :  { %2307 = vmatpush1.bf16.msra.mxu0 %v2306_v55  ;;  %v368_v55 = vld [vmem:[#allocation2 + $0xa00] sm:$0xff]  ;;  %v2588_v31 = vpack.c.bf16 %v427_v24, %v419_v23  ;;  %v435_v35 = vld [vmem:[#allocation2 + $0xc18] sm:$0xff]  ;;  %v449_v45 = vld [vmem:[#allocation2 + $0xc88] sm:$0xff] }
  0x63   :  { %2555 = vmatpush1.bf16.msra.mxu1 %v2554_v56  ;;  %2309 = vmatprep.subr.bf16.mxu0 %v2308_v57  ;;  %v376_v56 = vld [vmem:[#allocation2 + $0xa40] sm:$0xff]  ;;  %v370_v57 = vld [vmem:[#allocation2 + $0xa10] sm:$0xff]  ;;  %v443_v36 = vld [vmem:[#allocation2 + $0xc58] sm:$0xff] }
  0x64   :  { %2557 = vmatprep.subr.bf16.mxu1 %v2556_v61  ;;  %v393_v61 = vld [vmem:[#allocation2 + $0xac8] sm:$0xff]  ;;  %v2330_v0 = vpack.c.bf16 %v376_v56, %v368_v55  ;;  %v2578_v1 = vpack.c.bf16 %v378_v59, %v370_v57  ;;  %v2592_v43 = vpack.c.bf16 %v443_v36, %v435_v35  ;;  %v451_v47 = vld [vmem:[#allocation2 + $0xc98] sm:$0xff]  ;;  %v458_v56 = vld [vmem:[#allocation2 + $0xcd0] sm:$0xff] }
  0x65   :  { %v2332_v2 = vpack.c.bf16 %v393_v61, %v385_v60  ;;  %v459_v48 = vld [vmem:[#allocation2 + $0xcd8] sm:$0xff]  ;;  %v465_v57 = vld [vmem:[#allocation2 + $0xd08] sm:$0xff]  ;;  %v496_v24 = vld [vmem:[#allocation2 + $0xe00] sm:$0xff] }
  0x66   :  { %2311 = vmatpush1.bf16.msra.mxu0 %v2310_v3  ;;  %v384_v3 = vld [vmem:[#allocation2 + $0xa80] sm:$0xff]  ;;  %v2596_v55 = vpack.c.bf16 %v459_v48, %v451_v47  ;;  %v467_v59 = vld [vmem:[#allocation2 + $0xd18] sm:$0xff] }
  0x67   :  { %2559 = vmatpush1.bf16.msra.mxu1 %v2558_v4  ;;  %2313 = vmatprep.subr.bf16.mxu0 %v2312_v5  ;;  %v392_v4 = vld [vmem:[#allocation2 + $0xac0] sm:$0xff]  ;;  %v386_v5 = vld [vmem:[#allocation2 + $0xa90] sm:$0xff]  ;;  %v475_v60 = vld [vmem:[#allocation2 + $0xd58] sm:$0xff] }
  0x68   :  { %2561 = vmatprep.subr.bf16.mxu1 %v2560_v9  ;;  %v409_v9 = vld [vmem:[#allocation2 + $0xb48] sm:$0xff]  ;;  %v2334_v12 = vpack.c.bf16 %v392_v4, %v384_v3  ;;  %v2582_v14 = vpack.c.bf16 %v394_v7, %v386_v5  ;;  %v2600_v3 = vpack.c.bf16 %v475_v60, %v467_v59  ;;  %v474_v4 = vld [vmem:[#allocation2 + $0xd50] sm:$0xff]  ;;  %v483_v7 = vld [vmem:[#allocation2 + $0xd98] sm:$0xff] }
  0x69   :  { %1159 = vmatmul.mubr.f32.vlgmr.msra.gmra.mrb[0].mxu0 %v40_v15  ;;  %v481_v5 = vld [vmem:[#allocation2 + $0xd88] sm:$0xff]  ;;  %v507_v20 = vld [vmem:[#allocation2 + $0xe58] sm:$0xff]  ;;  %v512_v36 = vld [vmem:[#allocation2 + $0xe80] sm:$0xff] }
  0x6a   :  { %2315 = vmatpush1.bf16.msra.mxu0 %v2314_v16  ;;  %1443 = vmatmul.mubr.f32.vlgmr.msra.gmra.mrb[0].mxu1 %v40_v15  ;;  %v2336_v15 = vpack.c.bf16 %v409_v9, %v401_v8  ;;  %v408_v16 = vld [vmem:[#allocation2 + $0xb40] sm:$0xff]  ;;  %v491_v8 = vld [vmem:[#allocation2 + $0xdd8] sm:$0xff] }
  0x6b   :  { %2563 = vmatpush1.bf16.msra.mxu1 %v2562_v17  ;;  %2317 = vmatprep.subr.bf16.mxu0 %v2316_v18  ;;  %v402_v17 = vld [vmem:[#allocation2 + $0xb10] sm:$0xff]  ;;  %v2338_v25 = vpack.c.bf16 %v408_v16, %v400_v13  ;;  %v488_v13 = vld [vmem:[#allocation2 + $0xdc0] sm:$0xff] }
  0x6c   :  { %2565 = vmatprep.subr.bf16.mxu1 %v2564_v22  ;;  %v410_v18 = vld [vmem:[#allocation2 + $0xb50] sm:$0xff]  ;;  %v43_v22 = vld [vmem:[%s3476_s0 + $0x18] sm:$0xff]  ;;  %v528_v48 = vld [vmem:[#allocation2 + $0xf00] sm:$0xff] }
  0x6d   :  { %1229 = vmatprep.mubr.f32.mxu0 %v43_v22  ;;  %1513 = vmatprep.mubr.f32.mxu1 %v43_v22  ;;  %v2586_v26 = vpack.c.bf16 %v410_v18, %v402_v17  ;;  %v490_v16 = vld [vmem:[#allocation2 + $0xdd0] sm:$0xff]  ;;  %v497_v17 = vld [vmem:[#allocation2 + $0xe08] sm:$0xff]  ;;  %v544_v60 = vld [vmem:[#allocation2 + $0xf80] sm:$0xff] }
  0x6e   :  { %2319 = vmatpush1.bf16.msra.mxu0 %v2318_v28  ;;  %v416_v28 = vld [vmem:[#allocation2 + $0xb80] sm:$0xff]  ;;  %v505_v18 = vld [vmem:[#allocation2 + $0xe48] sm:$0xff] }
  0x6f   :  { %2567 = vmatpush1.bf16.msra.mxu1 %v2566_v29  ;;  %2321 = vmatprep.subr.bf16.mxu0 %v2320_v30  ;;  %v424_v29 = vld [vmem:[#allocation2 + $0xbc0] sm:$0xff]  ;;  %v418_v30 = vld [vmem:[#allocation2 + $0xb90] sm:$0xff]  ;;  %v2360_v23 = vpack.c.bf16 %v505_v18, %v497_v17 }
  0x70   :  { %2569 = vmatprep.subr.bf16.mxu1 %v2568_v34  ;;  %v441_v34 = vld [vmem:[#allocation2 + $0xc48] sm:$0xff]  ;;  %v2342_v37 = vpack.c.bf16 %v424_v29, %v416_v28  ;;  %v2590_v38 = vpack.c.bf16 %v426_v32, %v418_v30  ;;  %v506_v28 = vld [vmem:[#allocation2 + $0xe50] sm:$0xff]  ;;  %v523_v32 = vld [vmem:[#allocation2 + $0xed8] sm:$0xff] }
  0x71   :  { %v2344_v39 = vpack.c.bf16 %v441_v34, %v433_v33  ;;  %v513_v29 = vld [vmem:[#allocation2 + $0xe88] sm:$0xff]  ;;  %v42_v17 = vld [vmem:[%s3476_s0 + $0x10] sm:$0xff] }
  0x72   :  { %2323 = vmatpush1.bf16.msra.mxu0 %v2322_v40  ;;  %v432_v40 = vld [vmem:[#allocation2 + $0xc00] sm:$0xff]  ;;  %v521_v30 = vld [vmem:[#allocation2 + $0xec8] sm:$0xff] }
  0x73   :  { %2571 = vmatpush1.bf16.msra.mxu1 %v2570_v41  ;;  %2325 = vmatprep.subr.bf16.mxu0 %v2324_v42  ;;  %v440_v41 = vld [vmem:[#allocation2 + $0xc40] sm:$0xff]  ;;  %v434_v42 = vld [vmem:[#allocation2 + $0xc10] sm:$0xff]  ;;  %v2364_v35 = vpack.c.bf16 %v521_v30, %v513_v29  ;;  %v603_v29 = vld [vmem:[#allocation2 + $0x1158] sm:$0xff] }
  0x74   :  { %2573 = vmatprep.subr.bf16.mxu1 %v2572_v46  ;;  %v457_v46 = vld [vmem:[#allocation2 + $0xcc8] sm:$0xff]  ;;  %v2346_v49 = vpack.c.bf16 %v440_v41, %v432_v40  ;;  %v2594_v50 = vpack.c.bf16 %v442_v44, %v434_v42  ;;  %v522_v40 = vld [vmem:[#allocation2 + $0xed0] sm:$0xff]  ;;  %v539_v44 = vld [vmem:[#allocation2 + $0xf58] sm:$0xff] }
  0x75   :  { %v2348_v51 = vpack.c.bf16 %v457_v46, %v449_v45  ;;  %v529_v41 = vld [vmem:[#allocation2 + $0xf08] sm:$0xff] }
  0x76   :  { %2327 = vmatpush1.bf16.msra.mxu0 %v2326_v52  ;;  %v448_v52 = vld [vmem:[#allocation2 + $0xc80] sm:$0xff]  ;;  %v537_v42 = vld [vmem:[#allocation2 + $0xf48] sm:$0xff] }
  0x77   :  { %2575 = vmatpush1.bf16.msra.mxu1 %v2574_v53  ;;  %2329 = vmatprep.subr.bf16.mxu0 %v2328_v54  ;;  %v456_v53 = vld [vmem:[#allocation2 + $0xcc0] sm:$0xff]  ;;  %v450_v54 = vld [vmem:[#allocation2 + $0xc90] sm:$0xff]  ;;  %v2368_v47 = vpack.c.bf16 %v537_v42, %v529_v41  ;;  %v45_v30 = vld [vmem:[%s3476_s0 + $0x28] sm:$0xff] }
  0x78   :  { %2577 = vmatprep.subr.bf16.mxu1 %v2576_v58  ;;  %v473_v58 = vld [vmem:[#allocation2 + $0xd48] sm:$0xff]  ;;  %v2350_v61 = vpack.c.bf16 %v456_v53, %v448_v52  ;;  %v2598_v62 = vpack.c.bf16 %v458_v56, %v450_v54  ;;  %v538_v52 = vld [vmem:[#allocation2 + $0xf50] sm:$0xff]  ;;  %v555_v56 = vld [vmem:[#allocation2 + $0xfd8] sm:$0xff] }
  0x79   :  { %v2352_v63 = vpack.c.bf16 %v473_v58, %v465_v57  ;;  %v545_v53 = vld [vmem:[#allocation2 + $0xf88] sm:$0xff]  ;;  %v611_v41 = vld [vmem:[#allocation2 + $0x1198] sm:$0xff] }
  0x7a   :  { %2331 = vmatpush1.bf16.msra.mxu0 %v2330_v0  ;;  %v464_v0 = vld [vmem:[#allocation2 + $0xd00] sm:$0xff]  ;;  %v553_v54 = vld [vmem:[#allocation2 + $0xfc8] sm:$0xff]  ;;  %v619_v42 = vld [vmem:[#allocation2 + $0x11d8] sm:$0xff] }
  0x7b   :  { %2579 = vmatpush1.bf16.msra.mxu1 %v2578_v1  ;;  %2333 = vmatprep.subr.bf16.mxu0 %v2332_v2  ;;  %v472_v1 = vld [vmem:[#allocation2 + $0xd40] sm:$0xff]  ;;  %v466_v2 = vld [vmem:[#allocation2 + $0xd10] sm:$0xff]  ;;  %v2372_v59 = vpack.c.bf16 %v553_v54, %v545_v53  ;;  %v627_v53 = vld [vmem:[#allocation2 + $0x1218] sm:$0xff] }
  0x7c   :  { %2581 = vmatprep.subr.bf16.mxu1 %v2580_v6  ;;  %v489_v6 = vld [vmem:[#allocation2 + $0xdc8] sm:$0xff]  ;;  %v2354_v9 = vpack.c.bf16 %v472_v1, %v464_v0  ;;  %v2602_v10 = vpack.c.bf16 %v474_v4, %v466_v2  ;;  %v554_v0 = vld [vmem:[#allocation2 + $0xfd0] sm:$0xff]  ;;  %v571_v4 = vld [vmem:[#allocation2 + $0x1058] sm:$0xff] }
  0x7d   :  { %v2356_v11 = vpack.c.bf16 %v489_v6, %v481_v5  ;;  %v561_v1 = vld [vmem:[#allocation2 + $0x1008] sm:$0xff]  ;;  %v635_v54 = vld [vmem:[#allocation2 + $0x1258] sm:$0xff] }
  0x7e   :  { %2335 = vmatpush1.bf16.msra.mxu0 %v2334_v12  ;;  %v480_v12 = vld [vmem:[#allocation2 + $0xd80] sm:$0xff]  ;;  %v569_v2 = vld [vmem:[#allocation2 + $0x1048] sm:$0xff] }
  0x7f   :  { %2583 = vmatpush1.bf16.msra.mxu1 %v2582_v14  ;;  %2337 = vmatprep.subr.bf16.mxu0 %v2336_v15  ;;  %v482_v14 = vld [vmem:[#allocation2 + $0xd90] sm:$0xff]  ;;  %v2604_v15 = vpack.c.bf16 %v491_v8, %v483_v7  ;;  %v2358_v21 = vpack.c.bf16 %v488_v13, %v480_v12  ;;  %v2376_v7 = vpack.c.bf16 %v569_v2, %v561_v1  ;;  %v560_v8 = vld [vmem:[#allocation2 + $0x1000] sm:$0xff]  ;;  %v577_v13 = vld [vmem:[#allocation2 + $0x1088] sm:$0xff] }
  0x80   :  { %2585 = vmatprep.subr.bf16.mxu1 %v2584_v19  ;;  %v499_v19 = vld [vmem:[#allocation2 + $0xe18] sm:$0xff]  ;;  %v2606_v22 = vpack.c.bf16 %v490_v16, %v482_v14  ;;  %v570_v12 = vld [vmem:[#allocation2 + $0x1050] sm:$0xff]  ;;  %v585_v14 = vld [vmem:[#allocation2 + $0x10c8] sm:$0xff] }
  0x81   :  { %v587_v16 = vld [vmem:[#allocation2 + $0x10d8] sm:$0xff] }
  0x82   :  { %2339 = vmatpush1.bf16.msra.mxu0 %v2338_v25  ;;  %v504_v25 = vld [vmem:[#allocation2 + $0xe40] sm:$0xff]  ;;  %v643_v1 = vld [vmem:[#allocation2 + $0x1298] sm:$0xff] }
  0x83   :  { %2587 = vmatpush1.bf16.msra.mxu1 %v2586_v26  ;;  %2341 = vmatprep.subr.bf16.mxu0 %v2340_v27  ;;  %v498_v26 = vld [vmem:[#allocation2 + $0xe10] sm:$0xff]  ;;  %v2608_v27 = vpack.c.bf16 %v507_v20, %v499_v19  ;;  %v2362_v33 = vpack.c.bf16 %v504_v25, %v496_v24  ;;  %v2380_v20 = vpack.c.bf16 %v585_v14, %v577_v13  ;;  %v651_v2 = vld [vmem:[#allocation2 + $0x12d8] sm:$0xff] }
  0x84   :  { %2589 = vmatprep.subr.bf16.mxu1 %v2588_v31  ;;  %v515_v31 = vld [vmem:[#allocation2 + $0xe98] sm:$0xff]  ;;  %v2610_v34 = vpack.c.bf16 %v506_v28, %v498_v26  ;;  %v586_v25 = vld [vmem:[#allocation2 + $0x10d0] sm:$0xff]  ;;  %v593_v26 = vld [vmem:[#allocation2 + $0x1108] sm:$0xff] }
  0x85   :  { %v595_v28 = vld [vmem:[#allocation2 + $0x1118] sm:$0xff] }
  0x86   :  { %2343 = vmatpush1.bf16.msra.mxu0 %v2342_v37  ;;  %v520_v37 = vld [vmem:[#allocation2 + $0xec0] sm:$0xff]  ;;  %v659_v13 = vld [vmem:[#allocation2 + $0x1318] sm:$0xff] }
  0x87   :  { %2591 = vmatpush1.bf16.msra.mxu1 %v2590_v38  ;;  %2345 = vmatprep.subr.bf16.mxu0 %v2344_v39  ;;  %v514_v38 = vld [vmem:[#allocation2 + $0xe90] sm:$0xff]  ;;  %v2612_v39 = vpack.c.bf16 %v523_v32, %v515_v31  ;;  %v2366_v45 = vpack.c.bf16 %v520_v37, %v512_v36  ;;  %v2632_v37 = vpack.c.bf16 %v603_v29, %v595_v28  ;;  %v667_v14 = vld [vmem:[#allocation2 + $0x1358] sm:$0xff] }
  0x88   :  { %2593 = vmatprep.subr.bf16.mxu1 %v2592_v43  ;;  %v531_v43 = vld [vmem:[#allocation2 + $0xf18] sm:$0xff]  ;;  %v2614_v46 = vpack.c.bf16 %v522_v40, %v514_v38  ;;  %v594_v36 = vld [vmem:[#allocation2 + $0x1110] sm:$0xff]  ;;  %v617_v40 = vld [vmem:[#allocation2 + $0x11c8] sm:$0xff] }
  0x89   :  { %v602_v38 = vld [vmem:[#allocation2 + $0x1150] sm:$0xff] }
  0x8a   :  { %2347 = vmatpush1.bf16.msra.mxu0 %v2346_v49  ;;  %v536_v49 = vld [vmem:[#allocation2 + $0xf40] sm:$0xff] }
  0x8b   :  { %2595 = vmatpush1.bf16.msra.mxu1 %v2594_v50  ;;  %2349 = vmatprep.subr.bf16.mxu0 %v2348_v51  ;;  %v530_v50 = vld [vmem:[#allocation2 + $0xf10] sm:$0xff]  ;;  %v2616_v51 = vpack.c.bf16 %v539_v44, %v531_v43  ;;  %v2370_v57 = vpack.c.bf16 %v536_v49, %v528_v48  ;;  %v2634_v44 = vpack.c.bf16 %v602_v38, %v594_v36  ;;  %v697_v36 = vld [vmem:[#allocation2 + $0x1448] sm:$0xff]  ;;  %v699_v38 = vld [vmem:[#allocation2 + $0x1458] sm:$0xff] }
  0x8c   :  { %2597 = vmatprep.subr.bf16.mxu1 %v2596_v55  ;;  %v547_v55 = vld [vmem:[#allocation2 + $0xf98] sm:$0xff]  ;;  %v2618_v58 = vpack.c.bf16 %v538_v52, %v530_v50  ;;  %v610_v48 = vld [vmem:[#allocation2 + $0x1190] sm:$0xff]  ;;  %v2636_v49 = vpack.c.bf16 %v619_v42, %v611_v41  ;;  %v633_v52 = vld [vmem:[#allocation2 + $0x1248] sm:$0xff] }
  0x8d   :  { %v618_v50 = vld [vmem:[#allocation2 + $0x11d0] sm:$0xff]  ;;  %v688_v42 = vld [vmem:[#allocation2 + $0x1400] sm:$0xff] }
  0x8e   :  { %2351 = vmatpush1.bf16.msra.mxu0 %v2350_v61  ;;  %v552_v61 = vld [vmem:[#allocation2 + $0xfc0] sm:$0xff] }
  0x8f   :  { %2599 = vmatpush1.bf16.msra.mxu1 %v2598_v62  ;;  %2353 = vmatprep.subr.bf16.mxu0 %v2352_v63  ;;  %v546_v62 = vld [vmem:[#allocation2 + $0xf90] sm:$0xff]  ;;  %v2620_v63 = vpack.c.bf16 %v555_v56, %v547_v55  ;;  %v2374_v5 = vpack.c.bf16 %v552_v61, %v544_v60  ;;  %v2638_v56 = vpack.c.bf16 %v618_v50, %v610_v48  ;;  %v713_v48 = vld [vmem:[#allocation2 + $0x14c8] sm:$0xff]  ;;  %v715_v50 = vld [vmem:[#allocation2 + $0x14d8] sm:$0xff] }
  0x90   :  { %2601 = vmatprep.subr.bf16.mxu1 %v2600_v3  ;;  %v563_v3 = vld [vmem:[#allocation2 + $0x1018] sm:$0xff]  ;;  %v2622_v6 = vpack.c.bf16 %v554_v0, %v546_v62  ;;  %v626_v60 = vld [vmem:[#allocation2 + $0x1210] sm:$0xff]  ;;  %v2640_v61 = vpack.c.bf16 %v635_v54, %v627_v53  ;;  %v649_v0 = vld [vmem:[#allocation2 + $0x12c8] sm:$0xff] }
  0x91   :  { %v634_v62 = vld [vmem:[#allocation2 + $0x1250] sm:$0xff]  ;;  %v704_v54 = vld [vmem:[#allocation2 + $0x1480] sm:$0xff] }
  0x92   :  { %2355 = vmatpush1.bf16.msra.mxu0 %v2354_v9  ;;  %v568_v9 = vld [vmem:[#allocation2 + $0x1040] sm:$0xff] }
  0x93   :  { %2603 = vmatpush1.bf16.msra.mxu1 %v2602_v10  ;;  %2357 = vmatprep.subr.bf16.mxu0 %v2356_v11  ;;  %v562_v10 = vld [vmem:[#allocation2 + $0x1010] sm:$0xff]  ;;  %v2624_v11 = vpack.c.bf16 %v571_v4, %v563_v3  ;;  %v2378_v18 = vpack.c.bf16 %v568_v9, %v560_v8  ;;  %v2642_v4 = vpack.c.bf16 %v634_v62, %v626_v60  ;;  %v729_v60 = vld [vmem:[#allocation2 + $0x1548] sm:$0xff]  ;;  %v731_v62 = vld [vmem:[#allocation2 + $0x1558] sm:$0xff] }
  0x94   :  { %2605 = vmatprep.subr.bf16.mxu1 %v2604_v15  ;;  %v579_v15 = vld [vmem:[#allocation2 + $0x1098] sm:$0xff]  ;;  %v2626_v19 = vpack.c.bf16 %v570_v12, %v562_v10  ;;  %v642_v8 = vld [vmem:[#allocation2 + $0x1290] sm:$0xff]  ;;  %v2644_v9 = vpack.c.bf16 %v651_v2, %v643_v1  ;;  %v665_v12 = vld [vmem:[#allocation2 + $0x1348] sm:$0xff] }
  0x95   :  { %v2628_v24 = vpack.c.bf16 %v587_v16, %v579_v15  ;;  %v650_v10 = vld [vmem:[#allocation2 + $0x12d0] sm:$0xff]  ;;  %v720_v2 = vld [vmem:[#allocation2 + $0x1500] sm:$0xff] }
  0x96   :  { %2359 = vmatpush1.bf16.msra.mxu0 %v2358_v21  ;;  %v576_v21 = vld [vmem:[#allocation2 + $0x1080] sm:$0xff]  ;;  %v2646_v16 = vpack.c.bf16 %v650_v10, %v642_v8  ;;  %v745_v8 = vld [vmem:[#allocation2 + $0x15c8] sm:$0xff]  ;;  %v747_v10 = vld [vmem:[#allocation2 + $0x15d8] sm:$0xff] }
  0x97   :  { %2607 = vmatpush1.bf16.msra.mxu1 %v2606_v22  ;;  %2361 = vmatprep.subr.bf16.mxu0 %v2360_v23  ;;  %v584_v22 = vld [vmem:[#allocation2 + $0x10c0] sm:$0xff]  ;;  %v578_v23 = vld [vmem:[#allocation2 + $0x1090] sm:$0xff] }
  0x98   :  { %2609 = vmatprep.subr.bf16.mxu1 %v2608_v27  ;;  %v601_v27 = vld [vmem:[#allocation2 + $0x1148] sm:$0xff]  ;;  %v2382_v31 = vpack.c.bf16 %v584_v22, %v576_v21  ;;  %v2630_v32 = vpack.c.bf16 %v586_v25, %v578_v23  ;;  %v2648_v21 = vpack.c.bf16 %v667_v14, %v659_v13  ;;  %v666_v22 = vld [vmem:[#allocation2 + $0x1350] sm:$0xff]  ;;  %v675_v25 = vld [vmem:[#allocation2 + $0x1398] sm:$0xff] }
  0x99   :  { %v673_v23 = vld [vmem:[#allocation2 + $0x1388] sm:$0xff]  ;;  %v736_v14 = vld [vmem:[#allocation2 + $0x1580] sm:$0xff] }
  0x9a   :  { %2363 = vmatpush1.bf16.msra.mxu0 %v2362_v33  ;;  %v2384_v33 = vpack.c.bf16 %v601_v27, %v593_v26  ;;  %v683_v26 = vld [vmem:[#allocation2 + $0x13d8] sm:$0xff] }
  0x9b   :  { %2611 = vmatpush1.bf16.msra.mxu1 %v2610_v34  ;;  %2365 = vmatprep.subr.bf16.mxu0 %v2364_v35  ;;  %v592_v34 = vld [vmem:[#allocation2 + $0x1100] sm:$0xff] }
  0x9c   :  { %2613 = vmatprep.subr.bf16.mxu1 %v2612_v39  ;;  %v600_v35 = vld [vmem:[#allocation2 + $0x1140] sm:$0xff]  ;;  %v609_v39 = vld [vmem:[#allocation2 + $0x1188] sm:$0xff] }
  0x9d   :  { %v2386_v43 = vpack.c.bf16 %v600_v35, %v592_v34  ;;  %v682_v34 = vld [vmem:[#allocation2 + $0x13d0] sm:$0xff]  ;;  %v689_v35 = vld [vmem:[#allocation2 + $0x1408] sm:$0xff] }
  0x9e   :  { %2367 = vmatpush1.bf16.msra.mxu0 %v2366_v45  ;;  %v2388_v45 = vpack.c.bf16 %v617_v40, %v609_v39  ;;  %v2408_v41 = vpack.c.bf16 %v697_v36, %v689_v35 }
  0x9f   :  { %2615 = vmatpush1.bf16.msra.mxu1 %v2614_v46  ;;  %2369 = vmatprep.subr.bf16.mxu0 %v2368_v47  ;;  %v608_v46 = vld [vmem:[#allocation2 + $0x1180] sm:$0xff] }
  0xa0   :  { %2617 = vmatprep.subr.bf16.mxu1 %v2616_v51  ;;  %v616_v47 = vld [vmem:[#allocation2 + $0x11c0] sm:$0xff]  ;;  %v625_v51 = vld [vmem:[#allocation2 + $0x1208] sm:$0xff] }
  0xa1   :  { %v2390_v55 = vpack.c.bf16 %v616_v47, %v608_v46  ;;  %v698_v46 = vld [vmem:[#allocation2 + $0x1450] sm:$0xff]  ;;  %v705_v47 = vld [vmem:[#allocation2 + $0x1488] sm:$0xff] }
  0xa2   :  { %2371 = vmatpush1.bf16.msra.mxu0 %v2370_v57  ;;  %v2392_v57 = vpack.c.bf16 %v633_v52, %v625_v51  ;;  %v2412_v53 = vpack.c.bf16 %v713_v48, %v705_v47 }
  0xa3   :  { %2619 = vmatpush1.bf16.msra.mxu1 %v2618_v58  ;;  %2373 = vmatprep.subr.bf16.mxu0 %v2372_v59  ;;  %v624_v58 = vld [vmem:[#allocation2 + $0x1200] sm:$0xff] }
  0xa4   :  { %2621 = vmatprep.subr.bf16.mxu1 %v2620_v63  ;;  %v632_v59 = vld [vmem:[#allocation2 + $0x1240] sm:$0xff]  ;;  %v641_v63 = vld [vmem:[#allocation2 + $0x1288] sm:$0xff] }
  0xa5   :  { %v2394_v3 = vpack.c.bf16 %v632_v59, %v624_v58  ;;  %v714_v58 = vld [vmem:[#allocation2 + $0x14d0] sm:$0xff]  ;;  %v721_v59 = vld [vmem:[#allocation2 + $0x1508] sm:$0xff] }
  0xa6   :  { %2375 = vmatpush1.bf16.msra.mxu0 %v2374_v5  ;;  %v2396_v5 = vpack.c.bf16 %v649_v0, %v641_v63  ;;  %v2416_v1 = vpack.c.bf16 %v729_v60, %v721_v59 }
  0xa7   :  { %2623 = vmatpush1.bf16.msra.mxu1 %v2622_v6  ;;  %2377 = vmatprep.subr.bf16.mxu0 %v2376_v7  ;;  %v640_v6 = vld [vmem:[#allocation2 + $0x1280] sm:$0xff] }
  0xa8   :  { %2625 = vmatprep.subr.bf16.mxu1 %v2624_v11  ;;  %v648_v7 = vld [vmem:[#allocation2 + $0x12c0] sm:$0xff]  ;;  %v657_v11 = vld [vmem:[#allocation2 + $0x1308] sm:$0xff] }
  0xa9   :  { %1230 = vmatmul.mubr.f32.vlgmr.msra.gmra.mrb[0].mxu0 %v42_v17  ;;  %v2398_v15 = vpack.c.bf16 %v648_v7, %v640_v6  ;;  %v730_v6 = vld [vmem:[#allocation2 + $0x1550] sm:$0xff]  ;;  %v737_v7 = vld [vmem:[#allocation2 + $0x1588] sm:$0xff] }
  0xaa   :  { %2379 = vmatpush1.bf16.msra.mxu0 %v2378_v18  ;;  %1514 = vmatmul.mubr.f32.vlgmr.msra.gmra.mrb[0].mxu1 %v42_v17  ;;  %v2400_v17 = vpack.c.bf16 %v665_v12, %v657_v11  ;;  %v656_v18 = vld [vmem:[#allocation2 + $0x1300] sm:$0xff]  ;;  %v2420_v13 = vpack.c.bf16 %v745_v8, %v737_v7 }
  0xab   :  { %2627 = vmatpush1.bf16.msra.mxu1 %v2626_v19  ;;  %2381 = vmatprep.subr.bf16.mxu0 %v2380_v20  ;;  %v664_v19 = vld [vmem:[#allocation2 + $0x1340] sm:$0xff]  ;;  %v658_v20 = vld [vmem:[#allocation2 + $0x1310] sm:$0xff] }
  0xac   :  { %2629 = vmatprep.subr.bf16.mxu1 %v2628_v24  ;;  %1300 = vmatprep.mubr.f32.mxu0 %v45_v30  ;;  %v681_v24 = vld [vmem:[#allocation2 + $0x13c8] sm:$0xff]  ;;  %v2402_v27 = vpack.c.bf16 %v664_v19, %v656_v18  ;;  %v2650_v28 = vpack.c.bf16 %v666_v22, %v658_v20  ;;  %v746_v18 = vld [vmem:[#allocation2 + $0x15d0] sm:$0xff]  ;;  %v763_v22 = vld [vmem:[#allocation2 + $0x1658] sm:$0xff] }
  0xad   :  { %1584 = vmatprep.mubr.f32.mxu1 %v45_v30  ;;  %v2404_v29 = vpack.c.bf16 %v681_v24, %v673_v23  ;;  %v672_v30 = vld [vmem:[#allocation2 + $0x1380] sm:$0xff]  ;;  %v753_v19 = vld [vmem:[#allocation2 + $0x1608] sm:$0xff] }
  0xae   :  { %2383 = vmatpush1.bf16.msra.mxu0 %v2382_v31  ;;  %v680_v31 = vld [vmem:[#allocation2 + $0x13c0] sm:$0xff]  ;;  %v761_v20 = vld [vmem:[#allocation2 + $0x1648] sm:$0xff] }
  0xaf   :  { %2631 = vmatpush1.bf16.msra.mxu1 %v2630_v32  ;;  %2385 = vmatprep.subr.bf16.mxu0 %v2384_v33  ;;  %v674_v32 = vld [vmem:[#allocation2 + $0x1390] sm:$0xff]  ;;  %v2652_v33 = vpack.c.bf16 %v683_v26, %v675_v25  ;;  %v2406_v39 = vpack.c.bf16 %v680_v31, %v672_v30  ;;  %v2424_v25 = vpack.c.bf16 %v761_v20, %v753_v19  ;;  %v752_v26 = vld [vmem:[#allocation2 + $0x1600] sm:$0xff]  ;;  %v769_v31 = vld [vmem:[#allocation2 + $0x1688] sm:$0xff] }
  0xb0   :  { %2633 = vmatprep.subr.bf16.mxu1 %v2632_v37  ;;  %v691_v37 = vld [vmem:[#allocation2 + $0x1418] sm:$0xff]  ;;  %v2654_v40 = vpack.c.bf16 %v682_v34, %v674_v32  ;;  %v762_v30 = vld [vmem:[#allocation2 + $0x1650] sm:$0xff]  ;;  %v777_v32 = vld [vmem:[#allocation2 + $0x16c8] sm:$0xff] }
  0xb1   :  { %v779_v34 = vld [vmem:[#allocation2 + $0x16d8] sm:$0xff]  ;;  %v44_v19 = vld [vmem:[%s3476_s0 + $0x20] sm:$0xff] }
  0xb2   :  { %2387 = vmatpush1.bf16.msra.mxu0 %v2386_v43  ;;  %v696_v43 = vld [vmem:[#allocation2 + $0x1440] sm:$0xff] }
  0xb3   :  { %2635 = vmatpush1.bf16.msra.mxu1 %v2634_v44  ;;  %2389 = vmatprep.subr.bf16.mxu0 %v2388_v45  ;;  %v690_v44 = vld [vmem:[#allocation2 + $0x1410] sm:$0xff]  ;;  %v2656_v45 = vpack.c.bf16 %v699_v38, %v691_v37  ;;  %v2410_v51 = vpack.c.bf16 %v696_v43, %v688_v42  ;;  %v2428_v37 = vpack.c.bf16 %v777_v32, %v769_v31  ;;  %v768_v38 = vld [vmem:[#allocation2 + $0x1680] sm:$0xff]  ;;  %v785_v43 = vld [vmem:[#allocation2 + $0x1708] sm:$0xff] }
  0xb4   :  { %2637 = vmatprep.subr.bf16.mxu1 %v2636_v49  ;;  %v707_v49 = vld [vmem:[#allocation2 + $0x1498] sm:$0xff]  ;;  %v2658_v52 = vpack.c.bf16 %v698_v46, %v690_v44  ;;  %v778_v42 = vld [vmem:[#allocation2 + $0x16d0] sm:$0xff]  ;;  %v793_v44 = vld [vmem:[#allocation2 + $0x1748] sm:$0xff] }
  0xb5   :  { %v795_v46 = vld [vmem:[#allocation2 + $0x1758] sm:$0xff] }
  0xb6   :  { %2391 = vmatpush1.bf16.msra.mxu0 %v2390_v55  ;;  %v712_v55 = vld [vmem:[#allocation2 + $0x14c0] sm:$0xff]  ;;  %v859_v31 = vld [vmem:[#allocation2 + $0x1958] sm:$0xff] }
  0xb7   :  { %2639 = vmatpush1.bf16.msra.mxu1 %v2638_v56  ;;  %2393 = vmatprep.subr.bf16.mxu0 %v2392_v57  ;;  %v706_v56 = vld [vmem:[#allocation2 + $0x1490] sm:$0xff]  ;;  %v2660_v57 = vpack.c.bf16 %v715_v50, %v707_v49  ;;  %v2414_v63 = vpack.c.bf16 %v712_v55, %v704_v54  ;;  %v2432_v49 = vpack.c.bf16 %v793_v44, %v785_v43  ;;  %v784_v50 = vld [vmem:[#allocation2 + $0x1700] sm:$0xff]  ;;  %v801_v55 = vld [vmem:[#allocation2 + $0x1788] sm:$0xff] }
  0xb8   :  { %2641 = vmatprep.subr.bf16.mxu1 %v2640_v61  ;;  %v723_v61 = vld [vmem:[#allocation2 + $0x1518] sm:$0xff]  ;;  %v2662_v0 = vpack.c.bf16 %v714_v58, %v706_v56  ;;  %v794_v54 = vld [vmem:[#allocation2 + $0x1750] sm:$0xff]  ;;  %v809_v56 = vld [vmem:[#allocation2 + $0x17c8] sm:$0xff] }
  0xb9   :  { %v811_v58 = vld [vmem:[#allocation2 + $0x17d8] sm:$0xff] }
  0xba   :  { %2395 = vmatpush1.bf16.msra.mxu0 %v2394_v3  ;;  %v728_v3 = vld [vmem:[#allocation2 + $0x1540] sm:$0xff]  ;;  %v47_v32 = vld [vmem:[%s3476_s0 + $0x38] sm:$0xff] }
  0xbb   :  { %2643 = vmatpush1.bf16.msra.mxu1 %v2642_v4  ;;  %2397 = vmatprep.subr.bf16.mxu0 %v2396_v5  ;;  %v722_v4 = vld [vmem:[#allocation2 + $0x1510] sm:$0xff]  ;;  %v2664_v5 = vpack.c.bf16 %v731_v62, %v723_v61  ;;  %v2418_v11 = vpack.c.bf16 %v728_v3, %v720_v2  ;;  %v2436_v61 = vpack.c.bf16 %v809_v56, %v801_v55  ;;  %v800_v62 = vld [vmem:[#allocation2 + $0x1780] sm:$0xff]  ;;  %v817_v3 = vld [vmem:[#allocation2 + $0x1808] sm:$0xff] }
  0xbc   :  { %2645 = vmatprep.subr.bf16.mxu1 %v2644_v9  ;;  %v739_v9 = vld [vmem:[#allocation2 + $0x1598] sm:$0xff]  ;;  %v2666_v12 = vpack.c.bf16 %v730_v6, %v722_v4  ;;  %v810_v2 = vld [vmem:[#allocation2 + $0x17d0] sm:$0xff]  ;;  %v825_v4 = vld [vmem:[#allocation2 + $0x1848] sm:$0xff] }
  0xbd   :  { %v827_v6 = vld [vmem:[#allocation2 + $0x1858] sm:$0xff] }
  0xbe   :  { %2399 = vmatpush1.bf16.msra.mxu0 %v2398_v15  ;;  %v744_v15 = vld [vmem:[#allocation2 + $0x15c0] sm:$0xff]  ;;  %v867_v43 = vld [vmem:[#allocation2 + $0x1998] sm:$0xff] }
  0xbf   :  { %2647 = vmatpush1.bf16.msra.mxu1 %v2646_v16  ;;  %2401 = vmatprep.subr.bf16.mxu0 %v2400_v17  ;;  %v738_v16 = vld [vmem:[#allocation2 + $0x1590] sm:$0xff]  ;;  %v2668_v17 = vpack.c.bf16 %v747_v10, %v739_v9  ;;  %v2422_v23 = vpack.c.bf16 %v744_v15, %v736_v14  ;;  %v2440_v9 = vpack.c.bf16 %v825_v4, %v817_v3  ;;  %v816_v10 = vld [vmem:[#allocation2 + $0x1800] sm:$0xff]  ;;  %v833_v15 = vld [vmem:[#allocation2 + $0x1888] sm:$0xff] }
  0xc0   :  { %2649 = vmatprep.subr.bf16.mxu1 %v2648_v21  ;;  %v755_v21 = vld [vmem:[#allocation2 + $0x1618] sm:$0xff]  ;;  %v2670_v24 = vpack.c.bf16 %v746_v18, %v738_v16  ;;  %v826_v14 = vld [vmem:[#allocation2 + $0x1850] sm:$0xff]  ;;  %v841_v16 = vld [vmem:[#allocation2 + $0x18c8] sm:$0xff] }
  0xc1   :  { %v843_v18 = vld [vmem:[#allocation2 + $0x18d8] sm:$0xff] }
  0xc2   :  { %2403 = vmatpush1.bf16.msra.mxu0 %v2402_v27  ;;  %v760_v27 = vld [vmem:[#allocation2 + $0x1640] sm:$0xff]  ;;  %v875_v44 = vld [vmem:[#allocation2 + $0x19d8] sm:$0xff] }
  0xc3   :  { %2651 = vmatpush1.bf16.msra.mxu1 %v2650_v28  ;;  %2405 = vmatprep.subr.bf16.mxu0 %v2404_v29  ;;  %v754_v28 = vld [vmem:[#allocation2 + $0x1610] sm:$0xff]  ;;  %v2672_v29 = vpack.c.bf16 %v763_v22, %v755_v21  ;;  %v2426_v35 = vpack.c.bf16 %v760_v27, %v752_v26  ;;  %v2444_v22 = vpack.c.bf16 %v841_v16, %v833_v15  ;;  %v883_v55 = vld [vmem:[#allocation2 + $0x1a18] sm:$0xff] }
  0xc4   :  { %2653 = vmatprep.subr.bf16.mxu1 %v2652_v33  ;;  %v771_v33 = vld [vmem:[#allocation2 + $0x1698] sm:$0xff]  ;;  %v2674_v36 = vpack.c.bf16 %v762_v30, %v754_v28  ;;  %v842_v27 = vld [vmem:[#allocation2 + $0x18d0] sm:$0xff]  ;;  %v849_v28 = vld [vmem:[#allocation2 + $0x1908] sm:$0xff] }
  0xc5   :  { %v851_v30 = vld [vmem:[#allocation2 + $0x1918] sm:$0xff] }
  0xc6   :  { %2407 = vmatpush1.bf16.msra.mxu0 %v2406_v39  ;;  %v776_v39 = vld [vmem:[#allocation2 + $0x16c0] sm:$0xff]  ;;  %v891_v56 = vld [vmem:[#allocation2 + $0x1a58] sm:$0xff] }
  0xc7   :  { %2655 = vmatpush1.bf16.msra.mxu1 %v2654_v40  ;;  %2409 = vmatprep.subr.bf16.mxu0 %v2408_v41  ;;  %v770_v40 = vld [vmem:[#allocation2 + $0x1690] sm:$0xff]  ;;  %v2676_v41 = vpack.c.bf16 %v779_v34, %v771_v33  ;;  %v2430_v47 = vpack.c.bf16 %v776_v39, %v768_v38  ;;  %v2696_v39 = vpack.c.bf16 %v859_v31, %v851_v30  ;;  %v899_v3 = vld [vmem:[#allocation2 + $0x1a98] sm:$0xff] }
  0xc8   :  { %2657 = vmatprep.subr.bf16.mxu1 %v2656_v45  ;;  %v787_v45 = vld [vmem:[#allocation2 + $0x1718] sm:$0xff]  ;;  %v2678_v48 = vpack.c.bf16 %v778_v42, %v770_v40  ;;  %v850_v38 = vld [vmem:[#allocation2 + $0x1910] sm:$0xff]  ;;  %v873_v42 = vld [vmem:[#allocation2 + $0x19c8] sm:$0xff] }
  0xc9   :  { %v858_v40 = vld [vmem:[#allocation2 + $0x1950] sm:$0xff]  ;;  %v907_v4 = vld [vmem:[#allocation2 + $0x1ad8] sm:$0xff] }
  0xca   :  { %2411 = vmatpush1.bf16.msra.mxu0 %v2410_v51  ;;  %v792_v51 = vld [vmem:[#allocation2 + $0x1740] sm:$0xff]  ;;  %v915_v15 = vld [vmem:[#allocation2 + $0x1b18] sm:$0xff] }
  0xcb   :  { %2659 = vmatpush1.bf16.msra.mxu1 %v2658_v52  ;;  %2413 = vmatprep.subr.bf16.mxu0 %v2412_v53  ;;  %v786_v52 = vld [vmem:[#allocation2 + $0x1710] sm:$0xff]  ;;  %v2680_v53 = vpack.c.bf16 %v795_v46, %v787_v45  ;;  %v2434_v59 = vpack.c.bf16 %v792_v51, %v784_v50  ;;  %v2698_v46 = vpack.c.bf16 %v858_v40, %v850_v38  ;;  %v923_v16 = vld [vmem:[#allocation2 + $0x1b58] sm:$0xff]  ;;  %v953_v38 = vld [vmem:[#allocation2 + $0x1c48] sm:$0xff] }
  0xcc   :  { %2661 = vmatprep.subr.bf16.mxu1 %v2660_v57  ;;  %v803_v57 = vld [vmem:[#allocation2 + $0x1798] sm:$0xff]  ;;  %v2682_v60 = vpack.c.bf16 %v794_v54, %v786_v52  ;;  %v866_v50 = vld [vmem:[#allocation2 + $0x1990] sm:$0xff]  ;;  %v2700_v51 = vpack.c.bf16 %v875_v44, %v867_v43  ;;  %v889_v54 = vld [vmem:[#allocation2 + $0x1a48] sm:$0xff] }
  0xcd   :  { %v874_v52 = vld [vmem:[#allocation2 + $0x19d0] sm:$0xff]  ;;  %v955_v40 = vld [vmem:[#allocation2 + $0x1c58] sm:$0xff]  ;;  %v944_v44 = vld [vmem:[#allocation2 + $0x1c00] sm:$0xff] }
  0xce   :  { %2415 = vmatpush1.bf16.msra.mxu0 %v2414_v63  ;;  %v808_v63 = vld [vmem:[#allocation2 + $0x17c0] sm:$0xff] }
  0xcf   :  { %2663 = vmatpush1.bf16.msra.mxu1 %v2662_v0  ;;  %2417 = vmatprep.subr.bf16.mxu0 %v2416_v1  ;;  %v802_v0 = vld [vmem:[#allocation2 + $0x1790] sm:$0xff]  ;;  %v2684_v1 = vpack.c.bf16 %v811_v58, %v803_v57  ;;  %v2438_v7 = vpack.c.bf16 %v808_v63, %v800_v62  ;;  %v2702_v58 = vpack.c.bf16 %v874_v52, %v866_v50  ;;  %v969_v50 = vld [vmem:[#allocation2 + $0x1cc8] sm:$0xff]  ;;  %v971_v52 = vld [vmem:[#allocation2 + $0x1cd8] sm:$0xff] }
  0xd0   :  { %2665 = vmatprep.subr.bf16.mxu1 %v2664_v5  ;;  %v819_v5 = vld [vmem:[#allocation2 + $0x1818] sm:$0xff]  ;;  %v2686_v8 = vpack.c.bf16 %v810_v2, %v802_v0  ;;  %v882_v62 = vld [vmem:[#allocation2 + $0x1a10] sm:$0xff]  ;;  %v2704_v63 = vpack.c.bf16 %v891_v56, %v883_v55  ;;  %v905_v2 = vld [vmem:[#allocation2 + $0x1ac8] sm:$0xff] }
  0xd1   :  { %v890_v0 = vld [vmem:[#allocation2 + $0x1a50] sm:$0xff]  ;;  %v960_v56 = vld [vmem:[#allocation2 + $0x1c80] sm:$0xff] }
  0xd2   :  { %2419 = vmatpush1.bf16.msra.mxu0 %v2418_v11  ;;  %v824_v11 = vld [vmem:[#allocation2 + $0x1840] sm:$0xff] }
  0xd3   :  { %2667 = vmatpush1.bf16.msra.mxu1 %v2666_v12  ;;  %2421 = vmatprep.subr.bf16.mxu0 %v2420_v13  ;;  %v818_v12 = vld [vmem:[#allocation2 + $0x1810] sm:$0xff]  ;;  %v2688_v13 = vpack.c.bf16 %v827_v6, %v819_v5  ;;  %v2442_v20 = vpack.c.bf16 %v824_v11, %v816_v10  ;;  %v2706_v6 = vpack.c.bf16 %v890_v0, %v882_v62  ;;  %v985_v62 = vld [vmem:[#allocation2 + $0x1d48] sm:$0xff]  ;;  %v987_v0 = vld [vmem:[#allocation2 + $0x1d58] sm:$0xff] }
  0xd4   :  { %2669 = vmatprep.subr.bf16.mxu1 %v2668_v17  ;;  %v835_v17 = vld [vmem:[#allocation2 + $0x1898] sm:$0xff]  ;;  %v2690_v21 = vpack.c.bf16 %v826_v14, %v818_v12  ;;  %v898_v10 = vld [vmem:[#allocation2 + $0x1a90] sm:$0xff]  ;;  %v2708_v11 = vpack.c.bf16 %v907_v4, %v899_v3  ;;  %v921_v14 = vld [vmem:[#allocation2 + $0x1b48] sm:$0xff] }
  0xd5   :  { %v2692_v26 = vpack.c.bf16 %v843_v18, %v835_v17  ;;  %v906_v12 = vld [vmem:[#allocation2 + $0x1ad0] sm:$0xff]  ;;  %v976_v4 = vld [vmem:[#allocation2 + $0x1d00] sm:$0xff] }
  0xd6   :  { %2423 = vmatpush1.bf16.msra.mxu0 %v2422_v23  ;;  %v832_v23 = vld [vmem:[#allocation2 + $0x1880] sm:$0xff]  ;;  %v2710_v18 = vpack.c.bf16 %v906_v12, %v898_v10  ;;  %v1001_v10 = vld [vmem:[#allocation2 + $0x1dc8] sm:$0xff]  ;;  %v1003_v12 = vld [vmem:[#allocation2 + $0x1dd8] sm:$0xff] }
  0xd7   :  { %2671 = vmatpush1.bf16.msra.mxu1 %v2670_v24  ;;  %2425 = vmatprep.subr.bf16.mxu0 %v2424_v25  ;;  %v840_v24 = vld [vmem:[#allocation2 + $0x18c0] sm:$0xff]  ;;  %v834_v25 = vld [vmem:[#allocation2 + $0x1890] sm:$0xff] }
  0xd8   :  { %2673 = vmatprep.subr.bf16.mxu1 %v2672_v29  ;;  %v857_v29 = vld [vmem:[#allocation2 + $0x1948] sm:$0xff]  ;;  %v2446_v33 = vpack.c.bf16 %v840_v24, %v832_v23  ;;  %v2694_v34 = vpack.c.bf16 %v842_v27, %v834_v25  ;;  %v2712_v23 = vpack.c.bf16 %v923_v16, %v915_v15  ;;  %v922_v24 = vld [vmem:[#allocation2 + $0x1b50] sm:$0xff]  ;;  %v931_v27 = vld [vmem:[#allocation2 + $0x1b98] sm:$0xff] }
  0xd9   :  { %v929_v25 = vld [vmem:[#allocation2 + $0x1b88] sm:$0xff]  ;;  %v992_v16 = vld [vmem:[#allocation2 + $0x1d80] sm:$0xff] }
  0xda   :  { %2427 = vmatpush1.bf16.msra.mxu0 %v2426_v35  ;;  %v2448_v35 = vpack.c.bf16 %v857_v29, %v849_v28  ;;  %v939_v28 = vld [vmem:[#allocation2 + $0x1bd8] sm:$0xff] }
  0xdb   :  { %2675 = vmatpush1.bf16.msra.mxu1 %v2674_v36  ;;  %2429 = vmatprep.subr.bf16.mxu0 %v2428_v37  ;;  %v848_v36 = vld [vmem:[#allocation2 + $0x1900] sm:$0xff] }
  0xdc   :  { %2677 = vmatprep.subr.bf16.mxu1 %v2676_v41  ;;  %v856_v37 = vld [vmem:[#allocation2 + $0x1940] sm:$0xff]  ;;  %v865_v41 = vld [vmem:[#allocation2 + $0x1988] sm:$0xff] }
  0xdd   :  { %v2450_v45 = vpack.c.bf16 %v856_v37, %v848_v36  ;;  %v938_v36 = vld [vmem:[#allocation2 + $0x1bd0] sm:$0xff]  ;;  %v945_v37 = vld [vmem:[#allocation2 + $0x1c08] sm:$0xff] }
  0xde   :  { %2431 = vmatpush1.bf16.msra.mxu0 %v2430_v47  ;;  %v2452_v47 = vpack.c.bf16 %v873_v42, %v865_v41  ;;  %v2472_v43 = vpack.c.bf16 %v953_v38, %v945_v37 }
  0xdf   :  { %2679 = vmatpush1.bf16.msra.mxu1 %v2678_v48  ;;  %2433 = vmatprep.subr.bf16.mxu0 %v2432_v49  ;;  %v864_v48 = vld [vmem:[#allocation2 + $0x1980] sm:$0xff] }
  0xe0   :  { %2681 = vmatprep.subr.bf16.mxu1 %v2680_v53  ;;  %v872_v49 = vld [vmem:[#allocation2 + $0x19c0] sm:$0xff]  ;;  %v881_v53 = vld [vmem:[#allocation2 + $0x1a08] sm:$0xff] }
  0xe1   :  { %v2454_v57 = vpack.c.bf16 %v872_v49, %v864_v48  ;;  %v954_v48 = vld [vmem:[#allocation2 + $0x1c50] sm:$0xff]  ;;  %v961_v49 = vld [vmem:[#allocation2 + $0x1c88] sm:$0xff] }
  0xe2   :  { %2435 = vmatpush1.bf16.msra.mxu0 %v2434_v59  ;;  %v2456_v59 = vpack.c.bf16 %v889_v54, %v881_v53  ;;  %v2476_v55 = vpack.c.bf16 %v969_v50, %v961_v49  ;;  %v53_v49 = vld [vmem:[#allocation2 + $0x28] sm:$0xff]  ;;  %v1040_v50 = vld [vmem:[#allocation2 + $0x1f00] sm:$0xff] }
  0xe3   :  { %2683 = vmatpush1.bf16.msra.mxu1 %v2682_v60  ;;  %2437 = vmatprep.subr.bf16.mxu0 %v2436_v61  ;;  %v880_v60 = vld [vmem:[#allocation2 + $0x1a00] sm:$0xff] }
  0xe4   :  { %2685 = vmatprep.subr.bf16.mxu1 %v2684_v1  ;;  %v888_v61 = vld [vmem:[#allocation2 + $0x1a40] sm:$0xff]  ;;  %v897_v1 = vld [vmem:[#allocation2 + $0x1a88] sm:$0xff] }
  0xe5   :  { %v2458_v5 = vpack.c.bf16 %v888_v61, %v880_v60  ;;  %v970_v60 = vld [vmem:[#allocation2 + $0x1cd0] sm:$0xff]  ;;  %v977_v61 = vld [vmem:[#allocation2 + $0x1d08] sm:$0xff] }
  0xe6   :  { %2439 = vmatpush1.bf16.msra.mxu0 %v2438_v7  ;;  %v2460_v7 = vpack.c.bf16 %v905_v2, %v897_v1  ;;  %v2480_v3 = vpack.c.bf16 %v985_v62, %v977_v61  ;;  %v46_v61 = vld [vmem:[%s3476_s0 + $0x30] sm:$0xff] }
  0xe7   :  { %2687 = vmatpush1.bf16.msra.mxu1 %v2686_v8  ;;  %2441 = vmatprep.subr.bf16.mxu0 %v2440_v9  ;;  %v896_v8 = vld [vmem:[#allocation2 + $0x1a80] sm:$0xff] }
  0xe8   :  { %2689 = vmatprep.subr.bf16.mxu1 %v2688_v13  ;;  %v904_v9 = vld [vmem:[#allocation2 + $0x1ac0] sm:$0xff]  ;;  %v913_v13 = vld [vmem:[#allocation2 + $0x1b08] sm:$0xff] }
  0xe9   :  { %1301 = vmatmul.mubr.f32.vlgmr.msra.gmra.mrb[0].mxu0 %v44_v19  ;;  %v2462_v17 = vpack.c.bf16 %v904_v9, %v896_v8  ;;  %v986_v8 = vld [vmem:[#allocation2 + $0x1d50] sm:$0xff]  ;;  %v993_v9 = vld [vmem:[#allocation2 + $0x1d88] sm:$0xff] }
  0xea   :  { %2443 = vmatpush1.bf16.msra.mxu0 %v2442_v20  ;;  %1585 = vmatmul.mubr.f32.vlgmr.msra.gmra.mrb[0].mxu1 %v44_v19  ;;  %v2464_v19 = vpack.c.bf16 %v921_v14, %v913_v13  ;;  %v912_v20 = vld [vmem:[#allocation2 + $0x1b00] sm:$0xff]  ;;  %v2484_v15 = vpack.c.bf16 %v1001_v10, %v993_v9  ;;  %v78_v9 = vld [vmem:[#allocation2 + $0xf0] sm:$0xff]  ;;  %v85_v10 = vld [vmem:[#allocation2 + $0x128] sm:$0xff] }
  0xeb   :  { %2691 = vmatpush1.bf16.msra.mxu1 %v2690_v21  ;;  %2445 = vmatprep.subr.bf16.mxu0 %v2444_v22  ;;  %v920_v21 = vld [vmem:[#allocation2 + $0x1b40] sm:$0xff]  ;;  %v914_v22 = vld [vmem:[#allocation2 + $0x1b10] sm:$0xff] }
  0xec   :  { %2693 = vmatprep.subr.bf16.mxu1 %v2692_v26  ;;  %2244 = vmatprep.mubr.msk.f32.mxu0 %vm1090_vm0, %v47_v32  ;;  %v937_v26 = vld [vmem:[#allocation2 + $0x1bc8] sm:$0xff]  ;;  %v2466_v29 = vpack.c.bf16 %v920_v21, %v912_v20  ;;  %v2714_v30 = vpack.c.bf16 %v922_v24, %v914_v22  ;;  %v1002_v20 = vld [vmem:[#allocation2 + $0x1dd0] sm:$0xff]  ;;  %v1019_v24 = vld [vmem:[#allocation2 + $0x1e58] sm:$0xff] }
  0xed   :  { %2245 = vmatprep.mubr.msk.f32.mxu1 %vm1090_vm0, %v47_v32  ;;  %v2468_v31 = vpack.c.bf16 %v937_v26, %v929_v25  ;;  %v928_v32 = vld [vmem:[#allocation2 + $0x1b80] sm:$0xff]  ;;  %v1009_v21 = vld [vmem:[#allocation2 + $0x1e08] sm:$0xff] }
  0xee   :  { %2447 = vmatpush1.bf16.msra.mxu0 %v2446_v33  ;;  %v936_v33 = vld [vmem:[#allocation2 + $0x1bc0] sm:$0xff]  ;;  %v1017_v22 = vld [vmem:[#allocation2 + $0x1e48] sm:$0xff] }
  0xef   :  { %2695 = vmatpush1.bf16.msra.mxu1 %v2694_v34  ;;  %2449 = vmatprep.subr.bf16.mxu0 %v2448_v35  ;;  %v930_v34 = vld [vmem:[#allocation2 + $0x1b90] sm:$0xff]  ;;  %v2716_v35 = vpack.c.bf16 %v939_v28, %v931_v27  ;;  %v2470_v41 = vpack.c.bf16 %v936_v33, %v928_v32  ;;  %v2488_v27 = vpack.c.bf16 %v1017_v22, %v1009_v21  ;;  %v1008_v28 = vld [vmem:[#allocation2 + $0x1e00] sm:$0xff]  ;;  %v1025_v33 = vld [vmem:[#allocation2 + $0x1e88] sm:$0xff] }
  0xf0   :  { %2697 = vmatprep.subr.bf16.mxu1 %v2696_v39  ;;  %v947_v39 = vld [vmem:[#allocation2 + $0x1c18] sm:$0xff]  ;;  %v2718_v42 = vpack.c.bf16 %v938_v36, %v930_v34  ;;  %v1018_v32 = vld [vmem:[#allocation2 + $0x1e50] sm:$0xff]  ;;  %v1033_v34 = vld [vmem:[#allocation2 + $0x1ec8] sm:$0xff] }
  0xf1   :  { %v1035_v36 = vld [vmem:[#allocation2 + $0x1ed8] sm:$0xff]  ;;  %v94_v21 = vld [vmem:[#allocation2 + $0x170] sm:$0xff]  ;;  %v101_v22 = vld [vmem:[#allocation2 + $0x1a8] sm:$0xff] }
  0xf2   :  { %2451 = vmatpush1.bf16.msra.mxu0 %v2450_v45  ;;  %v952_v45 = vld [vmem:[#allocation2 + $0x1c40] sm:$0xff] }
  0xf3   :  { %2699 = vmatpush1.bf16.msra.mxu1 %v2698_v46  ;;  %2453 = vmatprep.subr.bf16.mxu0 %v2452_v47  ;;  %v946_v46 = vld [vmem:[#allocation2 + $0x1c10] sm:$0xff]  ;;  %v2720_v47 = vpack.c.bf16 %v955_v40, %v947_v39  ;;  %v2474_v53 = vpack.c.bf16 %v952_v45, %v944_v44  ;;  %v2492_v39 = vpack.c.bf16 %v1033_v34, %v1025_v33  ;;  %v1024_v40 = vld [vmem:[#allocation2 + $0x1e80] sm:$0xff] }
  0xf4   :  { %2701 = vmatprep.subr.bf16.mxu1 %v2700_v51  ;;  %v963_v51 = vld [vmem:[#allocation2 + $0x1c98] sm:$0xff]  ;;  %v2722_v54 = vpack.c.bf16 %v954_v48, %v946_v46  ;;  %v1034_v44 = vld [vmem:[#allocation2 + $0x1ed0] sm:$0xff] }
  0xf5   :  { %v1043_v48 = vld [vmem:[#allocation2 + $0x1f18] sm:$0xff]  ;;  %v110_v34 = vld [vmem:[#allocation2 + $0x1f0] sm:$0xff] }
  0xf6   :  { %2455 = vmatpush1.bf16.msra.mxu0 %v2454_v57  ;;  %v968_v57 = vld [vmem:[#allocation2 + $0x1cc0] sm:$0xff] }
  0xf7   :  { %2703 = vmatpush1.bf16.msra.mxu1 %v2702_v58  ;;  %2457 = vmatprep.subr.bf16.mxu0 %v2456_v59  ;;  %v962_v58 = vld [vmem:[#allocation2 + $0x1c90] sm:$0xff]  ;;  %v2724_v59 = vpack.c.bf16 %v971_v52, %v963_v51  ;;  %v2478_v1 = vpack.c.bf16 %v968_v57, %v960_v56  ;;  %v61_v51 = vld [vmem:[#allocation2 + $0x68] sm:$0xff]  ;;  %v55_v52 = vld [vmem:[#allocation2 + $0x38] sm:$0xff] }
  0xf8   :  { %2705 = vmatprep.subr.bf16.mxu1 %v2704_v63  ;;  %v979_v63 = vld [vmem:[#allocation2 + $0x1d18] sm:$0xff]  ;;  %v2726_v2 = vpack.c.bf16 %v970_v60, %v962_v58  ;;  %v60_v56 = vld [vmem:[#allocation2 + $0x60] sm:$0xff]  ;;  %v54_v57 = vld [vmem:[#allocation2 + $0x30] sm:$0xff]  ;;  %v2744_v62 = vpack.c.bf16 %v61_v51, %v53_v49 }
  0xf9   :  { %v62_v58 = vld [vmem:[#allocation2 + $0x70] sm:$0xff]  ;;  %v77_v60 = vld [vmem:[#allocation2 + $0xe8] sm:$0xff]  ;;  %v135_v49 = vld [vmem:[#allocation2 + $0x2b8] sm:$0xff] }
  0xfa   :  { %2459 = vmatpush1.bf16.msra.mxu0 %v2458_v5  ;;  %v984_v5 = vld [vmem:[#allocation2 + $0x1d40] sm:$0xff] }
  0xfb   :  { %2707 = vmatpush1.bf16.msra.mxu1 %v2706_v6  ;;  %2461 = vmatprep.subr.bf16.mxu0 %v2460_v7  ;;  %v978_v6 = vld [vmem:[#allocation2 + $0x1d10] sm:$0xff]  ;;  %v2728_v7 = vpack.c.bf16 %v987_v0, %v979_v63  ;;  %v2482_v13 = vpack.c.bf16 %v984_v5, %v976_v4  ;;  %v71_v63 = vld [vmem:[#allocation2 + $0xb8] sm:$0xff]  ;;  %v68_v5 = vld [vmem:[#allocation2 + $0xa0] sm:$0xff] }
  0xfc   :  { %2709 = vmatprep.subr.bf16.mxu1 %v2708_v11  ;;  %v995_v11 = vld [vmem:[#allocation2 + $0x1d98] sm:$0xff]  ;;  %v2730_v14 = vpack.c.bf16 %v986_v8, %v978_v6  ;;  %v76_v6 = vld [vmem:[#allocation2 + $0xe0] sm:$0xff] }
  0xfd   :  { %v79_v0 = vld [vmem:[#allocation2 + $0xf8] sm:$0xff] }
  0xfe   :  { %2463 = vmatpush1.bf16.msra.mxu0 %v2462_v17  ;;  %v1000_v17 = vld [vmem:[#allocation2 + $0x1dc0] sm:$0xff]  ;;  %v2996_v8 = vpack.c.bf16 %v79_v0, %v71_v63 }
  0xff   :  { %2711 = vmatpush1.bf16.msra.mxu1 %v2710_v18  ;;  %2465 = vmatprep.subr.bf16.mxu0 %v2464_v19  ;;  %v994_v18 = vld [vmem:[#allocation2 + $0x1d90] sm:$0xff]  ;;  %v2732_v19 = vpack.c.bf16 %v1003_v12, %v995_v11  ;;  %v2486_v25 = vpack.c.bf16 %v1000_v17, %v992_v16  ;;  %v93_v11 = vld [vmem:[#allocation2 + $0x168] sm:$0xff]  ;;  %v87_v12 = vld [vmem:[#allocation2 + $0x138] sm:$0xff] }
 0x100   :  { %2713 = vmatprep.subr.bf16.mxu1 %v2712_v23  ;;  %v1011_v23 = vld [vmem:[#allocation2 + $0x1e18] sm:$0xff]  ;;  %v2734_v26 = vpack.c.bf16 %v1002_v20, %v994_v18  ;;  %v2752_v16 = vpack.c.bf16 %v93_v11, %v85_v10  ;;  %v84_v17 = vld [vmem:[#allocation2 + $0x120] sm:$0xff] }
 0x101   :  { %v92_v18 = vld [vmem:[#allocation2 + $0x160] sm:$0xff]  ;;  %v175_v10 = vld [vmem:[#allocation2 + $0x3f8] sm:$0xff] }
 0x102   :  { %2467 = vmatpush1.bf16.msra.mxu0 %v2466_v29  ;;  %v1016_v29 = vld [vmem:[#allocation2 + $0x1e40] sm:$0xff] }
 0x103   :  { %2715 = vmatpush1.bf16.msra.mxu1 %v2714_v30  ;;  %2469 = vmatprep.subr.bf16.mxu0 %v2468_v31  ;;  %v1010_v30 = vld [vmem:[#allocation2 + $0x1e10] sm:$0xff]  ;;  %v2736_v31 = vpack.c.bf16 %v1019_v24, %v1011_v23  ;;  %v2490_v37 = vpack.c.bf16 %v1016_v29, %v1008_v28  ;;  %v109_v23 = vld [vmem:[#allocation2 + $0x1e8] sm:$0xff] }
 0x104   :  { %2717 = vmatprep.subr.bf16.mxu1 %v2716_v35  ;;  %v1027_v35 = vld [vmem:[#allocation2 + $0x1e98] sm:$0xff]  ;;  %v2738_v38 = vpack.c.bf16 %v1018_v32, %v1010_v30  ;;  %v3276_v24 = vld [vmem:[%s3476_s0 + $0x8] sm:$0xff]  ;;  %v2756_v29 = vpack.c.bf16 %v109_v23, %v101_v22  ;;  %v100_v30 = vld [vmem:[#allocation2 + $0x1a0] sm:$0xff] }
 0x105   :  { %v102_v32 = vld [vmem:[#allocation2 + $0x1b0] sm:$0xff]  ;;  %v191_v22 = vld [vmem:[#allocation2 + $0x478] sm:$0xff] }
 0x106   :  { %2471 = vmatpush1.bf16.msra.mxu0 %v2470_v41  ;;  %v1032_v41 = vld [vmem:[#allocation2 + $0x1ec0] sm:$0xff] }
 0x107   :  { %2719 = vmatpush1.bf16.msra.mxu1 %v2718_v42  ;;  %2473 = vmatprep.subr.bf16.mxu0 %v2472_v43  ;;  %v2740_v42 = vpack.c.bf16 %v1035_v36, %v1027_v35  ;;  %v1026_v43 = vld [vmem:[#allocation2 + $0x1e90] sm:$0xff]  ;;  %v2494_v45 = vpack.c.bf16 %v1032_v41, %v1024_v40  ;;  %v117_v35 = vld [vmem:[#allocation2 + $0x228] sm:$0xff]  ;;  %v3006_v40 = vpack.c.bf16 %v110_v34, %v102_v32  ;;  %v207_v34 = vld [vmem:[#allocation2 + $0x4f8] sm:$0xff] }
 0x108   :  { %2721 = vmatprep.subr.bf16.mxu1 %v2720_v47  ;;  %v2742_v46 = vpack.c.bf16 %v1034_v44, %v1026_v43  ;;  %v1041_v47 = vld [vmem:[#allocation2 + $0x1f08] sm:$0xff]  ;;  %v124_v43 = vld [vmem:[#allocation2 + $0x260] sm:$0xff]  ;;  %v118_v44 = vld [vmem:[#allocation2 + $0x230] sm:$0xff] }
 0x109   :  { %v125_v36 = vld [vmem:[#allocation2 + $0x268] sm:$0xff] }
 0x10a   :  { %2475 = vmatpush1.bf16.msra.mxu0 %v2474_v53  ;;  %v63_v53 = vld [vmem:[#allocation2 + $0x78] sm:$0xff]  ;;  %v2760_v41 = vpack.c.bf16 %v125_v36, %v117_v35  ;;  %v205_v32 = vld [vmem:[#allocation2 + $0x4e8] sm:$0xff] }
 0x10b   :  { %2723 = vmatpush1.bf16.msra.mxu1 %v2722_v54  ;;  %2477 = vmatprep.subr.bf16.mxu0 %v2476_v55  ;;  %v1042_v54 = vld [vmem:[#allocation2 + $0x1f10] sm:$0xff]  ;;  %v52_v55 = vld [vmem:[#allocation2 + $0x20] sm:$0xff] }
 0x10c   :  { %2725 = vmatprep.subr.bf16.mxu1 %v2724_v59  ;;  %v69_v59 = vld [vmem:[#allocation2 + $0xa8] sm:$0xff] }
 0x10d   :  { %v2748_v4 = vpack.c.bf16 %v77_v60, %v69_v59  ;;  %v149_v59 = vld [vmem:[#allocation2 + $0x328] sm:$0xff] }
 0x10e   :  { %2479 = vmatpush1.bf16.msra.mxu0 %v2478_v1  ;;  %v2992_v1 = vpack.c.bf16 %v63_v53, %v55_v52  ;;  %v157_v60 = vld [vmem:[#allocation2 + $0x368] sm:$0xff] }
 0x10f   :  { %2727 = vmatpush1.bf16.msra.mxu1 %v2726_v2  ;;  %2481 = vmatprep.subr.bf16.mxu0 %v2480_v3  ;;  %v2746_v2 = vpack.c.bf16 %v60_v56, %v52_v55  ;;  %v2994_v3 = vpack.c.bf16 %v62_v58, %v54_v57  ;;  %v140_v55 = vld [vmem:[#allocation2 + $0x2e0] sm:$0xff]  ;;  %v134_v56 = vld [vmem:[#allocation2 + $0x2b0] sm:$0xff] }
 0x110   :  { %2729 = vmatprep.subr.bf16.mxu1 %v2728_v7  ;;  %v70_v7 = vld [vmem:[#allocation2 + $0xb0] sm:$0xff] }
 0x111   :  { %v142_v58 = vld [vmem:[#allocation2 + $0x2f0] sm:$0xff] }
 0x112   :  { %2483 = vmatpush1.bf16.msra.mxu0 %v2482_v13  ;;  %v95_v13 = vld [vmem:[#allocation2 + $0x178] sm:$0xff]  ;;  %v3014_v0 = vpack.c.bf16 %v142_v58, %v134_v56  ;;  %v237_v56 = vld [vmem:[#allocation2 + $0x5e8] sm:$0xff] }
 0x113   :  { %2731 = vmatpush1.bf16.msra.mxu1 %v2730_v14  ;;  %2485 = vmatprep.subr.bf16.mxu0 %v2484_v15  ;;  %v2750_v14 = vpack.c.bf16 %v76_v6, %v68_v5  ;;  %v2998_v15 = vpack.c.bf16 %v78_v9, %v70_v7  ;;  %v3000_v20 = vpack.c.bf16 %v95_v13, %v87_v12  ;;  %v158_v6 = vld [vmem:[#allocation2 + $0x370] sm:$0xff]  ;;  %v165_v7 = vld [vmem:[#allocation2 + $0x3a8] sm:$0xff]  ;;  %v167_v9 = vld [vmem:[#allocation2 + $0x3b8] sm:$0xff] }
 0x114   :  { %2733 = vmatprep.subr.bf16.mxu1 %v2732_v19  ;;  %v86_v19 = vld [vmem:[#allocation2 + $0x130] sm:$0xff]  ;;  %v239_v58 = vld [vmem:[#allocation2 + $0x5f8] sm:$0xff] }
 0x115   :  { %v3002_v28 = vpack.c.bf16 %v94_v21, %v86_v19  ;;  %v181_v19 = vld [vmem:[#allocation2 + $0x428] sm:$0xff]  ;;  %v183_v21 = vld [vmem:[#allocation2 + $0x438] sm:$0xff] }
 0x116   :  { %2487 = vmatpush1.bf16.msra.mxu0 %v2486_v25  ;;  %v103_v25 = vld [vmem:[#allocation2 + $0x1b8] sm:$0xff] }
 0x117   :  { %2735 = vmatpush1.bf16.msra.mxu1 %v2734_v26  ;;  %2489 = vmatprep.subr.bf16.mxu0 %v2488_v27  ;;  %v111_v26 = vld [vmem:[#allocation2 + $0x1f8] sm:$0xff]  ;;  %v2754_v27 = vpack.c.bf16 %v92_v18, %v84_v17  ;;  %v3020_v17 = vpack.c.bf16 %v175_v10, %v167_v9  ;;  %v174_v18 = vld [vmem:[#allocation2 + $0x3f0] sm:$0xff]  ;;  %v244_v10 = vld [vmem:[#allocation2 + $0x620] sm:$0xff] }
 0x118   :  { %2737 = vmatprep.subr.bf16.mxu1 %v2736_v31  ;;  %v108_v31 = vld [vmem:[#allocation2 + $0x1e0] sm:$0xff]  ;;  %v3004_v33 = vpack.c.bf16 %v111_v26, %v103_v25 }
 0x119   :  { %v180_v26 = vld [vmem:[#allocation2 + $0x420] sm:$0xff] }
 0x11a   :  { %2491 = vmatpush1.bf16.msra.mxu0 %v2490_v37  ;;  %v119_v37 = vld [vmem:[#allocation2 + $0x238] sm:$0xff] }
 0x11b   :  { %2739 = vmatpush1.bf16.msra.mxu1 %v2738_v38  ;;  %2493 = vmatprep.subr.bf16.mxu0 %v2492_v39  ;;  %v127_v38 = vld [vmem:[#allocation2 + $0x278] sm:$0xff]  ;;  %v2758_v39 = vpack.c.bf16 %v108_v31, %v100_v30  ;;  %v190_v30 = vld [vmem:[#allocation2 + $0x470] sm:$0xff]  ;;  %v197_v31 = vld [vmem:[#allocation2 + $0x4a8] sm:$0xff] }
 0x11c   :  { %2741 = vmatprep.subr.bf16.mxu1 %v2740_v42  ;;  %v116_v42 = vld [vmem:[#allocation2 + $0x220] sm:$0xff] }
 0x11d   :  { %v2762_v51 = vpack.c.bf16 %v124_v43, %v116_v42  ;;  %v206_v42 = vld [vmem:[#allocation2 + $0x4f0] sm:$0xff]  ;;  %v213_v43 = vld [vmem:[#allocation2 + $0x528] sm:$0xff] }
 0x11e   :  { %2495 = vmatpush1.bf16.msra.mxu0 %v2494_v45  ;;  %v3008_v45 = vpack.c.bf16 %v127_v38, %v119_v37  ;;  %v2780_v37 = vpack.c.bf16 %v205_v32, %v197_v31  ;;  %v196_v38 = vld [vmem:[#allocation2 + $0x4a0] sm:$0xff] }
 0x11f   :  { %2743 = vmatpush1.bf16.msra.mxu1 %v2742_v46  ;;  %1363 = vmatprep.subr.mxu0 %v1041_v47  ;;  %v126_v46 = vld [vmem:[#allocation2 + $0x270] sm:$0xff]  ;;  %v133_v47 = vld [vmem:[#allocation2 + $0x2a8] sm:$0xff] }
 0x120   :  { %1647 = vmatprep.subr.mxu1 %v1043_v48  ;;  %v141_v48 = vld [vmem:[#allocation2 + $0x2e8] sm:$0xff]  ;;  %v3010_v52 = vpack.c.bf16 %v126_v46, %v118_v44  ;;  %v223_v46 = vld [vmem:[#allocation2 + $0x578] sm:$0xff] }
 0x121   :  { %v2764_v53 = vpack.c.bf16 %v141_v48, %v133_v47  ;;  %v221_v44 = vld [vmem:[#allocation2 + $0x568] sm:$0xff] }
 0x122   :  { %1364 = vmatpush1.msra.mxu0 %v1040_v50  ;;  %v143_v50 = vld [vmem:[#allocation2 + $0x2f8] sm:$0xff] }
 0x123   :  { %1648 = vmatpush1.msra.mxu1 %v1042_v54  ;;  %1372 = vmatmul.mubr.f32.vlgmr.msra.gmra.mrb[0].mxu0 %v46_v61  ;;  %v132_v54 = vld [vmem:[#allocation2 + $0x2a0] sm:$0xff]  ;;  %v3012_v57 = vpack.c.bf16 %v143_v50, %v135_v49  ;;  %v2784_v49 = vpack.c.bf16 %v221_v44, %v213_v43 }
 0x124   :  { %1656 = vmatmul.mubr.f32.vlgmr.msra.gmra.mrb[0].mxu1 %v46_v61  ;;  %2745 = vmatprep.subr.bf16.mxu0 %v2744_v62  ;;  %v151_v61 = vld [vmem:[#allocation2 + $0x338] sm:$0xff]  ;;  %v2766_v63 = vpack.c.bf16 %v140_v55, %v132_v54  ;;  %v212_v50 = vld [vmem:[#allocation2 + $0x520] sm:$0xff]  ;;  %v222_v54 = vld [vmem:[#allocation2 + $0x570] sm:$0xff] }
 0x125   :  { %2993 = vmatprep.subr.bf16.mxu1 %v2992_v1  ;;  %2747 = vmatpush1.bf16.msra.mxu0 %v2746_v2  ;;  %v159_v62 = vld [vmem:[#allocation2 + $0x378] sm:$0xff]  ;;  %v2768_v1 = vpack.c.bf16 %v157_v60, %v149_v59  ;;  %v148_v2 = vld [vmem:[#allocation2 + $0x320] sm:$0xff]  ;;  %v229_v55 = vld [vmem:[#allocation2 + $0x5a8] sm:$0xff] }
 0x126   :  { %2995 = vmatpush1.bf16.msra.mxu1 %v2994_v3  ;;  %2749 = vmatprep.subr.bf16.mxu0 %v2748_v4  ;;  %v156_v3 = vld [vmem:[#allocation2 + $0x360] sm:$0xff]  ;;  %v150_v4 = vld [vmem:[#allocation2 + $0x330] sm:$0xff]  ;;  %v3016_v5 = vpack.c.bf16 %v159_v62, %v151_v61  ;;  %v2788_v61 = vpack.c.bf16 %v237_v56, %v229_v55 }
 0x127   :  { %2997 = vmatprep.subr.bf16.mxu1 %v2996_v8  ;;  %1726 = vmatprep.mubr.f32.mxu0 %v3276_v24  ;;  %v173_v8 = vld [vmem:[#allocation2 + $0x3e8] sm:$0xff]  ;;  %v2770_v11 = vpack.c.bf16 %v156_v3, %v148_v2  ;;  %v3018_v12 = vpack.c.bf16 %v158_v6, %v150_v4  ;;  %v228_v62 = vld [vmem:[#allocation2 + $0x5a0] sm:$0xff]  ;;  %v238_v2 = vld [vmem:[#allocation2 + $0x5f0] sm:$0xff] }
 0x128   :  { %2010 = vmatprep.mubr.f32.mxu1 %v3276_v24  ;;  %v2772_v13 = vpack.c.bf16 %v173_v8, %v165_v7  ;;  %v245_v3 = vld [vmem:[#allocation2 + $0x628] sm:$0xff]  ;;  %v255_v6 = vld [vmem:[#allocation2 + $0x678] sm:$0xff] }
 0x129   :  { %2751 = vmatpush1.bf16.msra.mxu0 %v2750_v14  ;;  %v164_v14 = vld [vmem:[#allocation2 + $0x3a0] sm:$0xff]  ;;  %v253_v4 = vld [vmem:[#allocation2 + $0x668] sm:$0xff] }
 0x12a   :  { %2999 = vmatpush1.bf16.msra.mxu1 %v2998_v15  ;;  %2753 = vmatprep.subr.bf16.mxu0 %v2752_v16  ;;  %v172_v15 = vld [vmem:[#allocation2 + $0x3e0] sm:$0xff]  ;;  %v166_v16 = vld [vmem:[#allocation2 + $0x3b0] sm:$0xff]  ;;  %v2792_v9 = vpack.c.bf16 %v253_v4, %v245_v3 }
 0x12b   :  { %3001 = vmatprep.subr.bf16.mxu1 %v3000_v20  ;;  %v189_v20 = vld [vmem:[#allocation2 + $0x468] sm:$0xff]  ;;  %v2774_v23 = vpack.c.bf16 %v172_v15, %v164_v14  ;;  %v3022_v24 = vpack.c.bf16 %v174_v18, %v166_v16  ;;  %v254_v14 = vld [vmem:[#allocation2 + $0x670] sm:$0xff]  ;;  %v271_v18 = vld [vmem:[#allocation2 + $0x6f8] sm:$0xff] }
 0x12c   :  { %v2776_v25 = vpack.c.bf16 %v189_v20, %v181_v19  ;;  %v261_v15 = vld [vmem:[#allocation2 + $0x6a8] sm:$0xff] }
 0x12d   :  { %2755 = vmatpush1.bf16.msra.mxu0 %v2754_v27  ;;  %v188_v27 = vld [vmem:[#allocation2 + $0x460] sm:$0xff]  ;;  %v269_v16 = vld [vmem:[#allocation2 + $0x6e8] sm:$0xff] }
 0x12e   :  { %3003 = vmatpush1.bf16.msra.mxu1 %v3002_v28  ;;  %2757 = vmatprep.subr.bf16.mxu0 %v2756_v29  ;;  %v182_v28 = vld [vmem:[#allocation2 + $0x430] sm:$0xff]  ;;  %v3024_v29 = vpack.c.bf16 %v191_v22, %v183_v21  ;;  %v2778_v35 = vpack.c.bf16 %v188_v27, %v180_v26  ;;  %v2796_v21 = vpack.c.bf16 %v269_v16, %v261_v15  ;;  %v260_v22 = vld [vmem:[#allocation2 + $0x6a0] sm:$0xff]  ;;  %v277_v27 = vld [vmem:[#allocation2 + $0x728] sm:$0xff] }
 0x12f   :  { %3005 = vmatprep.subr.bf16.mxu1 %v3004_v33  ;;  %v199_v33 = vld [vmem:[#allocation2 + $0x4b8] sm:$0xff]  ;;  %v3026_v36 = vpack.c.bf16 %v190_v30, %v182_v28  ;;  %v270_v26 = vld [vmem:[#allocation2 + $0x6f0] sm:$0xff]  ;;  %v285_v28 = vld [vmem:[#allocation2 + $0x768] sm:$0xff] }
 0x130   :  { %v287_v30 = vld [vmem:[#allocation2 + $0x778] sm:$0xff] }
 0x131   :  { %2759 = vmatpush1.bf16.msra.mxu0 %v2758_v39  ;;  %v204_v39 = vld [vmem:[#allocation2 + $0x4e0] sm:$0xff]  ;;  %v351_v15 = vld [vmem:[#allocation2 + $0x978] sm:$0xff] }
 0x132   :  { %3007 = vmatpush1.bf16.msra.mxu1 %v3006_v40  ;;  %2761 = vmatprep.subr.bf16.mxu0 %v2760_v41  ;;  %v198_v40 = vld [vmem:[#allocation2 + $0x4b0] sm:$0xff]  ;;  %v3028_v41 = vpack.c.bf16 %v207_v34, %v199_v33  ;;  %v2782_v47 = vpack.c.bf16 %v204_v39, %v196_v38  ;;  %v2800_v33 = vpack.c.bf16 %v285_v28, %v277_v27  ;;  %v276_v34 = vld [vmem:[#allocation2 + $0x720] sm:$0xff]  ;;  %v293_v39 = vld [vmem:[#allocation2 + $0x7a8] sm:$0xff] }
 0x133   :  { %3009 = vmatprep.subr.bf16.mxu1 %v3008_v45  ;;  %v215_v45 = vld [vmem:[#allocation2 + $0x538] sm:$0xff]  ;;  %v3030_v48 = vpack.c.bf16 %v206_v42, %v198_v40  ;;  %v286_v38 = vld [vmem:[#allocation2 + $0x770] sm:$0xff]  ;;  %v301_v40 = vld [vmem:[#allocation2 + $0x7e8] sm:$0xff] }
 0x134   :  { %v303_v42 = vld [vmem:[#allocation2 + $0x7f8] sm:$0xff] }
 0x135   :  { %2763 = vmatpush1.bf16.msra.mxu0 %v2762_v51  ;;  %v220_v51 = vld [vmem:[#allocation2 + $0x560] sm:$0xff]  ;;  %v359_v27 = vld [vmem:[#allocation2 + $0x9b8] sm:$0xff] }
 0x136   :  { %3011 = vmatpush1.bf16.msra.mxu1 %v3010_v52  ;;  %2765 = vmatprep.subr.bf16.mxu0 %v2764_v53  ;;  %v214_v52 = vld [vmem:[#allocation2 + $0x530] sm:$0xff]  ;;  %v3032_v53 = vpack.c.bf16 %v223_v46, %v215_v45  ;;  %v2786_v59 = vpack.c.bf16 %v220_v51, %v212_v50  ;;  %v2804_v45 = vpack.c.bf16 %v301_v40, %v293_v39  ;;  %v292_v46 = vld [vmem:[#allocation2 + $0x7a0] sm:$0xff]  ;;  %v309_v51 = vld [vmem:[#allocation2 + $0x828] sm:$0xff] }
 0x137   :  { %3013 = vmatprep.subr.bf16.mxu1 %v3012_v57  ;;  %v231_v57 = vld [vmem:[#allocation2 + $0x5b8] sm:$0xff]  ;;  %v3034_v60 = vpack.c.bf16 %v222_v54, %v214_v52  ;;  %v302_v50 = vld [vmem:[#allocation2 + $0x7f0] sm:$0xff]  ;;  %v317_v52 = vld [vmem:[#allocation2 + $0x868] sm:$0xff] }
 0x138   :  { %v319_v54 = vld [vmem:[#allocation2 + $0x878] sm:$0xff] }
 0x139   :  { %2767 = vmatpush1.bf16.msra.mxu0 %v2766_v63  ;;  %v236_v63 = vld [vmem:[#allocation2 + $0x5e0] sm:$0xff]  ;;  %v367_v28 = vld [vmem:[#allocation2 + $0x9f8] sm:$0xff] }
 0x13a   :  { %3015 = vmatpush1.bf16.msra.mxu1 %v3014_v0  ;;  %2769 = vmatprep.subr.bf16.mxu0 %v2768_v1  ;;  %v230_v0 = vld [vmem:[#allocation2 + $0x5b0] sm:$0xff]  ;;  %v3036_v1 = vpack.c.bf16 %v239_v58, %v231_v57  ;;  %v2790_v7 = vpack.c.bf16 %v236_v63, %v228_v62  ;;  %v2808_v57 = vpack.c.bf16 %v317_v52, %v309_v51  ;;  %v308_v58 = vld [vmem:[#allocation2 + $0x820] sm:$0xff]  ;;  %v325_v63 = vld [vmem:[#allocation2 + $0x8a8] sm:$0xff] }
 0x13b   :  { %3017 = vmatprep.subr.bf16.mxu1 %v3016_v5  ;;  %v247_v5 = vld [vmem:[#allocation2 + $0x638] sm:$0xff]  ;;  %v3038_v8 = vpack.c.bf16 %v238_v2, %v230_v0  ;;  %v318_v62 = vld [vmem:[#allocation2 + $0x870] sm:$0xff]  ;;  %v333_v0 = vld [vmem:[#allocation2 + $0x8e8] sm:$0xff] }
 0x13c   :  { %v335_v2 = vld [vmem:[#allocation2 + $0x8f8] sm:$0xff] }
 0x13d   :  { %2771 = vmatpush1.bf16.msra.mxu0 %v2770_v11  ;;  %v252_v11 = vld [vmem:[#allocation2 + $0x660] sm:$0xff]  ;;  %v375_v39 = vld [vmem:[#allocation2 + $0xa38] sm:$0xff] }
 0x13e   :  { %3019 = vmatpush1.bf16.msra.mxu1 %v3018_v12  ;;  %2773 = vmatprep.subr.bf16.mxu0 %v2772_v13  ;;  %v246_v12 = vld [vmem:[#allocation2 + $0x630] sm:$0xff]  ;;  %v3040_v13 = vpack.c.bf16 %v255_v6, %v247_v5  ;;  %v2794_v19 = vpack.c.bf16 %v252_v11, %v244_v10  ;;  %v2812_v5 = vpack.c.bf16 %v333_v0, %v325_v63  ;;  %v324_v6 = vld [vmem:[#allocation2 + $0x8a0] sm:$0xff]  ;;  %v341_v11 = vld [vmem:[#allocation2 + $0x928] sm:$0xff] }
 0x13f   :  { %3021 = vmatprep.subr.bf16.mxu1 %v3020_v17  ;;  %v263_v17 = vld [vmem:[#allocation2 + $0x6b8] sm:$0xff]  ;;  %v3042_v20 = vpack.c.bf16 %v254_v14, %v246_v12  ;;  %v334_v10 = vld [vmem:[#allocation2 + $0x8f0] sm:$0xff]  ;;  %v349_v12 = vld [vmem:[#allocation2 + $0x968] sm:$0xff] }
 0x140   :  { %v343_v14 = vld [vmem:[#allocation2 + $0x938] sm:$0xff] }
 0x141   :  { %2775 = vmatpush1.bf16.msra.mxu0 %v2774_v23  ;;  %v268_v23 = vld [vmem:[#allocation2 + $0x6e0] sm:$0xff]  ;;  %v383_v40 = vld [vmem:[#allocation2 + $0xa78] sm:$0xff] }
 0x142   :  { %3023 = vmatpush1.bf16.msra.mxu1 %v3022_v24  ;;  %2777 = vmatprep.subr.bf16.mxu0 %v2776_v25  ;;  %v262_v24 = vld [vmem:[#allocation2 + $0x6b0] sm:$0xff]  ;;  %v3044_v25 = vpack.c.bf16 %v271_v18, %v263_v17  ;;  %v2798_v31 = vpack.c.bf16 %v268_v23, %v260_v22  ;;  %v2816_v18 = vpack.c.bf16 %v349_v12, %v341_v11  ;;  %v391_v51 = vld [vmem:[#allocation2 + $0xab8] sm:$0xff] }
 0x143   :  { %3025 = vmatprep.subr.bf16.mxu1 %v3024_v29  ;;  %v279_v29 = vld [vmem:[#allocation2 + $0x738] sm:$0xff]  ;;  %v3046_v32 = vpack.c.bf16 %v270_v26, %v262_v24  ;;  %v3064_v22 = vpack.c.bf16 %v351_v15, %v343_v14  ;;  %v350_v23 = vld [vmem:[#allocation2 + $0x970] sm:$0xff]  ;;  %v357_v24 = vld [vmem:[#allocation2 + $0x9a8] sm:$0xff] }
 0x144   :  { %v3278_v26 = vld [vmem:[%s3476_s0 + $0x18] sm:$0xff] }
 0x145   :  { %2779 = vmatpush1.bf16.msra.mxu0 %v2778_v35  ;;  %v284_v35 = vld [vmem:[#allocation2 + $0x760] sm:$0xff]  ;;  %v399_v52 = vld [vmem:[#allocation2 + $0xaf8] sm:$0xff] }
 0x146   :  { %3027 = vmatpush1.bf16.msra.mxu1 %v3026_v36  ;;  %2781 = vmatprep.subr.bf16.mxu0 %v2780_v37  ;;  %v278_v36 = vld [vmem:[#allocation2 + $0x730] sm:$0xff]  ;;  %v3048_v37 = vpack.c.bf16 %v287_v30, %v279_v29  ;;  %v2802_v43 = vpack.c.bf16 %v284_v35, %v276_v34  ;;  %v3068_v35 = vpack.c.bf16 %v367_v28, %v359_v27  ;;  %v407_v63 = vld [vmem:[#allocation2 + $0xb38] sm:$0xff]  ;;  %v436_v28 = vld [vmem:[#allocation2 + $0xc20] sm:$0xff] }
 0x147   :  { %3029 = vmatprep.subr.bf16.mxu1 %v3028_v41  ;;  %v295_v41 = vld [vmem:[#allocation2 + $0x7b8] sm:$0xff]  ;;  %v3050_v44 = vpack.c.bf16 %v286_v38, %v278_v36  ;;  %v358_v34 = vld [vmem:[#allocation2 + $0x9b0] sm:$0xff]  ;;  %v381_v38 = vld [vmem:[#allocation2 + $0xa68] sm:$0xff] }
 0x148   :  { %v366_v36 = vld [vmem:[#allocation2 + $0x9f0] sm:$0xff]  ;;  %v415_v0 = vld [vmem:[#allocation2 + $0xb78] sm:$0xff] }
 0x149   :  { %2783 = vmatpush1.bf16.msra.mxu0 %v2782_v47  ;;  %v300_v47 = vld [vmem:[#allocation2 + $0x7e0] sm:$0xff]  ;;  %v423_v11 = vld [vmem:[#allocation2 + $0xbb8] sm:$0xff] }
 0x14a   :  { %3031 = vmatpush1.bf16.msra.mxu1 %v3030_v48  ;;  %2785 = vmatprep.subr.bf16.mxu0 %v2784_v49  ;;  %v294_v48 = vld [vmem:[#allocation2 + $0x7b0] sm:$0xff]  ;;  %v3052_v49 = vpack.c.bf16 %v303_v42, %v295_v41  ;;  %v2806_v55 = vpack.c.bf16 %v300_v47, %v292_v46  ;;  %v3070_v42 = vpack.c.bf16 %v366_v36, %v358_v34  ;;  %v431_v12 = vld [vmem:[#allocation2 + $0xbf8] sm:$0xff]  ;;  %v461_v34 = vld [vmem:[#allocation2 + $0xce8] sm:$0xff] }
 0x14b   :  { %3033 = vmatprep.subr.bf16.mxu1 %v3032_v53  ;;  %v311_v53 = vld [vmem:[#allocation2 + $0x838] sm:$0xff]  ;;  %v3054_v56 = vpack.c.bf16 %v302_v50, %v294_v48  ;;  %v374_v46 = vld [vmem:[#allocation2 + $0xa30] sm:$0xff]  ;;  %v3072_v47 = vpack.c.bf16 %v383_v40, %v375_v39  ;;  %v397_v50 = vld [vmem:[#allocation2 + $0xae8] sm:$0xff] }
 0x14c   :  { %v382_v48 = vld [vmem:[#allocation2 + $0xa70] sm:$0xff]  ;;  %v463_v36 = vld [vmem:[#allocation2 + $0xcf8] sm:$0xff]  ;;  %v452_v40 = vld [vmem:[#allocation2 + $0xca0] sm:$0xff] }
 0x14d   :  { %2787 = vmatpush1.bf16.msra.mxu0 %v2786_v59  ;;  %v316_v59 = vld [vmem:[#allocation2 + $0x860] sm:$0xff] }
 0x14e   :  { %3035 = vmatpush1.bf16.msra.mxu1 %v3034_v60  ;;  %2789 = vmatprep.subr.bf16.mxu0 %v2788_v61  ;;  %v310_v60 = vld [vmem:[#allocation2 + $0x830] sm:$0xff]  ;;  %v3056_v61 = vpack.c.bf16 %v319_v54, %v311_v53  ;;  %v2810_v3 = vpack.c.bf16 %v316_v59, %v308_v58  ;;  %v3074_v54 = vpack.c.bf16 %v382_v48, %v374_v46  ;;  %v477_v46 = vld [vmem:[#allocation2 + $0xd68] sm:$0xff]  ;;  %v479_v48 = vld [vmem:[#allocation2 + $0xd78] sm:$0xff] }
 0x14f   :  { %3037 = vmatprep.subr.bf16.mxu1 %v3036_v1  ;;  %v327_v1 = vld [vmem:[#allocation2 + $0x8b8] sm:$0xff]  ;;  %v3058_v4 = vpack.c.bf16 %v318_v62, %v310_v60  ;;  %v390_v58 = vld [vmem:[#allocation2 + $0xab0] sm:$0xff]  ;;  %v3076_v59 = vpack.c.bf16 %v399_v52, %v391_v51  ;;  %v413_v62 = vld [vmem:[#allocation2 + $0xb68] sm:$0xff] }
 0x150   :  { %v398_v60 = vld [vmem:[#allocation2 + $0xaf0] sm:$0xff]  ;;  %v468_v52 = vld [vmem:[#allocation2 + $0xd20] sm:$0xff] }
 0x151   :  { %2791 = vmatpush1.bf16.msra.mxu0 %v2790_v7  ;;  %v332_v7 = vld [vmem:[#allocation2 + $0x8e0] sm:$0xff] }
 0x152   :  { %3039 = vmatpush1.bf16.msra.mxu1 %v3038_v8  ;;  %2793 = vmatprep.subr.bf16.mxu0 %v2792_v9  ;;  %v326_v8 = vld [vmem:[#allocation2 + $0x8b0] sm:$0xff]  ;;  %v3060_v9 = vpack.c.bf16 %v335_v2, %v327_v1  ;;  %v2814_v16 = vpack.c.bf16 %v332_v7, %v324_v6  ;;  %v3078_v2 = vpack.c.bf16 %v398_v60, %v390_v58  ;;  %v493_v58 = vld [vmem:[#allocation2 + $0xde8] sm:$0xff]  ;;  %v495_v60 = vld [vmem:[#allocation2 + $0xdf8] sm:$0xff] }
 0x153   :  { %3041 = vmatprep.subr.bf16.mxu1 %v3040_v13  ;;  %v3277_v13 = vld [vmem:[%s3476_s0] sm:$0xff]  ;;  %v3062_v17 = vpack.c.bf16 %v334_v10, %v326_v8  ;;  %v406_v6 = vld [vmem:[#allocation2 + $0xb30] sm:$0xff]  ;;  %v3080_v7 = vpack.c.bf16 %v415_v0, %v407_v63  ;;  %v429_v10 = vld [vmem:[#allocation2 + $0xbe8] sm:$0xff] }
 0x154   :  { %v414_v8 = vld [vmem:[#allocation2 + $0xb70] sm:$0xff]  ;;  %v484_v0 = vld [vmem:[#allocation2 + $0xda0] sm:$0xff] }
 0x155   :  { %2795 = vmatpush1.bf16.msra.mxu0 %v2794_v19  ;;  %v340_v19 = vld [vmem:[#allocation2 + $0x920] sm:$0xff]  ;;  %v3082_v14 = vpack.c.bf16 %v414_v8, %v406_v6  ;;  %v509_v6 = vld [vmem:[#allocation2 + $0xe68] sm:$0xff]  ;;  %v511_v8 = vld [vmem:[#allocation2 + $0xe78] sm:$0xff] }
 0x156   :  { %3043 = vmatpush1.bf16.msra.mxu1 %v3042_v20  ;;  %2797 = vmatprep.subr.bf16.mxu0 %v2796_v21  ;;  %v348_v20 = vld [vmem:[#allocation2 + $0x960] sm:$0xff]  ;;  %v342_v21 = vld [vmem:[#allocation2 + $0x930] sm:$0xff] }
 0x157   :  { %3045 = vmatprep.subr.bf16.mxu1 %v3044_v25  ;;  %v365_v25 = vld [vmem:[#allocation2 + $0x9e8] sm:$0xff]  ;;  %v2818_v29 = vpack.c.bf16 %v348_v20, %v340_v19  ;;  %v3066_v30 = vpack.c.bf16 %v350_v23, %v342_v21  ;;  %v3084_v19 = vpack.c.bf16 %v431_v12, %v423_v11  ;;  %v430_v20 = vld [vmem:[#allocation2 + $0xbf0] sm:$0xff]  ;;  %v439_v23 = vld [vmem:[#allocation2 + $0xc38] sm:$0xff] }
 0x158   :  { %v437_v21 = vld [vmem:[#allocation2 + $0xc28] sm:$0xff]  ;;  %v500_v12 = vld [vmem:[#allocation2 + $0xe20] sm:$0xff] }
 0x159   :  { %2799 = vmatpush1.bf16.msra.mxu0 %v2798_v31  ;;  %v2820_v31 = vpack.c.bf16 %v365_v25, %v357_v24  ;;  %v447_v24 = vld [vmem:[#allocation2 + $0xc78] sm:$0xff] }
 0x15a   :  { %3047 = vmatpush1.bf16.msra.mxu1 %v3046_v32  ;;  %2801 = vmatprep.subr.bf16.mxu0 %v2800_v33  ;;  %v356_v32 = vld [vmem:[#allocation2 + $0x9a0] sm:$0xff] }
 0x15b   :  { %3049 = vmatprep.subr.bf16.mxu1 %v3048_v37  ;;  %v364_v33 = vld [vmem:[#allocation2 + $0x9e0] sm:$0xff]  ;;  %v373_v37 = vld [vmem:[#allocation2 + $0xa28] sm:$0xff] }
 0x15c   :  { %v2822_v41 = vpack.c.bf16 %v364_v33, %v356_v32  ;;  %v446_v32 = vld [vmem:[#allocation2 + $0xc70] sm:$0xff]  ;;  %v453_v33 = vld [vmem:[#allocation2 + $0xca8] sm:$0xff] }
 0x15d   :  { %2803 = vmatpush1.bf16.msra.mxu0 %v2802_v43  ;;  %v2824_v43 = vpack.c.bf16 %v381_v38, %v373_v37  ;;  %v2844_v39 = vpack.c.bf16 %v461_v34, %v453_v33 }
 0x15e   :  { %3051 = vmatpush1.bf16.msra.mxu1 %v3050_v44  ;;  %2805 = vmatprep.subr.bf16.mxu0 %v2804_v45  ;;  %v372_v44 = vld [vmem:[#allocation2 + $0xa20] sm:$0xff] }
 0x15f   :  { %3053 = vmatprep.subr.bf16.mxu1 %v3052_v49  ;;  %v380_v45 = vld [vmem:[#allocation2 + $0xa60] sm:$0xff]  ;;  %v389_v49 = vld [vmem:[#allocation2 + $0xaa8] sm:$0xff] }
 0x160   :  { %v2826_v53 = vpack.c.bf16 %v380_v45, %v372_v44  ;;  %v462_v44 = vld [vmem:[#allocation2 + $0xcf0] sm:$0xff]  ;;  %v469_v45 = vld [vmem:[#allocation2 + $0xd28] sm:$0xff] }
 0x161   :  { %2807 = vmatpush1.bf16.msra.mxu0 %v2806_v55  ;;  %v2828_v55 = vpack.c.bf16 %v397_v50, %v389_v49  ;;  %v2848_v51 = vpack.c.bf16 %v477_v46, %v469_v45 }
 0x162   :  { %3055 = vmatpush1.bf16.msra.mxu1 %v3054_v56  ;;  %2809 = vmatprep.subr.bf16.mxu0 %v2808_v57  ;;  %v388_v56 = vld [vmem:[#allocation2 + $0xaa0] sm:$0xff] }
 0x163   :  { %3057 = vmatprep.subr.bf16.mxu1 %v3056_v61  ;;  %v396_v57 = vld [vmem:[#allocation2 + $0xae0] sm:$0xff]  ;;  %v405_v61 = vld [vmem:[#allocation2 + $0xb28] sm:$0xff] }
 0x164   :  { %1727 = vmatmul.mubr.f32.vlgmr.msra.gmra.mrb[2].mxu0 %v3277_v13  ;;  %v2830_v1 = vpack.c.bf16 %v396_v57, %v388_v56  ;;  %v478_v56 = vld [vmem:[#allocation2 + $0xd70] sm:$0xff]  ;;  %v485_v57 = vld [vmem:[#allocation2 + $0xda8] sm:$0xff] }
 0x165   :  { %2811 = vmatpush1.bf16.msra.mxu0 %v2810_v3  ;;  %2011 = vmatmul.mubr.f32.vlgmr.msra.gmra.mrb[2].mxu1 %v3277_v13  ;;  %v2832_v3 = vpack.c.bf16 %v413_v62, %v405_v61  ;;  %v2852_v63 = vpack.c.bf16 %v493_v58, %v485_v57 }
 0x166   :  { %3059 = vmatpush1.bf16.msra.mxu1 %v3058_v4  ;;  %2813 = vmatprep.subr.bf16.mxu0 %v2812_v5  ;;  %v404_v4 = vld [vmem:[#allocation2 + $0xb20] sm:$0xff] }
 0x167   :  { %3061 = vmatprep.subr.bf16.mxu1 %v3060_v9  ;;  %1797 = vmatprep.mubr.f32.mxu0 %v3278_v26  ;;  %v412_v5 = vld [vmem:[#allocation2 + $0xb60] sm:$0xff]  ;;  %v421_v9 = vld [vmem:[#allocation2 + $0xba8] sm:$0xff] }
 0x168   :  { %2081 = vmatprep.mubr.f32.mxu1 %v3278_v26  ;;  %v2834_v13 = vpack.c.bf16 %v412_v5, %v404_v4  ;;  %v2836_v15 = vpack.c.bf16 %v429_v10, %v421_v9  ;;  %v494_v4 = vld [vmem:[#allocation2 + $0xdf0] sm:$0xff]  ;;  %v501_v5 = vld [vmem:[#allocation2 + $0xe28] sm:$0xff] }
 0x169   :  { %2815 = vmatpush1.bf16.msra.mxu0 %v2814_v16  ;;  %v420_v16 = vld [vmem:[#allocation2 + $0xba0] sm:$0xff]  ;;  %v2856_v11 = vpack.c.bf16 %v509_v6, %v501_v5 }
 0x16a   :  { %3063 = vmatpush1.bf16.msra.mxu1 %v3062_v17  ;;  %2817 = vmatprep.subr.bf16.mxu0 %v2816_v18  ;;  %v428_v17 = vld [vmem:[#allocation2 + $0xbe0] sm:$0xff]  ;;  %v422_v18 = vld [vmem:[#allocation2 + $0xbb0] sm:$0xff] }
 0x16b   :  { %3065 = vmatprep.subr.bf16.mxu1 %v3064_v22  ;;  %v445_v22 = vld [vmem:[#allocation2 + $0xc68] sm:$0xff]  ;;  %v2838_v25 = vpack.c.bf16 %v428_v17, %v420_v16  ;;  %v3086_v26 = vpack.c.bf16 %v430_v20, %v422_v18  ;;  %v510_v16 = vld [vmem:[#allocation2 + $0xe70] sm:$0xff]  ;;  %v527_v20 = vld [vmem:[#allocation2 + $0xef8] sm:$0xff] }
 0x16c   :  { %v2840_v27 = vpack.c.bf16 %v445_v22, %v437_v21  ;;  %v517_v17 = vld [vmem:[#allocation2 + $0xea8] sm:$0xff] }
 0x16d   :  { %2819 = vmatpush1.bf16.msra.mxu0 %v2818_v29  ;;  %v444_v29 = vld [vmem:[#allocation2 + $0xc60] sm:$0xff]  ;;  %v525_v18 = vld [vmem:[#allocation2 + $0xee8] sm:$0xff] }
 0x16e   :  { %3067 = vmatpush1.bf16.msra.mxu1 %v3066_v30  ;;  %2821 = vmatprep.subr.bf16.mxu0 %v2820_v31  ;;  %v438_v30 = vld [vmem:[#allocation2 + $0xc30] sm:$0xff]  ;;  %v3088_v31 = vpack.c.bf16 %v447_v24, %v439_v23  ;;  %v2842_v37 = vpack.c.bf16 %v444_v29, %v436_v28  ;;  %v2860_v23 = vpack.c.bf16 %v525_v18, %v517_v17  ;;  %v516_v24 = vld [vmem:[#allocation2 + $0xea0] sm:$0xff]  ;;  %v533_v29 = vld [vmem:[#allocation2 + $0xf28] sm:$0xff] }
 0x16f   :  { %3069 = vmatprep.subr.bf16.mxu1 %v3068_v35  ;;  %v455_v35 = vld [vmem:[#allocation2 + $0xcb8] sm:$0xff]  ;;  %v3090_v38 = vpack.c.bf16 %v446_v32, %v438_v30  ;;  %v526_v28 = vld [vmem:[#allocation2 + $0xef0] sm:$0xff]  ;;  %v541_v30 = vld [vmem:[#allocation2 + $0xf68] sm:$0xff] }
 0x170   :  { %v543_v32 = vld [vmem:[#allocation2 + $0xf78] sm:$0xff] }
 0x171   :  { %2823 = vmatpush1.bf16.msra.mxu0 %v2822_v41  ;;  %v460_v41 = vld [vmem:[#allocation2 + $0xce0] sm:$0xff]  ;;  %v607_v17 = vld [vmem:[#allocation2 + $0x1178] sm:$0xff] }
 0x172   :  { %3071 = vmatpush1.bf16.msra.mxu1 %v3070_v42  ;;  %2825 = vmatprep.subr.bf16.mxu0 %v2824_v43  ;;  %v454_v42 = vld [vmem:[#allocation2 + $0xcb0] sm:$0xff]  ;;  %v3092_v43 = vpack.c.bf16 %v463_v36, %v455_v35  ;;  %v2846_v49 = vpack.c.bf16 %v460_v41, %v452_v40  ;;  %v2864_v35 = vpack.c.bf16 %v541_v30, %v533_v29  ;;  %v532_v36 = vld [vmem:[#allocation2 + $0xf20] sm:$0xff]  ;;  %v549_v41 = vld [vmem:[#allocation2 + $0xfa8] sm:$0xff] }
 0x173   :  { %3073 = vmatprep.subr.bf16.mxu1 %v3072_v47  ;;  %v471_v47 = vld [vmem:[#allocation2 + $0xd38] sm:$0xff]  ;;  %v3094_v50 = vpack.c.bf16 %v462_v44, %v454_v42  ;;  %v542_v40 = vld [vmem:[#allocation2 + $0xf70] sm:$0xff]  ;;  %v557_v42 = vld [vmem:[#allocation2 + $0xfe8] sm:$0xff] }
 0x174   :  { %v559_v44 = vld [vmem:[#allocation2 + $0xff8] sm:$0xff] }
 0x175   :  { %2827 = vmatpush1.bf16.msra.mxu0 %v2826_v53  ;;  %v476_v53 = vld [vmem:[#allocation2 + $0xd60] sm:$0xff]  ;;  %v615_v29 = vld [vmem:[#allocation2 + $0x11b8] sm:$0xff] }
 0x176   :  { %3075 = vmatpush1.bf16.msra.mxu1 %v3074_v54  ;;  %2829 = vmatprep.subr.bf16.mxu0 %v2828_v55  ;;  %v470_v54 = vld [vmem:[#allocation2 + $0xd30] sm:$0xff]  ;;  %v3096_v55 = vpack.c.bf16 %v479_v48, %v471_v47  ;;  %v2850_v61 = vpack.c.bf16 %v476_v53, %v468_v52  ;;  %v2868_v47 = vpack.c.bf16 %v557_v42, %v549_v41  ;;  %v548_v48 = vld [vmem:[#allocation2 + $0xfa0] sm:$0xff]  ;;  %v565_v53 = vld [vmem:[#allocation2 + $0x1028] sm:$0xff] }
 0x177   :  { %3077 = vmatprep.subr.bf16.mxu1 %v3076_v59  ;;  %v487_v59 = vld [vmem:[#allocation2 + $0xdb8] sm:$0xff]  ;;  %v3098_v62 = vpack.c.bf16 %v478_v56, %v470_v54  ;;  %v558_v52 = vld [vmem:[#allocation2 + $0xff0] sm:$0xff]  ;;  %v573_v54 = vld [vmem:[#allocation2 + $0x1068] sm:$0xff] }
 0x178   :  { %v575_v56 = vld [vmem:[#allocation2 + $0x1078] sm:$0xff] }
 0x179   :  { %2831 = vmatpush1.bf16.msra.mxu0 %v2830_v1  ;;  %v492_v1 = vld [vmem:[#allocation2 + $0xde0] sm:$0xff]  ;;  %v623_v30 = vld [vmem:[#allocation2 + $0x11f8] sm:$0xff] }
 0x17a   :  { %3079 = vmatpush1.bf16.msra.mxu1 %v3078_v2  ;;  %2833 = vmatprep.subr.bf16.mxu0 %v2832_v3  ;;  %v486_v2 = vld [vmem:[#allocation2 + $0xdb0] sm:$0xff]  ;;  %v3100_v3 = vpack.c.bf16 %v495_v60, %v487_v59  ;;  %v2854_v9 = vpack.c.bf16 %v492_v1, %v484_v0  ;;  %v2872_v59 = vpack.c.bf16 %v573_v54, %v565_v53  ;;  %v564_v60 = vld [vmem:[#allocation2 + $0x1020] sm:$0xff]  ;;  %v581_v1 = vld [vmem:[#allocation2 + $0x10a8] sm:$0xff] }
 0x17b   :  { %3081 = vmatprep.subr.bf16.mxu1 %v3080_v7  ;;  %v503_v7 = vld [vmem:[#allocation2 + $0xe38] sm:$0xff]  ;;  %v3102_v10 = vpack.c.bf16 %v494_v4, %v486_v2  ;;  %v574_v0 = vld [vmem:[#allocation2 + $0x1070] sm:$0xff]  ;;  %v589_v2 = vld [vmem:[#allocation2 + $0x10e8] sm:$0xff] }
 0x17c   :  { %v591_v4 = vld [vmem:[#allocation2 + $0x10f8] sm:$0xff] }
 0x17d   :  { %2835 = vmatpush1.bf16.msra.mxu0 %v2834_v13  ;;  %v508_v13 = vld [vmem:[#allocation2 + $0xe60] sm:$0xff]  ;;  %v631_v41 = vld [vmem:[#allocation2 + $0x1238] sm:$0xff] }
 0x17e   :  { %3083 = vmatpush1.bf16.msra.mxu1 %v3082_v14  ;;  %2837 = vmatprep.subr.bf16.mxu0 %v2836_v15  ;;  %v502_v14 = vld [vmem:[#allocation2 + $0xe30] sm:$0xff]  ;;  %v3104_v15 = vpack.c.bf16 %v511_v8, %v503_v7  ;;  %v2858_v21 = vpack.c.bf16 %v508_v13, %v500_v12  ;;  %v2876_v7 = vpack.c.bf16 %v589_v2, %v581_v1  ;;  %v580_v8 = vld [vmem:[#allocation2 + $0x10a0] sm:$0xff]  ;;  %v597_v13 = vld [vmem:[#allocation2 + $0x1128] sm:$0xff] }
 0x17f   :  { %3085 = vmatprep.subr.bf16.mxu1 %v3084_v19  ;;  %v519_v19 = vld [vmem:[#allocation2 + $0xeb8] sm:$0xff]  ;;  %v3106_v22 = vpack.c.bf16 %v510_v16, %v502_v14  ;;  %v590_v12 = vld [vmem:[#allocation2 + $0x10f0] sm:$0xff]  ;;  %v605_v14 = vld [vmem:[#allocation2 + $0x1168] sm:$0xff] }
 0x180   :  { %v599_v16 = vld [vmem:[#allocation2 + $0x1138] sm:$0xff] }
 0x181   :  { %2839 = vmatpush1.bf16.msra.mxu0 %v2838_v25  ;;  %v524_v25 = vld [vmem:[#allocation2 + $0xee0] sm:$0xff]  ;;  %v639_v42 = vld [vmem:[#allocation2 + $0x1278] sm:$0xff] }
 0x182   :  { %3087 = vmatpush1.bf16.msra.mxu1 %v3086_v26  ;;  %2841 = vmatprep.subr.bf16.mxu0 %v2840_v27  ;;  %v518_v26 = vld [vmem:[#allocation2 + $0xeb0] sm:$0xff]  ;;  %v3108_v27 = vpack.c.bf16 %v527_v20, %v519_v19  ;;  %v2862_v33 = vpack.c.bf16 %v524_v25, %v516_v24  ;;  %v2880_v20 = vpack.c.bf16 %v605_v14, %v597_v13  ;;  %v647_v53 = vld [vmem:[#allocation2 + $0x12b8] sm:$0xff] }
 0x183   :  { %3089 = vmatprep.subr.bf16.mxu1 %v3088_v31  ;;  %v535_v31 = vld [vmem:[#allocation2 + $0xf38] sm:$0xff]  ;;  %v3110_v34 = vpack.c.bf16 %v526_v28, %v518_v26  ;;  %v3128_v24 = vpack.c.bf16 %v607_v17, %v599_v16  ;;  %v606_v25 = vld [vmem:[#allocation2 + $0x1170] sm:$0xff]  ;;  %v613_v26 = vld [vmem:[#allocation2 + $0x11a8] sm:$0xff] }
 0x184   :  { %v3280_v28 = vld [vmem:[%s3476_s0 + $0x28] sm:$0xff]  ;;  %v655_v54 = vld [vmem:[#allocation2 + $0x12f8] sm:$0xff] }
 0x185   :  { %2843 = vmatpush1.bf16.msra.mxu0 %v2842_v37  ;;  %v540_v37 = vld [vmem:[#allocation2 + $0xf60] sm:$0xff]  ;;  %v663_v1 = vld [vmem:[#allocation2 + $0x1338] sm:$0xff] }
 0x186   :  { %3091 = vmatpush1.bf16.msra.mxu1 %v3090_v38  ;;  %2845 = vmatprep.subr.bf16.mxu0 %v2844_v39  ;;  %v534_v38 = vld [vmem:[#allocation2 + $0xf30] sm:$0xff]  ;;  %v3112_v39 = vpack.c.bf16 %v543_v32, %v535_v31  ;;  %v2866_v45 = vpack.c.bf16 %v540_v37, %v532_v36  ;;  %v3132_v37 = vpack.c.bf16 %v623_v30, %v615_v29  ;;  %v671_v2 = vld [vmem:[#allocation2 + $0x1378] sm:$0xff]  ;;  %v692_v30 = vld [vmem:[#allocation2 + $0x1420] sm:$0xff] }
 0x187   :  { %3093 = vmatprep.subr.bf16.mxu1 %v3092_v43  ;;  %v551_v43 = vld [vmem:[#allocation2 + $0xfb8] sm:$0xff]  ;;  %v3114_v46 = vpack.c.bf16 %v542_v40, %v534_v38  ;;  %v614_v36 = vld [vmem:[#allocation2 + $0x11b0] sm:$0xff]  ;;  %v637_v40 = vld [vmem:[#allocation2 + $0x1268] sm:$0xff] }
 0x188   :  { %v622_v38 = vld [vmem:[#allocation2 + $0x11f0] sm:$0xff]  ;;  %v679_v13 = vld [vmem:[#allocation2 + $0x13b8] sm:$0xff] }
 0x189   :  { %2847 = vmatpush1.bf16.msra.mxu0 %v2846_v49  ;;  %v556_v49 = vld [vmem:[#allocation2 + $0xfe0] sm:$0xff]  ;;  %v687_v14 = vld [vmem:[#allocation2 + $0x13f8] sm:$0xff] }
 0x18a   :  { %3095 = vmatpush1.bf16.msra.mxu1 %v3094_v50  ;;  %2849 = vmatprep.subr.bf16.mxu0 %v2848_v51  ;;  %v550_v50 = vld [vmem:[#allocation2 + $0xfb0] sm:$0xff]  ;;  %v3116_v51 = vpack.c.bf16 %v559_v44, %v551_v43  ;;  %v2870_v57 = vpack.c.bf16 %v556_v49, %v548_v48  ;;  %v3134_v44 = vpack.c.bf16 %v622_v38, %v614_v36  ;;  %v717_v36 = vld [vmem:[#allocation2 + $0x14e8] sm:$0xff]  ;;  %v719_v38 = vld [vmem:[#allocation2 + $0x14f8] sm:$0xff] }
 0x18b   :  { %3097 = vmatprep.subr.bf16.mxu1 %v3096_v55  ;;  %v567_v55 = vld [vmem:[#allocation2 + $0x1038] sm:$0xff]  ;;  %v3118_v58 = vpack.c.bf16 %v558_v52, %v550_v50  ;;  %v630_v48 = vld [vmem:[#allocation2 + $0x1230] sm:$0xff]  ;;  %v3136_v49 = vpack.c.bf16 %v639_v42, %v631_v41  ;;  %v653_v52 = vld [vmem:[#allocation2 + $0x12e8] sm:$0xff] }
 0x18c   :  { %v638_v50 = vld [vmem:[#allocation2 + $0x1270] sm:$0xff]  ;;  %v708_v42 = vld [vmem:[#allocation2 + $0x14a0] sm:$0xff] }
 0x18d   :  { %2851 = vmatpush1.bf16.msra.mxu0 %v2850_v61  ;;  %v572_v61 = vld [vmem:[#allocation2 + $0x1060] sm:$0xff] }
 0x18e   :  { %3099 = vmatpush1.bf16.msra.mxu1 %v3098_v62  ;;  %2853 = vmatprep.subr.bf16.mxu0 %v2852_v63  ;;  %v566_v62 = vld [vmem:[#allocation2 + $0x1030] sm:$0xff]  ;;  %v3120_v63 = vpack.c.bf16 %v575_v56, %v567_v55  ;;  %v2874_v5 = vpack.c.bf16 %v572_v61, %v564_v60  ;;  %v3138_v56 = vpack.c.bf16 %v638_v50, %v630_v48  ;;  %v733_v48 = vld [vmem:[#allocation2 + $0x1568] sm:$0xff]  ;;  %v735_v50 = vld [vmem:[#allocation2 + $0x1578] sm:$0xff] }
 0x18f   :  { %3101 = vmatprep.subr.bf16.mxu1 %v3100_v3  ;;  %v583_v3 = vld [vmem:[#allocation2 + $0x10b8] sm:$0xff]  ;;  %v3122_v6 = vpack.c.bf16 %v574_v0, %v566_v62  ;;  %v646_v60 = vld [vmem:[#allocation2 + $0x12b0] sm:$0xff]  ;;  %v3140_v61 = vpack.c.bf16 %v655_v54, %v647_v53  ;;  %v669_v0 = vld [vmem:[#allocation2 + $0x1368] sm:$0xff] }
 0x190   :  { %v654_v62 = vld [vmem:[#allocation2 + $0x12f0] sm:$0xff]  ;;  %v724_v54 = vld [vmem:[#allocation2 + $0x1520] sm:$0xff] }
 0x191   :  { %2855 = vmatpush1.bf16.msra.mxu0 %v2854_v9  ;;  %v588_v9 = vld [vmem:[#allocation2 + $0x10e0] sm:$0xff] }
 0x192   :  { %3103 = vmatpush1.bf16.msra.mxu1 %v3102_v10  ;;  %2857 = vmatprep.subr.bf16.mxu0 %v2856_v11  ;;  %v582_v10 = vld [vmem:[#allocation2 + $0x10b0] sm:$0xff]  ;;  %v3124_v11 = vpack.c.bf16 %v591_v4, %v583_v3  ;;  %v2878_v18 = vpack.c.bf16 %v588_v9, %v580_v8  ;;  %v3142_v4 = vpack.c.bf16 %v654_v62, %v646_v60  ;;  %v749_v60 = vld [vmem:[#allocation2 + $0x15e8] sm:$0xff]  ;;  %v751_v62 = vld [vmem:[#allocation2 + $0x15f8] sm:$0xff] }
 0x193   :  { %3105 = vmatprep.subr.bf16.mxu1 %v3104_v15  ;;  %v3279_v15 = vld [vmem:[%s3476_s0 + $0x10] sm:$0xff]  ;;  %v3126_v19 = vpack.c.bf16 %v590_v12, %v582_v10  ;;  %v3144_v9 = vpack.c.bf16 %v671_v2, %v663_v1  ;;  %v685_v12 = vld [vmem:[#allocation2 + $0x13e8] sm:$0xff]  ;;  %v740_v2 = vld [vmem:[#allocation2 + $0x15a0] sm:$0xff] }
 0x194   :  { %v662_v8 = vld [vmem:[#allocation2 + $0x1330] sm:$0xff] }
 0x195   :  { %2859 = vmatpush1.bf16.msra.mxu0 %v2858_v21  ;;  %v596_v21 = vld [vmem:[#allocation2 + $0x1120] sm:$0xff]  ;;  %v670_v10 = vld [vmem:[#allocation2 + $0x1370] sm:$0xff] }
 0x196   :  { %3107 = vmatpush1.bf16.msra.mxu1 %v3106_v22  ;;  %2861 = vmatprep.subr.bf16.mxu0 %v2860_v23  ;;  %v604_v22 = vld [vmem:[#allocation2 + $0x1160] sm:$0xff]  ;;  %v598_v23 = vld [vmem:[#allocation2 + $0x1130] sm:$0xff]  ;;  %v3146_v16 = vpack.c.bf16 %v670_v10, %v662_v8  ;;  %v765_v8 = vld [vmem:[#allocation2 + $0x1668] sm:$0xff] }
 0x197   :  { %3109 = vmatprep.subr.bf16.mxu1 %v3108_v27  ;;  %v621_v27 = vld [vmem:[#allocation2 + $0x11e8] sm:$0xff]  ;;  %v2882_v31 = vpack.c.bf16 %v604_v22, %v596_v21  ;;  %v3130_v32 = vpack.c.bf16 %v606_v25, %v598_v23  ;;  %v3148_v21 = vpack.c.bf16 %v687_v14, %v679_v13  ;;  %v686_v22 = vld [vmem:[#allocation2 + $0x13f0] sm:$0xff]  ;;  %v695_v25 = vld [vmem:[#allocation2 + $0x1438] sm:$0xff] }
 0x198   :  { %v693_v23 = vld [vmem:[#allocation2 + $0x1428] sm:$0xff]  ;;  %v767_v10 = vld [vmem:[#allocation2 + $0x1678] sm:$0xff]  ;;  %v756_v14 = vld [vmem:[#allocation2 + $0x1620] sm:$0xff] }
 0x199   :  { %2863 = vmatpush1.bf16.msra.mxu0 %v2862_v33  ;;  %v2884_v33 = vpack.c.bf16 %v621_v27, %v613_v26  ;;  %v703_v26 = vld [vmem:[#allocation2 + $0x1478] sm:$0xff] }
 0x19a   :  { %3111 = vmatpush1.bf16.msra.mxu1 %v3110_v34  ;;  %2865 = vmatprep.subr.bf16.mxu0 %v2864_v35  ;;  %v612_v34 = vld [vmem:[#allocation2 + $0x11a0] sm:$0xff] }
 0x19b   :  { %3113 = vmatprep.subr.bf16.mxu1 %v3112_v39  ;;  %v620_v35 = vld [vmem:[#allocation2 + $0x11e0] sm:$0xff]  ;;  %v629_v39 = vld [vmem:[#allocation2 + $0x1228] sm:$0xff] }
 0x19c   :  { %v2886_v43 = vpack.c.bf16 %v620_v35, %v612_v34  ;;  %v702_v34 = vld [vmem:[#allocation2 + $0x1470] sm:$0xff]  ;;  %v709_v35 = vld [vmem:[#allocation2 + $0x14a8] sm:$0xff] }
 0x19d   :  { %2867 = vmatpush1.bf16.msra.mxu0 %v2866_v45  ;;  %v2888_v45 = vpack.c.bf16 %v637_v40, %v629_v39  ;;  %v2908_v41 = vpack.c.bf16 %v717_v36, %v709_v35 }
 0x19e   :  { %3115 = vmatpush1.bf16.msra.mxu1 %v3114_v46  ;;  %2869 = vmatprep.subr.bf16.mxu0 %v2868_v47  ;;  %v628_v46 = vld [vmem:[#allocation2 + $0x1220] sm:$0xff] }
 0x19f   :  { %3117 = vmatprep.subr.bf16.mxu1 %v3116_v51  ;;  %v636_v47 = vld [vmem:[#allocation2 + $0x1260] sm:$0xff]  ;;  %v645_v51 = vld [vmem:[#allocation2 + $0x12a8] sm:$0xff] }
 0x1a0   :  { %v2890_v55 = vpack.c.bf16 %v636_v47, %v628_v46  ;;  %v718_v46 = vld [vmem:[#allocation2 + $0x14f0] sm:$0xff]  ;;  %v725_v47 = vld [vmem:[#allocation2 + $0x1528] sm:$0xff] }
 0x1a1   :  { %2871 = vmatpush1.bf16.msra.mxu0 %v2870_v57  ;;  %v2892_v57 = vpack.c.bf16 %v653_v52, %v645_v51  ;;  %v2912_v53 = vpack.c.bf16 %v733_v48, %v725_v47 }
 0x1a2   :  { %3119 = vmatpush1.bf16.msra.mxu1 %v3118_v58  ;;  %2873 = vmatprep.subr.bf16.mxu0 %v2872_v59  ;;  %v644_v58 = vld [vmem:[#allocation2 + $0x12a0] sm:$0xff] }
 0x1a3   :  { %3121 = vmatprep.subr.bf16.mxu1 %v3120_v63  ;;  %v652_v59 = vld [vmem:[#allocation2 + $0x12e0] sm:$0xff]  ;;  %v661_v63 = vld [vmem:[#allocation2 + $0x1328] sm:$0xff] }
 0x1a4   :  { %1798 = vmatmul.mubr.f32.vlgmr.msra.gmra.mrb[2].mxu0 %v3279_v15  ;;  %v2894_v3 = vpack.c.bf16 %v652_v59, %v644_v58  ;;  %v734_v58 = vld [vmem:[#allocation2 + $0x1570] sm:$0xff]  ;;  %v741_v59 = vld [vmem:[#allocation2 + $0x15a8] sm:$0xff] }
 0x1a5   :  { %2875 = vmatpush1.bf16.msra.mxu0 %v2874_v5  ;;  %2082 = vmatmul.mubr.f32.vlgmr.msra.gmra.mrb[2].mxu1 %v3279_v15  ;;  %v2896_v5 = vpack.c.bf16 %v669_v0, %v661_v63  ;;  %v2916_v1 = vpack.c.bf16 %v749_v60, %v741_v59 }
 0x1a6   :  { %3123 = vmatpush1.bf16.msra.mxu1 %v3122_v6  ;;  %2877 = vmatprep.subr.bf16.mxu0 %v2876_v7  ;;  %v660_v6 = vld [vmem:[#allocation2 + $0x1320] sm:$0xff] }
 0x1a7   :  { %3125 = vmatprep.subr.bf16.mxu1 %v3124_v11  ;;  %1868 = vmatprep.mubr.f32.mxu0 %v3280_v28  ;;  %v668_v7 = vld [vmem:[#allocation2 + $0x1360] sm:$0xff]  ;;  %v677_v11 = vld [vmem:[#allocation2 + $0x13a8] sm:$0xff] }
 0x1a8   :  { %2152 = vmatprep.mubr.f32.mxu1 %v3280_v28  ;;  %v2898_v15 = vpack.c.bf16 %v668_v7, %v660_v6  ;;  %v2900_v17 = vpack.c.bf16 %v685_v12, %v677_v11  ;;  %v750_v6 = vld [vmem:[#allocation2 + $0x15f0] sm:$0xff]  ;;  %v757_v7 = vld [vmem:[#allocation2 + $0x1628] sm:$0xff] }
 0x1a9   :  { %2879 = vmatpush1.bf16.msra.mxu0 %v2878_v18  ;;  %v676_v18 = vld [vmem:[#allocation2 + $0x13a0] sm:$0xff]  ;;  %v2920_v13 = vpack.c.bf16 %v765_v8, %v757_v7 }
 0x1aa   :  { %3127 = vmatpush1.bf16.msra.mxu1 %v3126_v19  ;;  %2881 = vmatprep.subr.bf16.mxu0 %v2880_v20  ;;  %v684_v19 = vld [vmem:[#allocation2 + $0x13e0] sm:$0xff]  ;;  %v678_v20 = vld [vmem:[#allocation2 + $0x13b0] sm:$0xff] }
 0x1ab   :  { %3129 = vmatprep.subr.bf16.mxu1 %v3128_v24  ;;  %v701_v24 = vld [vmem:[#allocation2 + $0x1468] sm:$0xff]  ;;  %v2902_v27 = vpack.c.bf16 %v684_v19, %v676_v18  ;;  %v3150_v28 = vpack.c.bf16 %v686_v22, %v678_v20  ;;  %v766_v18 = vld [vmem:[#allocation2 + $0x1670] sm:$0xff]  ;;  %v783_v22 = vld [vmem:[#allocation2 + $0x16f8] sm:$0xff] }
 0x1ac   :  { %v2904_v29 = vpack.c.bf16 %v701_v24, %v693_v23  ;;  %v773_v19 = vld [vmem:[#allocation2 + $0x16a8] sm:$0xff] }
 0x1ad   :  { %2883 = vmatpush1.bf16.msra.mxu0 %v2882_v31  ;;  %v700_v31 = vld [vmem:[#allocation2 + $0x1460] sm:$0xff]  ;;  %v781_v20 = vld [vmem:[#allocation2 + $0x16e8] sm:$0xff] }
 0x1ae   :  { %3131 = vmatpush1.bf16.msra.mxu1 %v3130_v32  ;;  %2885 = vmatprep.subr.bf16.mxu0 %v2884_v33  ;;  %v694_v32 = vld [vmem:[#allocation2 + $0x1430] sm:$0xff]  ;;  %v3152_v33 = vpack.c.bf16 %v703_v26, %v695_v25  ;;  %v2906_v39 = vpack.c.bf16 %v700_v31, %v692_v30  ;;  %v2924_v25 = vpack.c.bf16 %v781_v20, %v773_v19  ;;  %v772_v26 = vld [vmem:[#allocation2 + $0x16a0] sm:$0xff]  ;;  %v789_v31 = vld [vmem:[#allocation2 + $0x1728] sm:$0xff] }
 0x1af   :  { %3133 = vmatprep.subr.bf16.mxu1 %v3132_v37  ;;  %v711_v37 = vld [vmem:[#allocation2 + $0x14b8] sm:$0xff]  ;;  %v3154_v40 = vpack.c.bf16 %v702_v34, %v694_v32  ;;  %v782_v30 = vld [vmem:[#allocation2 + $0x16f0] sm:$0xff]  ;;  %v797_v32 = vld [vmem:[#allocation2 + $0x1768] sm:$0xff] }
 0x1b0   :  { %v799_v34 = vld [vmem:[#allocation2 + $0x1778] sm:$0xff] }
 0x1b1   :  { %2887 = vmatpush1.bf16.msra.mxu0 %v2886_v43  ;;  %v716_v43 = vld [vmem:[#allocation2 + $0x14e0] sm:$0xff]  ;;  %v863_v19 = vld [vmem:[#allocation2 + $0x1978] sm:$0xff] }
 0x1b2   :  { %3135 = vmatpush1.bf16.msra.mxu1 %v3134_v44  ;;  %2889 = vmatprep.subr.bf16.mxu0 %v2888_v45  ;;  %v710_v44 = vld [vmem:[#allocation2 + $0x14b0] sm:$0xff]  ;;  %v3156_v45 = vpack.c.bf16 %v719_v38, %v711_v37  ;;  %v2910_v51 = vpack.c.bf16 %v716_v43, %v708_v42  ;;  %v2928_v37 = vpack.c.bf16 %v797_v32, %v789_v31  ;;  %v788_v38 = vld [vmem:[#allocation2 + $0x1720] sm:$0xff]  ;;  %v805_v43 = vld [vmem:[#allocation2 + $0x17a8] sm:$0xff] }
 0x1b3   :  { %3137 = vmatprep.subr.bf16.mxu1 %v3136_v49  ;;  %v727_v49 = vld [vmem:[#allocation2 + $0x1538] sm:$0xff]  ;;  %v3158_v52 = vpack.c.bf16 %v718_v46, %v710_v44  ;;  %v798_v42 = vld [vmem:[#allocation2 + $0x1770] sm:$0xff]  ;;  %v813_v44 = vld [vmem:[#allocation2 + $0x17e8] sm:$0xff] }
 0x1b4   :  { %v815_v46 = vld [vmem:[#allocation2 + $0x17f8] sm:$0xff] }
 0x1b5   :  { %2891 = vmatpush1.bf16.msra.mxu0 %v2890_v55  ;;  %v732_v55 = vld [vmem:[#allocation2 + $0x1560] sm:$0xff]  ;;  %v3282_v31 = vld [vmem:[%s3476_s0 + $0x38] sm:$0xff] }
 0x1b6   :  { %3139 = vmatpush1.bf16.msra.mxu1 %v3138_v56  ;;  %2893 = vmatprep.subr.bf16.mxu0 %v2892_v57  ;;  %v726_v56 = vld [vmem:[#allocation2 + $0x1530] sm:$0xff]  ;;  %v3160_v57 = vpack.c.bf16 %v735_v50, %v727_v49  ;;  %v2914_v63 = vpack.c.bf16 %v732_v55, %v724_v54  ;;  %v2932_v49 = vpack.c.bf16 %v813_v44, %v805_v43  ;;  %v804_v50 = vld [vmem:[#allocation2 + $0x17a0] sm:$0xff]  ;;  %v821_v55 = vld [vmem:[#allocation2 + $0x1828] sm:$0xff] }
 0x1b7   :  { %3141 = vmatprep.subr.bf16.mxu1 %v3140_v61  ;;  %v743_v61 = vld [vmem:[#allocation2 + $0x15b8] sm:$0xff]  ;;  %v3162_v0 = vpack.c.bf16 %v734_v58, %v726_v56  ;;  %v814_v54 = vld [vmem:[#allocation2 + $0x17f0] sm:$0xff]  ;;  %v829_v56 = vld [vmem:[#allocation2 + $0x1868] sm:$0xff] }
 0x1b8   :  { %v831_v58 = vld [vmem:[#allocation2 + $0x1878] sm:$0xff]  ;;  %v893_v43 = vld [vmem:[#allocation2 + $0x1a68] sm:$0xff] }
 0x1b9   :  { %2895 = vmatpush1.bf16.msra.mxu0 %v2894_v3  ;;  %v748_v3 = vld [vmem:[#allocation2 + $0x15e0] sm:$0xff]  ;;  %v871_v32 = vld [vmem:[#allocation2 + $0x19b8] sm:$0xff] }
 0x1ba   :  { %3143 = vmatpush1.bf16.msra.mxu1 %v3142_v4  ;;  %2897 = vmatprep.subr.bf16.mxu0 %v2896_v5  ;;  %v742_v4 = vld [vmem:[#allocation2 + $0x15b0] sm:$0xff]  ;;  %v3164_v5 = vpack.c.bf16 %v751_v62, %v743_v61  ;;  %v2918_v11 = vpack.c.bf16 %v748_v3, %v740_v2  ;;  %v2936_v61 = vpack.c.bf16 %v829_v56, %v821_v55  ;;  %v820_v62 = vld [vmem:[#allocation2 + $0x1820] sm:$0xff]  ;;  %v837_v3 = vld [vmem:[#allocation2 + $0x18a8] sm:$0xff] }
 0x1bb   :  { %3145 = vmatprep.subr.bf16.mxu1 %v3144_v9  ;;  %v759_v9 = vld [vmem:[#allocation2 + $0x1638] sm:$0xff]  ;;  %v3166_v12 = vpack.c.bf16 %v750_v6, %v742_v4  ;;  %v830_v2 = vld [vmem:[#allocation2 + $0x1870] sm:$0xff]  ;;  %v845_v4 = vld [vmem:[#allocation2 + $0x18e8] sm:$0xff] }
 0x1bc   :  { %v847_v6 = vld [vmem:[#allocation2 + $0x18f8] sm:$0xff]  ;;  %v901_v56 = vld [vmem:[#allocation2 + $0x1aa8] sm:$0xff] }
 0x1bd   :  { %2899 = vmatpush1.bf16.msra.mxu0 %v2898_v15  ;;  %v764_v15 = vld [vmem:[#allocation2 + $0x1660] sm:$0xff] }
 0x1be   :  { %3147 = vmatpush1.bf16.msra.mxu1 %v3146_v16  ;;  %2901 = vmatprep.subr.bf16.mxu0 %v2900_v17  ;;  %v758_v16 = vld [vmem:[#allocation2 + $0x1630] sm:$0xff]  ;;  %v3168_v17 = vpack.c.bf16 %v767_v10, %v759_v9  ;;  %v2922_v23 = vpack.c.bf16 %v764_v15, %v756_v14  ;;  %v2940_v9 = vpack.c.bf16 %v845_v4, %v837_v3  ;;  %v836_v10 = vld [vmem:[#allocation2 + $0x18a0] sm:$0xff]  ;;  %v853_v15 = vld [vmem:[#allocation2 + $0x1928] sm:$0xff] }
 0x1bf   :  { %3149 = vmatprep.subr.bf16.mxu1 %v3148_v21  ;;  %v775_v21 = vld [vmem:[#allocation2 + $0x16b8] sm:$0xff]  ;;  %v3170_v24 = vpack.c.bf16 %v766_v18, %v758_v16  ;;  %v846_v14 = vld [vmem:[#allocation2 + $0x18f0] sm:$0xff]  ;;  %v861_v16 = vld [vmem:[#allocation2 + $0x1968] sm:$0xff] }
 0x1c0   :  { %v855_v18 = vld [vmem:[#allocation2 + $0x1938] sm:$0xff]  ;;  %v900_v3 = vld [vmem:[#allocation2 + $0x1aa0] sm:$0xff] }
 0x1c1   :  { %2903 = vmatpush1.bf16.msra.mxu0 %v2902_v27  ;;  %v780_v27 = vld [vmem:[#allocation2 + $0x16e0] sm:$0xff] }
 0x1c2   :  { %3151 = vmatpush1.bf16.msra.mxu1 %v3150_v28  ;;  %2905 = vmatprep.subr.bf16.mxu0 %v2904_v29  ;;  %v774_v28 = vld [vmem:[#allocation2 + $0x16b0] sm:$0xff]  ;;  %v3172_v29 = vpack.c.bf16 %v783_v22, %v775_v21  ;;  %v2926_v35 = vpack.c.bf16 %v780_v27, %v772_v26  ;;  %v2944_v22 = vpack.c.bf16 %v861_v16, %v853_v15  ;;  %v908_v4 = vld [vmem:[#allocation2 + $0x1ae0] sm:$0xff] }
 0x1c3   :  { %3153 = vmatprep.subr.bf16.mxu1 %v3152_v33  ;;  %v791_v33 = vld [vmem:[#allocation2 + $0x1738] sm:$0xff]  ;;  %v3174_v36 = vpack.c.bf16 %v782_v30, %v774_v28  ;;  %v3192_v26 = vpack.c.bf16 %v863_v19, %v855_v18  ;;  %v862_v27 = vld [vmem:[#allocation2 + $0x1970] sm:$0xff]  ;;  %v869_v28 = vld [vmem:[#allocation2 + $0x19a8] sm:$0xff]  ;;  %v1050_v30 = vlaneseq  ;;  %v2958_v16 = vpack.c.bf16 %v908_v4, %v900_v3 }
 0x1c4   :  { %v966_v3 = vld [vmem:[#allocation2 + $0x1cb0] sm:$0xff] }
 0x1c5   :  { %2907 = vmatpush1.bf16.msra.mxu0 %v2906_v39  ;;  %v796_v39 = vld [vmem:[#allocation2 + $0x1760] sm:$0xff]  ;;  %v3429_v44 = vshrl.u32 %v1050_v30, 7 }
 0x1c6   :  { %3155 = vmatpush1.bf16.msra.mxu1 %v3154_v40  ;;  %2909 = vmatprep.subr.bf16.mxu0 %v2908_v41  ;;  %v790_v40 = vld [vmem:[#allocation2 + $0x1730] sm:$0xff]  ;;  %v3176_v41 = vpack.c.bf16 %v799_v34, %v791_v33  ;;  %v2930_v47 = vpack.c.bf16 %v796_v39, %v788_v38  ;;  %v879_v33 = vld [vmem:[#allocation2 + $0x19f8] sm:$0xff]  ;;  %v876_v38 = vld [vmem:[#allocation2 + $0x19e0] sm:$0xff] }
 0x1c7   :  { %3157 = vmatprep.subr.bf16.mxu1 %v3156_v45  ;;  %v807_v45 = vld [vmem:[#allocation2 + $0x17b8] sm:$0xff]  ;;  %v3178_v48 = vpack.c.bf16 %v798_v42, %v790_v40  ;;  %v870_v39 = vld [vmem:[#allocation2 + $0x19b0] sm:$0xff]  ;;  %v3196_v40 = vpack.c.bf16 %v879_v33, %v871_v32  ;;  %v885_v42 = vld [vmem:[#allocation2 + $0x1a28] sm:$0xff]  ;;  %v1052_v55 = vsub.s32 0, %v3429_v44 }
 0x1c8   :  { %v935_v33 = vld [vmem:[#allocation2 + $0x1bb8] sm:$0xff] }
 0x1c9   :  { %2911 = vmatpush1.bf16.msra.mxu0 %v2910_v51  ;;  %v812_v51 = vld [vmem:[#allocation2 + $0x17e0] sm:$0xff] }
 0x1ca   :  { %3159 = vmatpush1.bf16.msra.mxu1 %v3158_v52  ;;  %2913 = vmatprep.subr.bf16.mxu0 %v2912_v53  ;;  %v806_v52 = vld [vmem:[#allocation2 + $0x17b0] sm:$0xff]  ;;  %v3180_v53 = vpack.c.bf16 %v815_v46, %v807_v45  ;;  %v2934_v59 = vpack.c.bf16 %v812_v51, %v804_v50  ;;  %v887_v45 = vld [vmem:[#allocation2 + $0x1a38] sm:$0xff]  ;;  %v884_v50 = vld [vmem:[#allocation2 + $0x1a20] sm:$0xff] }
 0x1cb   :  { %3161 = vmatprep.subr.bf16.mxu1 %v3160_v57  ;;  %v823_v57 = vld [vmem:[#allocation2 + $0x1838] sm:$0xff]  ;;  %v3182_v60 = vpack.c.bf16 %v814_v54, %v806_v52  ;;  %v892_v51 = vld [vmem:[#allocation2 + $0x1a60] sm:$0xff]  ;;  %v886_v52 = vld [vmem:[#allocation2 + $0x1a30] sm:$0xff] }
 0x1cc   :  { %v895_v46 = vld [vmem:[#allocation2 + $0x1a78] sm:$0xff]  ;;  %v894_v54 = vld [vmem:[#allocation2 + $0x1a70] sm:$0xff] }
 0x1cd   :  { %2915 = vmatpush1.bf16.msra.mxu0 %v2914_v63  ;;  %v828_v63 = vld [vmem:[#allocation2 + $0x1860] sm:$0xff] }
 0x1ce   :  { %3163 = vmatpush1.bf16.msra.mxu1 %v3162_v0  ;;  %2917 = vmatprep.subr.bf16.mxu0 %v2916_v1  ;;  %v822_v0 = vld [vmem:[#allocation2 + $0x1830] sm:$0xff]  ;;  %v3184_v1 = vpack.c.bf16 %v831_v58, %v823_v57  ;;  %v2938_v7 = vpack.c.bf16 %v828_v63, %v820_v62  ;;  %v909_v57 = vld [vmem:[#allocation2 + $0x1ae8] sm:$0xff]  ;;  %v3432_v58 = vld [vmem:[#allocation4] sm:$0xff]  ;;  %v2954_v63 = vpack.c.bf16 %v892_v51, %v884_v50 }
 0x1cf   :  { %3165 = vmatprep.subr.bf16.mxu1 %v3164_v5  ;;  %v839_v5 = vld [vmem:[#allocation2 + $0x18b8] sm:$0xff]  ;;  %v3186_v8 = vpack.c.bf16 %v830_v2, %v822_v0  ;;  %v1064_v0 = vsub.s32 3, %v3429_v44  ;;  %v2956_v2 = vpack.c.bf16 %v909_v57, %v901_v56  ;;  %v958_v56 = vld [vmem:[#allocation2 + $0x1c70] sm:$0xff]  ;;  %v965_v57 = vld [vmem:[#allocation2 + $0x1ca8] sm:$0xff] }
 0x1d0   :  { %v911_v62 = vld [vmem:[#allocation2 + $0x1af8] sm:$0xff] }
 0x1d1   :  { %2919 = vmatpush1.bf16.msra.mxu0 %v2918_v11  ;;  %v844_v11 = vld [vmem:[#allocation2 + $0x18e0] sm:$0xff]  ;;  %v1065_v15 = vrot.slane %v3432_v58, %v1064_v0 }
 0x1d2   :  { %3167 = vmatpush1.bf16.msra.mxu1 %v3166_v12  ;;  %2921 = vmatprep.subr.bf16.mxu0 %v2920_v13  ;;  %v838_v12 = vld [vmem:[#allocation2 + $0x18b0] sm:$0xff]  ;;  %v3188_v13 = vpack.c.bf16 %v847_v6, %v839_v5  ;;  %v2942_v20 = vpack.c.bf16 %v844_v11, %v836_v10  ;;  %v1053_v6 = vrot.slane %v3432_v58, %v1052_v55  ;;  %v925_v10 = vld [vmem:[#allocation2 + $0x1b68] sm:$0xff] }
 0x1d3   :  { %3169 = vmatprep.subr.bf16.mxu1 %v3168_v17  ;;  %v3281_v17 = vld [vmem:[%s3476_s0 + $0x20] sm:$0xff]  ;;  %v3190_v21 = vpack.c.bf16 %v846_v14, %v838_v12  ;;  %v902_v5 = vld [vmem:[#allocation2 + $0x1ab0] sm:$0xff]  ;;  %v927_v14 = vld [vmem:[#allocation2 + $0x1b78] sm:$0xff] }
 0x1d5   :  { %2923 = vmatpush1.bf16.msra.mxu0 %v2922_v23  ;;  %v852_v23 = vld [vmem:[#allocation2 + $0x1920] sm:$0xff] }
 0x1d6   :  { %3171 = vmatpush1.bf16.msra.mxu1 %v3170_v24  ;;  %2925 = vmatprep.subr.bf16.mxu0 %v2924_v25  ;;  %v860_v24 = vld [vmem:[#allocation2 + $0x1960] sm:$0xff]  ;;  %v854_v25 = vld [vmem:[#allocation2 + $0x1930] sm:$0xff] }
 0x1d7   :  { %3173 = vmatprep.subr.bf16.mxu1 %v3172_v29  ;;  %v877_v29 = vld [vmem:[#allocation2 + $0x19e8] sm:$0xff]  ;;  %v2946_v34 = vpack.c.bf16 %v860_v24, %v852_v23 }
 0x1d9   :  { %2927 = vmatpush1.bf16.msra.mxu0 %v2926_v35  ;;  %v3194_v35 = vpack.c.bf16 %v862_v27, %v854_v25  ;;  %v926_v27 = vld [vmem:[#allocation2 + $0x1b70] sm:$0xff] }
 0x1da   :  { %3175 = vmatpush1.bf16.msra.mxu1 %v3174_v36  ;;  %2929 = vmatprep.subr.bf16.mxu0 %v2928_v37  ;;  %v2948_v36 = vpack.c.bf16 %v877_v29, %v869_v28  ;;  %v868_v37 = vld [vmem:[#allocation2 + $0x19a0] sm:$0xff]  ;;  %v933_v28 = vld [vmem:[#allocation2 + $0x1ba8] sm:$0xff] }
 0x1db   :  { %3177 = vmatprep.subr.bf16.mxu1 %v3176_v41  ;;  %v878_v41 = vld [vmem:[#allocation2 + $0x19f0] sm:$0xff]  ;;  %v941_v29 = vld [vmem:[#allocation2 + $0x1be8] sm:$0xff] }
 0x1dd   :  { %2931 = vmatpush1.bf16.msra.mxu0 %v2930_v47  ;;  %v2950_v47 = vpack.c.bf16 %v876_v38, %v868_v37  ;;  %v2964_v38 = vpack.c.bf16 %v941_v29, %v933_v28  ;;  %v1006_v29 = vld [vmem:[#allocation2 + $0x1df0] sm:$0xff] }
 0x1de   :  { %3179 = vmatpush1.bf16.msra.mxu1 %v3178_v48  ;;  %2933 = vmatprep.subr.bf16.mxu0 %v2932_v49  ;;  %v3198_v48 = vpack.c.bf16 %v878_v41, %v870_v39  ;;  %v2952_v49 = vpack.c.bf16 %v893_v43, %v885_v42  ;;  %v932_v39 = vld [vmem:[#allocation2 + $0x1ba0] sm:$0xff]  ;;  %v934_v41 = vld [vmem:[#allocation2 + $0x1bb0] sm:$0xff] }
 0x1df   :  { %3181 = vmatprep.subr.bf16.mxu1 %v3180_v53  ;;  %v3200_v53 = vpack.c.bf16 %v895_v46, %v887_v45  ;;  %v942_v43 = vld [vmem:[#allocation2 + $0x1bf0] sm:$0xff]  ;;  %v949_v45 = vld [vmem:[#allocation2 + $0x1c28] sm:$0xff] }
 0x1e0   :  { %v957_v46 = vld [vmem:[#allocation2 + $0x1c68] sm:$0xff]  ;;  %v3214_v50 = vpack.c.bf16 %v942_v43, %v934_v41  ;;  %v1022_v41 = vld [vmem:[#allocation2 + $0x1e70] sm:$0xff] }
 0x1e1   :  { %2935 = vmatpush1.bf16.msra.mxu0 %v2934_v59  ;;  %v1060_v59 = vsub.s32 2, %v3429_v44  ;;  %v2968_v51 = vpack.c.bf16 %v957_v46, %v949_v45  ;;  %v1037_v43 = vld [vmem:[#allocation2 + $0x1ee8] sm:$0xff]  ;;  %v1031_v45 = vld [vmem:[#allocation2 + $0x1eb8] sm:$0xff] }
 0x1e2   :  { %3183 = vmatpush1.bf16.msra.mxu1 %v3182_v60  ;;  %2937 = vmatprep.subr.bf16.mxu0 %v2936_v61  ;;  %v1056_v60 = vsub.s32 1, %v3429_v44  ;;  %v903_v61 = vld [vmem:[#allocation2 + $0x1ab8] sm:$0xff] }
 0x1e3   :  { %3185 = vmatprep.subr.bf16.mxu1 %v3184_v1  ;;  %v3202_v1 = vpack.c.bf16 %v894_v54, %v886_v52  ;;  %v1061_v11 = vrot.slane %v3432_v58, %v1060_v59  ;;  %v948_v52 = vld [vmem:[#allocation2 + $0x1c20] sm:$0xff]  ;;  %v950_v54 = vld [vmem:[#allocation2 + $0x1c30] sm:$0xff]  ;;  %v973_v59 = vld [vmem:[#allocation2 + $0x1ce8] sm:$0xff] }
 0x1e4   :  { %1869 = vmatmul.mubr.f32.vlgmr.msra.gmra.mrb[2].mxu0 %v3281_v17  ;;  %v1057_v12 = vrot.slane %v3432_v58, %v1056_v60  ;;  %v967_v60 = vld [vmem:[#allocation2 + $0x1cb8] sm:$0xff]  ;;  %v2972_v0 = vpack.c.bf16 %v973_v59, %v965_v57  ;;  %v1045_v57 = vld [vmem:[#allocation2 + $0x1f28] sm:$0xff] }
 0x1e5   :  { %2939 = vmatpush1.bf16.msra.mxu0 %v2938_v7  ;;  %2153 = vmatmul.mubr.f32.vlgmr.msra.gmra.mrb[2].mxu1 %v3281_v17  ;;  %v3204_v7 = vpack.c.bf16 %v911_v62, %v903_v61  ;;  %v975_v61 = vld [vmem:[#allocation2 + $0x1cf8] sm:$0xff] }
 0x1e6   :  { %3187 = vmatpush1.bf16.msra.mxu1 %v3186_v8  ;;  %2941 = vmatprep.subr.bf16.mxu0 %v2940_v9  ;;  %v910_v8 = vld [vmem:[#allocation2 + $0x1af0] sm:$0xff]  ;;  %v917_v9 = vld [vmem:[#allocation2 + $0x1b28] sm:$0xff]  ;;  %v3220_v4 = vpack.c.bf16 %v975_v61, %v967_v60  ;;  %v1039_v46 = vld [vmem:[#allocation2 + $0x1ef8] sm:$0xff] }
 0x1e7   :  { %3189 = vmatprep.subr.bf16.mxu1 %v3188_v13  ;;  %2246 = vmatprep.mubr.msk.f32.mxu0 %vm1090_vm0, %v3282_v31  ;;  %v919_v13 = vld [vmem:[#allocation2 + $0x1b38] sm:$0xff]  ;;  %v3206_v18 = vpack.c.bf16 %v910_v8, %v902_v5  ;;  %v2960_v19 = vpack.c.bf16 %v925_v10, %v917_v9  ;;  %v974_v5 = vld [vmem:[#allocation2 + $0x1cf0] sm:$0xff]  ;;  %v1044_v60 = vld [vmem:[#allocation2 + $0x1f20] sm:$0xff] }
 0x1e8   :  { %2247 = vmatprep.mubr.msk.f32.mxu1 %vm1090_vm0, %v3282_v31  ;;  %v983_v8 = vld [vmem:[#allocation2 + $0x1d38] sm:$0xff]  ;;  %v1046_v61 = vld [vmem:[#allocation2 + $0x1f30] sm:$0xff] }
 0x1e9   :  { %2943 = vmatpush1.bf16.msra.mxu0 %v2942_v20  ;;  %v916_v20 = vld [vmem:[#allocation2 + $0x1b20] sm:$0xff]  ;;  %v991_v9 = vld [vmem:[#allocation2 + $0x1d78] sm:$0xff] }
 0x1ea   :  { %3191 = vmatpush1.bf16.msra.mxu1 %v3190_v21  ;;  %2945 = vmatprep.subr.bf16.mxu0 %v2944_v22  ;;  %v924_v21 = vld [vmem:[#allocation2 + $0x1b60] sm:$0xff]  ;;  %v918_v22 = vld [vmem:[#allocation2 + $0x1b30] sm:$0xff]  ;;  %v1047_v59 = vld [vmem:[#allocation2 + $0x1f38] sm:$0xff] }
 0x1eb   :  { %3193 = vmatprep.subr.bf16.mxu1 %v3192_v26  ;;  %v3208_v26 = vpack.c.bf16 %v927_v14, %v919_v13  ;;  %v3210_v37 = vpack.c.bf16 %v926_v27, %v918_v22  ;;  %v980_v13 = vld [vmem:[#allocation2 + $0x1d20] sm:$0xff]  ;;  %v998_v27 = vld [vmem:[#allocation2 + $0x1db0] sm:$0xff] }
 0x1ec   :  { %v988_v14 = vld [vmem:[#allocation2 + $0x1d60] sm:$0xff] }
 0x1ed   :  { %2947 = vmatpush1.bf16.msra.mxu0 %v2946_v34  ;;  %v943_v34 = vld [vmem:[#allocation2 + $0x1bf8] sm:$0xff]  ;;  %v2978_v22 = vpack.c.bf16 %v988_v14, %v980_v13 }
 0x1ee   :  { %3195 = vmatpush1.bf16.msra.mxu1 %v3194_v35  ;;  %2949 = vmatprep.subr.bf16.mxu0 %v2948_v36  ;;  %v2962_v36 = vpack.c.bf16 %v924_v21, %v916_v20  ;;  %v3212_v42 = vpack.c.bf16 %v943_v34, %v935_v33  ;;  %v999_v20 = vld [vmem:[#allocation2 + $0x1db8] sm:$0xff] }
 0x1ef   :  { %3197 = vmatprep.subr.bf16.mxu1 %v3196_v40  ;;  %v940_v40 = vld [vmem:[#allocation2 + $0x1be0] sm:$0xff]  ;;  %v1007_v21 = vld [vmem:[#allocation2 + $0x1df8] sm:$0xff] }
 0x1f0   :  { %v3228_v28 = vpack.c.bf16 %v1007_v21, %v999_v20  ;;  %v1023_v33 = vld [vmem:[#allocation2 + $0x1e78] sm:$0xff] }
 0x1f1   :  { %2951 = vmatpush1.bf16.msra.mxu0 %v2950_v47  ;;  %v951_v47 = vld [vmem:[#allocation2 + $0x1c38] sm:$0xff] }
 0x1f2   :  { %3199 = vmatpush1.bf16.msra.mxu1 %v3198_v48  ;;  %2953 = vmatprep.subr.bf16.mxu0 %v2952_v49  ;;  %v959_v48 = vld [vmem:[#allocation2 + $0x1c78] sm:$0xff]  ;;  %v2966_v49 = vpack.c.bf16 %v940_v40, %v932_v39  ;;  %v1014_v39 = vld [vmem:[#allocation2 + $0x1e30] sm:$0xff] }
 0x1f3   :  { %3201 = vmatprep.subr.bf16.mxu1 %v3200_v53  ;;  %v956_v53 = vld [vmem:[#allocation2 + $0x1c60] sm:$0xff]  ;;  %v3216_v55 = vpack.c.bf16 %v959_v48, %v951_v47  ;;  %v3234_v48 = vpack.c.bf16 %v1022_v41, %v1014_v39 }
 0x1f4   :  { %v2970_v62 = vpack.c.bf16 %v956_v53, %v948_v52  ;;  %v3236_v52 = vpack.c.bf16 %v1039_v46, %v1031_v45  ;;  %v1030_v53 = vld [vmem:[#allocation2 + $0x1eb0] sm:$0xff] }
 0x1f5   :  { %2955 = vmatpush1.bf16.msra.mxu0 %v2954_v63  ;;  %v3218_v63 = vpack.c.bf16 %v958_v56, %v950_v54  ;;  %v1038_v54 = vld [vmem:[#allocation2 + $0x1ef0] sm:$0xff] }
 0x1f6   :  { %3203 = vmatpush1.bf16.msra.mxu1 %v3202_v1  ;;  %v1373_v17 = vpop.f32.mrb[0].mxu0  ;;  %2957 = vmatprep.subr.bf16.mxu0 %v2956_v2  ;;  %v964_v1 = vld [vmem:[#allocation2 + $0x1ca0] sm:$0xff]  ;;  %v3238_v56 = vpack.c.bf16 %v1038_v54, %v1030_v53 }
 0x1f7   :  { %v3240_v23 = vadd.f32 %v1373_v17, %v1053_v6  ;;  %v1657_v24 = vpop.f32.mrb[0].mxu1  ;;  %v1375_v25 = vpop.f32.mrb[1].mxu0  ;;  %3205 = vmatprep.subr.bf16.mxu1 %v3204_v7  ;;  %v972_v2 = vld [vmem:[#allocation2 + $0x1ce0] sm:$0xff]  ;;  %v981_v6 = vld [vmem:[#allocation2 + $0x1d28] sm:$0xff]  ;;  %v990_v17 = vld [vmem:[#allocation2 + $0x1d70] sm:$0xff] }
 0x1f8   :  { %v3242_v30 = vadd.f32 %v1657_v24, %v1061_v11  ;;  %v3241_v31 = vadd.f32 %v1375_v25, %v1057_v12  ;;  %v1659_v32 = vpop.f32.mrb[1].mxu1  ;;  %v989_v7 = vld [vmem:[#allocation2 + $0x1d68] sm:$0xff]  ;;  %v2974_v10 = vpack.c.bf16 %v972_v2, %v964_v1  ;;  %v3222_v11 = vpack.c.bf16 %v974_v5, %v966_v3  ;;  %v996_v25 = vld [vmem:[#allocation2 + $0x1da0] sm:$0xff] }
 0x1f9   :  { %2230 = vst [vmem:[%s3479_s3] sm:$0xff] %v3240_v23  ;;  %v3243_v35 = vadd.f32 %v1659_v32, %v1065_v15  ;;  %2959 = vmatpush1.bf16.msra.mxu0 %v2958_v16  ;;  %v2976_v12 = vpack.c.bf16 %v989_v7, %v981_v6  ;;  %v982_v15 = vld [vmem:[#allocation2 + $0x1d30] sm:$0xff]  ;;  %v3224_v16 = vpack.c.bf16 %v991_v9, %v983_v8  ;;  %v1015_v32 = vld [vmem:[#allocation2 + $0x1e38] sm:$0xff]  ;;  %v1072_v1 = vsub.s32 5, %v3429_v44 }
 0x1fa   :  { %2232 = vst [vmem:[%s3479_s3 + $0x10] sm:$0xff] %v3242_v30  ;;  %2231 = vst [vmem:[%s3479_s3 + $0x8] sm:$0xff] %v3241_v31  ;;  %3207 = vmatpush1.bf16.msra.mxu1 %v3206_v18  ;;  %2961 = vmatprep.subr.bf16.mxu0 %v2960_v19  ;;  %v997_v18 = vld [vmem:[#allocation2 + $0x1da8] sm:$0xff]  ;;  %v3226_v23 = vpack.c.bf16 %v990_v17, %v982_v15  ;;  %v3232_v40 = vpack.c.bf16 %v1023_v33, %v1015_v32  ;;  %v1080_v2 = vsub.s32 7, %v3429_v44 }
 0x1fb   :  { %2233 = vst [vmem:[%s3479_s3 + $0x18] sm:$0xff] %v3243_v35  ;;  %3209 = vmatprep.subr.bf16.mxu1 %v3208_v26  ;;  %v1005_v19 = vld [vmem:[#allocation2 + $0x1de8] sm:$0xff]  ;;  %v1004_v26 = vld [vmem:[#allocation2 + $0x1de0] sm:$0xff]  ;;  %v3230_v35 = vpack.c.bf16 %v1006_v29, %v998_v27  ;;  %v1073_v5 = vrot.slane %v3432_v58, %v1072_v1 }
 0x1fc   :  { %v2980_v24 = vpack.c.bf16 %v1005_v19, %v997_v18  ;;  %v1013_v30 = vld [vmem:[#allocation2 + $0x1e28] sm:$0xff]  ;;  %v2982_v34 = vpack.c.bf16 %v1004_v26, %v996_v25  ;;  %v1081_v6 = vrot.slane %v3432_v58, %v1080_v2 }
 0x1fd   :  { %2963 = vmatpush1.bf16.msra.mxu0 %v2962_v36  ;;  %v1021_v31 = vld [vmem:[#allocation2 + $0x1e68] sm:$0xff] }
 0x1fe   :  { %3211 = vmatpush1.bf16.msra.mxu1 %v3210_v37  ;;  %2965 = vmatprep.subr.bf16.mxu0 %v2964_v38  ;;  %v2984_v36 = vpack.c.bf16 %v1021_v31, %v1013_v30  ;;  %v1012_v37 = vld [vmem:[#allocation2 + $0x1e20] sm:$0xff] }
 0x1ff   :  { %3213 = vmatprep.subr.bf16.mxu1 %v3212_v42  ;;  %v1020_v38 = vld [vmem:[#allocation2 + $0x1e60] sm:$0xff]  ;;  %v1029_v42 = vld [vmem:[#allocation2 + $0x1ea8] sm:$0xff] }
 0x200   :  { %v2986_v47 = vpack.c.bf16 %v1020_v38, %v1012_v37 }
 0x201   :  { %2967 = vmatpush1.bf16.msra.mxu0 %v2966_v49  ;;  %v2988_v49 = vpack.c.bf16 %v1037_v43, %v1029_v42 }
 0x202   :  { %3215 = vmatpush1.bf16.msra.mxu1 %v3214_v50  ;;  %2969 = vmatprep.subr.bf16.mxu0 %v2968_v51  ;;  %v1028_v50 = vld [vmem:[#allocation2 + $0x1ea0] sm:$0xff] }
 0x203   :  { %3217 = vmatprep.subr.bf16.mxu1 %v3216_v55  ;;  %v1036_v51 = vld [vmem:[#allocation2 + $0x1ee0] sm:$0xff] }
 0x204   :  { %v2990_v55 = vpack.c.bf16 %v1036_v51, %v1028_v50 }
 0x205   :  { %2971 = vmatpush1.bf16.msra.mxu0 %v2970_v62  ;;  %v3283_v62 = vld [vmem:[%s3476_s0 + $0x30] sm:$0xff] }
 0x206   :  { %3219 = vmatpush1.bf16.msra.mxu1 %v3218_v63  ;;  %2973 = vmatprep.subr.bf16.mxu0 %v2972_v0  ;;  %v1068_v63 = vsub.s32 4, %v3429_v44  ;;  %v1076_v0 = vsub.s32 6, %v3429_v44 }
 0x207   :  { %3221 = vmatprep.subr.bf16.mxu1 %v3220_v4 }
 0x208   :  { %v1069_v3 = vrot.slane %v3432_v58, %v1068_v63  ;;  %v1077_v4 = vrot.slane %v3432_v58, %v1076_v0 }
 0x209   :  { %2975 = vmatpush1.bf16.msra.mxu0 %v2974_v10 }
 0x20a   :  { %3223 = vmatpush1.bf16.msra.mxu1 %v3222_v11  ;;  %2977 = vmatprep.subr.bf16.mxu0 %v2976_v12 }
 0x20b   :  { %3225 = vmatprep.subr.bf16.mxu1 %v3224_v16 }
 0x20d   :  { %2979 = vmatpush1.bf16.msra.mxu0 %v2978_v22 }
 0x20e   :  { %3227 = vmatpush1.bf16.msra.mxu1 %v3226_v23  ;;  %2981 = vmatprep.subr.bf16.mxu0 %v2980_v24 }
 0x20f   :  { %3229 = vmatprep.subr.bf16.mxu1 %v3228_v28 }
 0x211   :  { %2983 = vmatpush1.bf16.msra.mxu0 %v2982_v34 }
 0x212   :  { %3231 = vmatpush1.bf16.msra.mxu1 %v3230_v35  ;;  %2985 = vmatprep.subr.bf16.mxu0 %v2984_v36 }
 0x213   :  { %3233 = vmatprep.subr.bf16.mxu1 %v3232_v40 }
 0x215   :  { %2987 = vmatpush1.bf16.msra.mxu0 %v2986_v47 }
 0x216   :  { %3235 = vmatpush1.bf16.msra.mxu1 %v3234_v48  ;;  %2989 = vmatprep.subr.bf16.mxu0 %v2988_v49 }
 0x217   :  { %3237 = vmatprep.subr.bf16.mxu1 %v3236_v52 }
 0x219   :  { %2991 = vmatpush1.bf16.msra.mxu0 %v2990_v55 }
 0x21a   :  { %3239 = vmatpush1.bf16.msra.mxu1 %v3238_v56  ;;  %1931 = vmatprep.subr.mxu0 %v1045_v57 }
 0x21b   :  { %2215 = vmatprep.subr.mxu1 %v1047_v59 }
 0x21d   :  { %1932 = vmatpush1.msra.mxu0 %v1044_v60 }
 0x21e   :  { %2216 = vmatpush1.msra.mxu1 %v1046_v61  ;;  %1940 = vmatmul.mubr.f32.vlgmr.msra.gmra.mrb[2].mxu0 %v3283_v62 }
 0x21f   :  { %2224 = vmatmul.mubr.f32.vlgmr.msra.gmra.mrb[2].mxu1 %v3283_v62 }
 0x2f1   :  { %v1941_v7 = vpop.f32.mrb[2].mxu0 }
 0x2f2   :  { %v3244_v8 = vadd.f32 %v1941_v7, %v1069_v3  ;;  %v2225_v9 = vpop.f32.mrb[2].mxu1  ;;  %v1943_v10 = vpop.f32.mrb[3].mxu0 }
 0x2f3   :  { %v3246_v11 = vadd.f32 %v2225_v9, %v1077_v4  ;;  %v3245_v12 = vadd.f32 %v1943_v10, %v1073_v5  ;;  %v2227_v13 = vpop.f32.mrb[3].mxu1 }
 0x2f4   :  { %2234 = vst [vmem:[%s3479_s3 + $0x20] sm:$0xff] %v3244_v8  ;;  %v3247_v44 = vadd.f32 %v2227_v13, %v1081_v6 }
 0x2f5   :  { %2236 = vst [vmem:[%s3479_s3 + $0x30] sm:$0xff] %v3246_v11  ;;  %2235 = vst [vmem:[%s3479_s3 + $0x28] sm:$0xff] %v3245_v12 }
 0x2f6   :  { %2237 = vst [vmem:[%s3479_s3 + $0x38] sm:$0xff] %v3247_v44 }
 0x2f7   :  { %2242 = vsyncpa [#allocation3], 1 }
 0x2f8   :  { %2243 = vsyncpa [#allocation5], 1 }

</bundles_post_ra>
